<compile_context>
chip_gen: v5e
topology: v5e:2x2
jax: 0.10.0
libtpu: 0.0.40
codegen_flags: <defaults>
</compile_context>

<pallas_src>
import numpy as np

import jax
import jax.numpy as jnp
from jax.experimental import pallas as pl
from jax.experimental.pallas import tpu as pltpu


# ------------------------------ Pallas kernel ------------------------------ #

def _gather_kh(act, t, hin, ho, stride, kh, pad=2):
    """Rows [h*t + i] of the result = act row [(stride*h + kh - pad)*t + i],
    or zeros when that input row falls in the conv zero-padding.

    `act` has the h-major layout (row = r*t + i), so every gather is a static,
    t-aligned row slice (free-ish) -- no MXU gather, no strided loads."""
    wc = act.shape[1]
    pieces = []
    h = 0
    while h < ho:
        r = stride * h + kh - pad
        if 0 <= r < hin:
            if stride == 1:
                # merge the maximal contiguous run of valid output rows
                h_end = h
                while h_end < ho and (h_end + kh - pad) < hin:
                    h_end += 1
                pieces.append(act[r * t:(r + (h_end - h)) * t, :])
                h = h_end
            else:
                pieces.append(act[r * t:(r + 1) * t, :])
                h += 1
        else:
            # merge the run of out-of-range (zero-padded) output rows
            h_end = h
            while h_end < ho and not (0 <= stride * h_end + kh - pad < hin):
                h_end += 1
            pieces.append(jnp.zeros(((h_end - h) * t, wc), act.dtype))
            h = h_end
    return pieces[0] if len(pieces) == 1 else jnp.concatenate(pieces, axis=0)


def _conv_layer(act, m_ref, b_ref, t, hin, stride):
    """act: (hin*t, win*cin) bf16  ->  (ho*t, wo*cout) bf16 (sigmoid applied).

    One MXU matmul per layer: the 5 kh taps are packed along the contraction
    axis (K = 5*win*cin), the W-direction stride/pad/channel mix is baked into
    m_ref at prep time."""
    ho = (hin - 1) // stride + 1
    g = jnp.concatenate(
        [_gather_kh(act, t, hin, ho, stride, kh) for kh in range(5)], axis=1)
    z = jnp.dot(g, m_ref[...], preferred_element_type=jnp.float32) + b_ref[...]
    # sigmoid(z) = 1 / (1 + exp(-z)): exp + approx reciprocal both go to the EUP.
    s = pl.reciprocal(1.0 + jnp.exp(-z), approx=True)
    return s.astype(jnp.bfloat16)


def _dlgnet_kernel(x_ref,
                   m1_ref, b1_ref,
                   m2_ref, b2_ref,
                   m3_ref, b3_ref,
                   wfc_ref, bfc_ref,
                   out_ref):
    t = x_ref.shape[1] // 32                       # batch-tile size (static)

    act = x_ref[0]                                 # (32t, 96)
    act = _conv_layer(act, m1_ref, b1_ref, t, 32, 2)   # (16t, 192)
    act = _conv_layer(act, m2_ref, b2_ref, t, 16, 2)   # (8t,   96)
    act = _conv_layer(act, m3_ref, b3_ref, t, 8, 1)    # (8t,   96)

    # FC: assemble (t, 768) features (lane = h*96 + w*12 + c) and do one K=768
    # matmul into a lane-dense (t, 128) logits block (classes padded 10 -> 128).
    feat = jnp.concatenate([act[h * t:(h + 1) * t, :] for h in range(8)], axis=1)
    logits = jnp.dot(feat, wfc_ref[...],
                     preferred_element_type=jnp.float32) + bfc_ref[...]
    out_ref[0] = logits


# -------------------------- One-time weight prep ---------------------------- #

def prepare_params(params):
    """Re-layout PyTorch-style weights into kernel constants (done once).
    Weights are independent of the batch tile size."""

    def conv_matrix(w_oihw, win, stride, pad=2):
        w = np.asarray(w_oihw, np.float32)
        cout, cin, k, _ = w.shape
        wo = (win + 2 * pad - k) // stride + 1
        m = np.zeros((k * win * cin, wo * cout), np.float32)
        for kh in range(k):
            for o in range(wo):
                for kw in range(k):
                    wi = stride * o + kw - pad
                    if 0 <= wi < win:
                        r0 = (kh * win + wi) * cin
                        m[r0:r0 + cin, o * cout:(o + 1) * cout] = w[:, :, kh, kw].T
        return m, wo

    m1, wo1 = conv_matrix(params["conv1_w"], 32, 2)     # (480, 192), wo=16
    m2, wo2 = conv_matrix(params["conv2_w"], 16, 2)     # (960,  96), wo=8
    m3, wo3 = conv_matrix(params["conv3_w"], 8, 1)      # (480,  96), wo=8

    b1 = np.tile(np.asarray(params["conv1_b"], np.float32), wo1)[None]   # (1, 192)
    b2 = np.tile(np.asarray(params["conv2_b"], np.float32), wo2)[None]   # (1,  96)
    b3 = np.tile(np.asarray(params["conv3_b"], np.float32), wo3)[None]   # (1,  96)

    # FC: PyTorch flattens NCHW (c*64 + h*8 + w); kernel feature lane index is
    # h*96 + w*12 + c.  Permute once and pad classes 10 -> 128 (lane-dense out).
    wfc = np.asarray(params["fc_w"], np.float32).reshape(10, 12, 8, 8)   # (n,c,h,w)
    wfc = np.transpose(wfc, (2, 3, 1, 0)).reshape(768, 10)               # (h*96+w*12+c, n)
    wfc = np.pad(wfc, ((0, 0), (0, 118)))                                # (768, 128)
    bfc = np.pad(np.asarray(params["fc_b"], np.float32), (0, 118))[None]  # (1, 128)

    bf16 = jnp.bfloat16
    return {
        "m1": jnp.asarray(m1, bf16), "b1": jnp.asarray(b1),
        "m2": jnp.asarray(m2, bf16), "b2": jnp.asarray(b2),
        "m3": jnp.asarray(m3, bf16), "b3": jnp.asarray(b3),
        "wfc": jnp.asarray(wfc, bf16), "bfc": jnp.asarray(bfc),
    }


# --------------------------------- Forward ---------------------------------- #

def _choose_tile(b):
    """Batch tile: big enough to fill the MXU, >= 2 grid steps when B allows
    (so v7x's two TensorCores both get work), multiple of 8 for aligned slices."""
    if b >= 256:
        return 128
    if b >= 16:
        t = (b // 2) // 8 * 8
        return max(8, min(128, t))
    return b


def dlgnet_forward(prep, x, tile_b=None):
    """x: (B, 3, 32, 32) NCHW -> logits (B, 10)."""
    assert x.shape[1:] == (3, 32, 32), x.shape
    B = x.shape[0]
    t = int(tile_b) if tile_b is not None else _choose_tile(B)
    b_pad = ((B + t - 1) // t) * t
    nt = b_pad // t

    # NCHW -> h-major tile layout: row = image_row * t + image_index,
    # lane = w*3 + c.
    # TODO(synk): for large batches, store inputs pre-laid-out (or fuse this
    # relayout into the producer) instead of doing it per call in XLA.
    xr = jnp.transpose(x, (0, 2, 3, 1)).reshape(B, 32, 96)
    if b_pad != B:
        xr = jnp.pad(xr, ((0, b_pad - B), (0, 0), (0, 0)))
    xr = xr.reshape(nt, t, 32, 96).transpose(0, 2, 1, 3).reshape(nt, 32 * t, 96)
    xr = xr.astype(jnp.bfloat16)

    out = pl.pallas_call(
        _dlgnet_kernel,
        out_shape=jax.ShapeDtypeStruct((nt, t, 128), jnp.float32),
        grid=(nt,),
        in_specs=[
            pl.BlockSpec((1, 32 * t, 96), lambda i: (i, 0, 0)),   # input tile
            pl.BlockSpec(prep["m1"].shape, lambda i: (0, 0)),
            pl.BlockSpec(prep["b1"].shape, lambda i: (0, 0)),
            pl.BlockSpec(prep["m2"].shape, lambda i: (0, 0)),
            pl.BlockSpec(prep["b2"].shape, lambda i: (0, 0)),
            pl.BlockSpec(prep["m3"].shape, lambda i: (0, 0)),
            pl.BlockSpec(prep["b3"].shape, lambda i: (0, 0)),
            pl.BlockSpec(prep["wfc"].shape, lambda i: (0, 0)),
            pl.BlockSpec(prep["bfc"].shape, lambda i: (0, 0)),
        ],
        out_specs=pl.BlockSpec((1, t, 128), lambda i: (i, 0, 0)),
        compiler_params=pltpu.CompilerParams(
            dimension_semantics=("parallel",),
            vmem_limit_bytes=32 * 1024 * 1024),
    )(xr,
      prep["m1"], prep["b1"],
      prep["m2"], prep["b2"],
      prep["m3"], prep["b3"],
      prep["wfc"], prep["bfc"])

    return out.reshape(b_pad, 128)[:B, :10]


# ------------------------------ Parameters ---------------------------------- #

def init_params(key):
    """Deterministic synthetic parameters with PyTorch-like uniform init."""
    def uniform(k, shape, fan_in):
        bound = 1.0 / jnp.sqrt(fan_in)
        return jax.random.uniform(k, shape, jnp.float32, -bound, bound)

    ks = jax.random.split(key, 8)
    return {
        "conv1_w": uniform(ks[0], (12, 3, 5, 5), 3 * 25),
        "conv1_b": uniform(ks[1], (12,), 3 * 25),
        "conv2_w": uniform(ks[2], (12, 12, 5, 5), 12 * 25),
        "conv2_b": uniform(ks[3], (12,), 12 * 25),
        "conv3_w": uniform(ks[4], (12, 12, 5, 5), 12 * 25),
        "conv3_b": uniform(ks[5], (12,), 12 * 25),
        "fc_w":    uniform(ks[6], (10, 768), 768),     # PyTorch Linear: (out, in)
        "fc_b":    uniform(ks[7], (10,), 768),
    }


# ------------------------- Pure-JAX reference (check) ----------------------- #

def reference_forward(params, x):
    dn = ("NCHW", "OIHW", "NCHW")
    hi = jax.lax.Precision.HIGHEST

    def conv(h, w, b, s):
        y = jax.lax.conv_general_dilated(
            h, w, window_strides=(s, s), padding=((2, 2), (2, 2)),
            dimension_numbers=dn, precision=hi)
        return jax.nn.sigmoid(y + b[None, :, None, None])

    h = conv(x, params["conv1_w"], params["conv1_b"], 2)
    h = conv(h, params["conv2_w"], params["conv2_b"], 2)
    h = conv(h, params["conv3_w"], params["conv3_b"], 1)
    feat = h.reshape(h.shape[0], -1)                       # NCHW flatten
    return jnp.dot(feat, params["fc_w"].T, precision=hi) + params["fc_b"]


# ---------------------------------- Main ------------------------------------ #

if __name__ == "__main__":
    key = jax.random.PRNGKey(0)
    pkey, xkey = jax.random.split(key)

    params = init_params(pkey)
    # Linear(768, 10) implies 12 * 8 * 8 features -> 32x32 spatial input.
    # B=16 -> tile_b=8, 2 grid steps (keeps both v7x TensorCores busy).
    x = jax.random.normal(xkey, (16, 3, 32, 32), dtype=jnp.float32)

    prep = prepare_params(params)

    fwd = jax.jit(dlgnet_forward)
    out = jax.block_until_ready(fwd(prep, x))

    assert out.shape == (16, 10), out.shape
    assert out.dtype == jnp.float32

    # Numerical check against a plain-JAX f32 reference (bf16 MXU tolerance).
    ref = jax.block_until_ready(reference_forward(params, x))
    np.testing.assert_allclose(np.asarray(out), np.asarray(ref), rtol=0.0, atol=5e-2)

    print("KERNEL_OK")
</pallas_src>

<mosaic_0001>
module attributes {stable_mosaic.version = 11 : i64} {
  func.func @_dlgnet_kernel(%arg0: i32, %arg1: memref<1x256x96xbf16, #tpu.memory_space<vmem>>, %arg2: memref<480x192xbf16, #tpu.memory_space<vmem>>, %arg3: memref<1x192xf32, #tpu.memory_space<vmem>>, %arg4: memref<960x96xbf16, #tpu.memory_space<vmem>>, %arg5: memref<1x96xf32, #tpu.memory_space<vmem>>, %arg6: memref<480x96xbf16, #tpu.memory_space<vmem>>, %arg7: memref<1x96xf32, #tpu.memory_space<vmem>>, %arg8: memref<768x128xbf16, #tpu.memory_space<vmem>>, %arg9: memref<1x128xf32, #tpu.memory_space<vmem>>, %arg10: memref<1x8x128xf32, #tpu.memory_space<vmem>>) attributes {dimension_semantics = [#tpu.dimension_semantics<parallel>], iteration_bounds = array<i64: 2>, scalar_prefetch = 0 : i64, scratch_operands = 0 : i64, tpu.core_type = #tpu.core_type<tc>, window_params = [{transform_indices = @transform_0, window_bounds = array<i64: 1, 256, 96>}, {pipeline_mode = #tpu.pipeline_mode<synchronous>, transform_indices = @transform_1, window_bounds = array<i64: 480, 192>}, {pipeline_mode = #tpu.pipeline_mode<synchronous>, transform_indices = @transform_2, window_bounds = array<i64: 1, 192>}, {pipeline_mode = #tpu.pipeline_mode<synchronous>, transform_indices = @transform_3, window_bounds = array<i64: 960, 96>}, {pipeline_mode = #tpu.pipeline_mode<synchronous>, transform_indices = @transform_4, window_bounds = array<i64: 1, 96>}, {pipeline_mode = #tpu.pipeline_mode<synchronous>, transform_indices = @transform_5, window_bounds = array<i64: 480, 96>}, {pipeline_mode = #tpu.pipeline_mode<synchronous>, transform_indices = @transform_6, window_bounds = array<i64: 1, 96>}, {pipeline_mode = #tpu.pipeline_mode<synchronous>, transform_indices = @transform_7, window_bounds = array<i64: 768, 128>}, {pipeline_mode = #tpu.pipeline_mode<synchronous>, transform_indices = @transform_8, window_bounds = array<i64: 1, 128>}, {transform_indices = @transform_9, window_bounds = array<i64: 1, 8, 128>}]} {
    %c0 = arith.constant 0 : index
    %c0_0 = arith.constant 0 : index
    %c0_1 = arith.constant 0 : index
    %0 = vector.load %arg1[%c0, %c0_0, %c0_1] : memref<1x256x96xbf16, #tpu.memory_space<vmem>>, vector<1x256x96xbf16>
    %1 = vector.shape_cast %0 : vector<1x256x96xbf16> to vector<256x96xbf16>
    %cst = arith.constant 0.000000e+00 : bf16
    %2 = vector.broadcast %cst : bf16 to vector<8x96xbf16>
    %3 = vector.extract_strided_slice %1 {offsets = [0, 0], sizes = [8, 96], strides = [1, 1]} : vector<256x96xbf16> to vector<8x96xbf16>
    %4 = vector.extract_strided_slice %1 {offsets = [16, 0], sizes = [8, 96], strides = [1, 1]} : vector<256x96xbf16> to vector<8x96xbf16>
    %5 = vector.extract_strided_slice %1 {offsets = [32, 0], sizes = [8, 96], strides = [1, 1]} : vector<256x96xbf16> to vector<8x96xbf16>
    %6 = vector.extract_strided_slice %1 {offsets = [48, 0], sizes = [8, 96], strides = [1, 1]} : vector<256x96xbf16> to vector<8x96xbf16>
    %7 = vector.extract_strided_slice %1 {offsets = [64, 0], sizes = [8, 96], strides = [1, 1]} : vector<256x96xbf16> to vector<8x96xbf16>
    %8 = vector.extract_strided_slice %1 {offsets = [80, 0], sizes = [8, 96], strides = [1, 1]} : vector<256x96xbf16> to vector<8x96xbf16>
    %9 = vector.extract_strided_slice %1 {offsets = [96, 0], sizes = [8, 96], strides = [1, 1]} : vector<256x96xbf16> to vector<8x96xbf16>
    %10 = vector.extract_strided_slice %1 {offsets = [112, 0], sizes = [8, 96], strides = [1, 1]} : vector<256x96xbf16> to vector<8x96xbf16>
    %11 = vector.extract_strided_slice %1 {offsets = [128, 0], sizes = [8, 96], strides = [1, 1]} : vector<256x96xbf16> to vector<8x96xbf16>
    %12 = vector.extract_strided_slice %1 {offsets = [144, 0], sizes = [8, 96], strides = [1, 1]} : vector<256x96xbf16> to vector<8x96xbf16>
    %13 = vector.extract_strided_slice %1 {offsets = [160, 0], sizes = [8, 96], strides = [1, 1]} : vector<256x96xbf16> to vector<8x96xbf16>
    %14 = vector.extract_strided_slice %1 {offsets = [176, 0], sizes = [8, 96], strides = [1, 1]} : vector<256x96xbf16> to vector<8x96xbf16>
    %15 = vector.extract_strided_slice %1 {offsets = [192, 0], sizes = [8, 96], strides = [1, 1]} : vector<256x96xbf16> to vector<8x96xbf16>
    %16 = vector.extract_strided_slice %1 {offsets = [208, 0], sizes = [8, 96], strides = [1, 1]} : vector<256x96xbf16> to vector<8x96xbf16>
    %17 = vector.extract_strided_slice %1 {offsets = [224, 0], sizes = [8, 96], strides = [1, 1]} : vector<256x96xbf16> to vector<8x96xbf16>
    %18 = tpu.concatenate %2, %3, %4, %5, %6, %7, %8, %9, %10, %11, %12, %13, %14, %15, %16, %17 in 0 : vector<8x96xbf16>, vector<8x96xbf16>, vector<8x96xbf16>, vector<8x96xbf16>, vector<8x96xbf16>, vector<8x96xbf16>, vector<8x96xbf16>, vector<8x96xbf16>, vector<8x96xbf16>, vector<8x96xbf16>, vector<8x96xbf16>, vector<8x96xbf16>, vector<8x96xbf16>, vector<8x96xbf16>, vector<8x96xbf16>, vector<8x96xbf16> -> vector<128x96xbf16>
    %cst_2 = arith.constant 0.000000e+00 : bf16
    %19 = vector.broadcast %cst_2 : bf16 to vector<8x96xbf16>
    %20 = vector.extract_strided_slice %1 {offsets = [8, 0], sizes = [8, 96], strides = [1, 1]} : vector<256x96xbf16> to vector<8x96xbf16>
    %21 = vector.extract_strided_slice %1 {offsets = [24, 0], sizes = [8, 96], strides = [1, 1]} : vector<256x96xbf16> to vector<8x96xbf16>
    %22 = vector.extract_strided_slice %1 {offsets = [40, 0], sizes = [8, 96], strides = [1, 1]} : vector<256x96xbf16> to vector<8x96xbf16>
    %23 = vector.extract_strided_slice %1 {offsets = [56, 0], sizes = [8, 96], strides = [1, 1]} : vector<256x96xbf16> to vector<8x96xbf16>
    %24 = vector.extract_strided_slice %1 {offsets = [72, 0], sizes = [8, 96], strides = [1, 1]} : vector<256x96xbf16> to vector<8x96xbf16>
    %25 = vector.extract_strided_slice %1 {offsets = [88, 0], sizes = [8, 96], strides = [1, 1]} : vector<256x96xbf16> to vector<8x96xbf16>
    %26 = vector.extract_strided_slice %1 {offsets = [104, 0], sizes = [8, 96], strides = [1, 1]} : vector<256x96xbf16> to vector<8x96xbf16>
    %27 = vector.extract_strided_slice %1 {offsets = [120, 0], sizes = [8, 96], strides = [1, 1]} : vector<256x96xbf16> to vector<8x96xbf16>
    %28 = vector.extract_strided_slice %1 {offsets = [136, 0], sizes = [8, 96], strides = [1, 1]} : vector<256x96xbf16> to vector<8x96xbf16>
    %29 = vector.extract_strided_slice %1 {offsets = [152, 0], sizes = [8, 96], strides = [1, 1]} : vector<256x96xbf16> to vector<8x96xbf16>
    %30 = vector.extract_strided_slice %1 {offsets = [168, 0], sizes = [8, 96], strides = [1, 1]} : vector<256x96xbf16> to vector<8x96xbf16>
    %31 = vector.extract_strided_slice %1 {offsets = [184, 0], sizes = [8, 96], strides = [1, 1]} : vector<256x96xbf16> to vector<8x96xbf16>
    %32 = vector.extract_strided_slice %1 {offsets = [200, 0], sizes = [8, 96], strides = [1, 1]} : vector<256x96xbf16> to vector<8x96xbf16>
    %33 = vector.extract_strided_slice %1 {offsets = [216, 0], sizes = [8, 96], strides = [1, 1]} : vector<256x96xbf16> to vector<8x96xbf16>
    %34 = vector.extract_strided_slice %1 {offsets = [232, 0], sizes = [8, 96], strides = [1, 1]} : vector<256x96xbf16> to vector<8x96xbf16>
    %35 = tpu.concatenate %19, %20, %21, %22, %23, %24, %25, %26, %27, %28, %29, %30, %31, %32, %33, %34 in 0 : vector<8x96xbf16>, vector<8x96xbf16>, vector<8x96xbf16>, vector<8x96xbf16>, vector<8x96xbf16>, vector<8x96xbf16>, vector<8x96xbf16>, vector<8x96xbf16>, vector<8x96xbf16>, vector<8x96xbf16>, vector<8x96xbf16>, vector<8x96xbf16>, vector<8x96xbf16>, vector<8x96xbf16>, vector<8x96xbf16>, vector<8x96xbf16> -> vector<128x96xbf16>
    %36 = vector.extract_strided_slice %1 {offsets = [0, 0], sizes = [8, 96], strides = [1, 1]} : vector<256x96xbf16> to vector<8x96xbf16>
    %37 = vector.extract_strided_slice %1 {offsets = [16, 0], sizes = [8, 96], strides = [1, 1]} : vector<256x96xbf16> to vector<8x96xbf16>
    %38 = vector.extract_strided_slice %1 {offsets = [32, 0], sizes = [8, 96], strides = [1, 1]} : vector<256x96xbf16> to vector<8x96xbf16>
    %39 = vector.extract_strided_slice %1 {offsets = [48, 0], sizes = [8, 96], strides = [1, 1]} : vector<256x96xbf16> to vector<8x96xbf16>
    %40 = vector.extract_strided_slice %1 {offsets = [64, 0], sizes = [8, 96], strides = [1, 1]} : vector<256x96xbf16> to vector<8x96xbf16>
    %41 = vector.extract_strided_slice %1 {offsets = [80, 0], sizes = [8, 96], strides = [1, 1]} : vector<256x96xbf16> to vector<8x96xbf16>
    %42 = vector.extract_strided_slice %1 {offsets = [96, 0], sizes = [8, 96], strides = [1, 1]} : vector<256x96xbf16> to vector<8x96xbf16>
    %43 = vector.extract_strided_slice %1 {offsets = [112, 0], sizes = [8, 96], strides = [1, 1]} : vector<256x96xbf16> to vector<8x96xbf16>
    %44 = vector.extract_strided_slice %1 {offsets = [128, 0], sizes = [8, 96], strides = [1, 1]} : vector<256x96xbf16> to vector<8x96xbf16>
    %45 = vector.extract_strided_slice %1 {offsets = [144, 0], sizes = [8, 96], strides = [1, 1]} : vector<256x96xbf16> to vector<8x96xbf16>
    %46 = vector.extract_strided_slice %1 {offsets = [160, 0], sizes = [8, 96], strides = [1, 1]} : vector<256x96xbf16> to vector<8x96xbf16>
    %47 = vector.extract_strided_slice %1 {offsets = [176, 0], sizes = [8, 96], strides = [1, 1]} : vector<256x96xbf16> to vector<8x96xbf16>
    %48 = vector.extract_strided_slice %1 {offsets = [192, 0], sizes = [8, 96], strides = [1, 1]} : vector<256x96xbf16> to vector<8x96xbf16>
    %49 = vector.extract_strided_slice %1 {offsets = [208, 0], sizes = [8, 96], strides = [1, 1]} : vector<256x96xbf16> to vector<8x96xbf16>
    %50 = vector.extract_strided_slice %1 {offsets = [224, 0], sizes = [8, 96], strides = [1, 1]} : vector<256x96xbf16> to vector<8x96xbf16>
    %51 = vector.extract_strided_slice %1 {offsets = [240, 0], sizes = [8, 96], strides = [1, 1]} : vector<256x96xbf16> to vector<8x96xbf16>
    %52 = tpu.concatenate %36, %37, %38, %39, %40, %41, %42, %43, %44, %45, %46, %47, %48, %49, %50, %51 in 0 : vector<8x96xbf16>, vector<8x96xbf16>, vector<8x96xbf16>, vector<8x96xbf16>, vector<8x96xbf16>, vector<8x96xbf16>, vector<8x96xbf16>, vector<8x96xbf16>, vector<8x96xbf16>, vector<8x96xbf16>, vector<8x96xbf16>, vector<8x96xbf16>, vector<8x96xbf16>, vector<8x96xbf16>, vector<8x96xbf16>, vector<8x96xbf16> -> vector<128x96xbf16>
    %53 = vector.extract_strided_slice %1 {offsets = [8, 0], sizes = [8, 96], strides = [1, 1]} : vector<256x96xbf16> to vector<8x96xbf16>
    %54 = vector.extract_strided_slice %1 {offsets = [24, 0], sizes = [8, 96], strides = [1, 1]} : vector<256x96xbf16> to vector<8x96xbf16>
    %55 = vector.extract_strided_slice %1 {offsets = [40, 0], sizes = [8, 96], strides = [1, 1]} : vector<256x96xbf16> to vector<8x96xbf16>
    %56 = vector.extract_strided_slice %1 {offsets = [56, 0], sizes = [8, 96], strides = [1, 1]} : vector<256x96xbf16> to vector<8x96xbf16>
    %57 = vector.extract_strided_slice %1 {offsets = [72, 0], sizes = [8, 96], strides = [1, 1]} : vector<256x96xbf16> to vector<8x96xbf16>
    %58 = vector.extract_strided_slice %1 {offsets = [88, 0], sizes = [8, 96], strides = [1, 1]} : vector<256x96xbf16> to vector<8x96xbf16>
    %59 = vector.extract_strided_slice %1 {offsets = [104, 0], sizes = [8, 96], strides = [1, 1]} : vector<256x96xbf16> to vector<8x96xbf16>
    %60 = vector.extract_strided_slice %1 {offsets = [120, 0], sizes = [8, 96], strides = [1, 1]} : vector<256x96xbf16> to vector<8x96xbf16>
    %61 = vector.extract_strided_slice %1 {offsets = [136, 0], sizes = [8, 96], strides = [1, 1]} : vector<256x96xbf16> to vector<8x96xbf16>
    %62 = vector.extract_strided_slice %1 {offsets = [152, 0], sizes = [8, 96], strides = [1, 1]} : vector<256x96xbf16> to vector<8x96xbf16>
    %63 = vector.extract_strided_slice %1 {offsets = [168, 0], sizes = [8, 96], strides = [1, 1]} : vector<256x96xbf16> to vector<8x96xbf16>
    %64 = vector.extract_strided_slice %1 {offsets = [184, 0], sizes = [8, 96], strides = [1, 1]} : vector<256x96xbf16> to vector<8x96xbf16>
    %65 = vector.extract_strided_slice %1 {offsets = [200, 0], sizes = [8, 96], strides = [1, 1]} : vector<256x96xbf16> to vector<8x96xbf16>
    %66 = vector.extract_strided_slice %1 {offsets = [216, 0], sizes = [8, 96], strides = [1, 1]} : vector<256x96xbf16> to vector<8x96xbf16>
    %67 = vector.extract_strided_slice %1 {offsets = [232, 0], sizes = [8, 96], strides = [1, 1]} : vector<256x96xbf16> to vector<8x96xbf16>
    %68 = vector.extract_strided_slice %1 {offsets = [248, 0], sizes = [8, 96], strides = [1, 1]} : vector<256x96xbf16> to vector<8x96xbf16>
    %69 = tpu.concatenate %53, %54, %55, %56, %57, %58, %59, %60, %61, %62, %63, %64, %65, %66, %67, %68 in 0 : vector<8x96xbf16>, vector<8x96xbf16>, vector<8x96xbf16>, vector<8x96xbf16>, vector<8x96xbf16>, vector<8x96xbf16>, vector<8x96xbf16>, vector<8x96xbf16>, vector<8x96xbf16>, vector<8x96xbf16>, vector<8x96xbf16>, vector<8x96xbf16>, vector<8x96xbf16>, vector<8x96xbf16>, vector<8x96xbf16>, vector<8x96xbf16> -> vector<128x96xbf16>
    %70 = vector.extract_strided_slice %1 {offsets = [16, 0], sizes = [8, 96], strides = [1, 1]} : vector<256x96xbf16> to vector<8x96xbf16>
    %71 = vector.extract_strided_slice %1 {offsets = [32, 0], sizes = [8, 96], strides = [1, 1]} : vector<256x96xbf16> to vector<8x96xbf16>
    %72 = vector.extract_strided_slice %1 {offsets = [48, 0], sizes = [8, 96], strides = [1, 1]} : vector<256x96xbf16> to vector<8x96xbf16>
    %73 = vector.extract_strided_slice %1 {offsets = [64, 0], sizes = [8, 96], strides = [1, 1]} : vector<256x96xbf16> to vector<8x96xbf16>
    %74 = vector.extract_strided_slice %1 {offsets = [80, 0], sizes = [8, 96], strides = [1, 1]} : vector<256x96xbf16> to vector<8x96xbf16>
    %75 = vector.extract_strided_slice %1 {offsets = [96, 0], sizes = [8, 96], strides = [1, 1]} : vector<256x96xbf16> to vector<8x96xbf16>
    %76 = vector.extract_strided_slice %1 {offsets = [112, 0], sizes = [8, 96], strides = [1, 1]} : vector<256x96xbf16> to vector<8x96xbf16>
    %77 = vector.extract_strided_slice %1 {offsets = [128, 0], sizes = [8, 96], strides = [1, 1]} : vector<256x96xbf16> to vector<8x96xbf16>
    %78 = vector.extract_strided_slice %1 {offsets = [144, 0], sizes = [8, 96], strides = [1, 1]} : vector<256x96xbf16> to vector<8x96xbf16>
    %79 = vector.extract_strided_slice %1 {offsets = [160, 0], sizes = [8, 96], strides = [1, 1]} : vector<256x96xbf16> to vector<8x96xbf16>
    %80 = vector.extract_strided_slice %1 {offsets = [176, 0], sizes = [8, 96], strides = [1, 1]} : vector<256x96xbf16> to vector<8x96xbf16>
    %81 = vector.extract_strided_slice %1 {offsets = [192, 0], sizes = [8, 96], strides = [1, 1]} : vector<256x96xbf16> to vector<8x96xbf16>
    %82 = vector.extract_strided_slice %1 {offsets = [208, 0], sizes = [8, 96], strides = [1, 1]} : vector<256x96xbf16> to vector<8x96xbf16>
    %83 = vector.extract_strided_slice %1 {offsets = [224, 0], sizes = [8, 96], strides = [1, 1]} : vector<256x96xbf16> to vector<8x96xbf16>
    %84 = vector.extract_strided_slice %1 {offsets = [240, 0], sizes = [8, 96], strides = [1, 1]} : vector<256x96xbf16> to vector<8x96xbf16>
    %cst_3 = arith.constant 0.000000e+00 : bf16
    %85 = vector.broadcast %cst_3 : bf16 to vector<8x96xbf16>
    %86 = tpu.concatenate %70, %71, %72, %73, %74, %75, %76, %77, %78, %79, %80, %81, %82, %83, %84, %85 in 0 : vector<8x96xbf16>, vector<8x96xbf16>, vector<8x96xbf16>, vector<8x96xbf16>, vector<8x96xbf16>, vector<8x96xbf16>, vector<8x96xbf16>, vector<8x96xbf16>, vector<8x96xbf16>, vector<8x96xbf16>, vector<8x96xbf16>, vector<8x96xbf16>, vector<8x96xbf16>, vector<8x96xbf16>, vector<8x96xbf16>, vector<8x96xbf16> -> vector<128x96xbf16>
    %87 = tpu.concatenate %18, %35, %52, %69, %86 in 1 : vector<128x96xbf16>, vector<128x96xbf16>, vector<128x96xbf16>, vector<128x96xbf16>, vector<128x96xbf16> -> vector<128x480xbf16>
    %c0_4 = arith.constant 0 : index
    %c0_5 = arith.constant 0 : index
    %88 = vector.load %arg2[%c0_4, %c0_5] : memref<480x192xbf16, #tpu.memory_space<vmem>>, vector<480x192xbf16>
    %cst_6 = arith.constant dense<0.000000e+00> : vector<128x192xf32>
    %89 = tpu.matmul %87, %88, %cst_6 {dimension_numbers = #tpu.dot_dimension_numbers<[1], [0], [0], [1], [0, 0, 1, 1], [], []>} : vector<128x480xbf16>, vector<480x192xbf16>, vector<128x192xf32> -> vector<128x192xf32>
    %c0_7 = arith.constant 0 : index
    %c0_8 = arith.constant 0 : index
    %90 = vector.load %arg3[%c0_7, %c0_8] : memref<1x192xf32, #tpu.memory_space<vmem>>, vector<1x192xf32>
    %91 = vector.broadcast %90 : vector<1x192xf32> to vector<128x192xf32>
    %92 = arith.addf %89, %91 : vector<128x192xf32>
    %cst_9 = arith.constant 0.000000e+00 : f32
    %93 = vector.broadcast %cst_9 : f32 to vector<128x192xf32>
    %94 = arith.subf %93, %92 : vector<128x192xf32>
    %95 = math.exp %94 : vector<128x192xf32>
    %cst_10 = arith.constant 1.000000e+00 : f32
    %96 = vector.broadcast %cst_10 : f32 to vector<128x192xf32>
    %97 = arith.addf %96, %95 : vector<128x192xf32>
    %98 = tpu.reciprocal %97 {approx = true} : vector<128x192xf32> -> vector<128x192xf32>
    %99 = arith.truncf %98 : vector<128x192xf32> to vector<128x192xbf16>
    %cst_11 = arith.constant 0.000000e+00 : bf16
    %100 = vector.broadcast %cst_11 : bf16 to vector<8x192xbf16>
    %101 = vector.extract_strided_slice %99 {offsets = [0, 0], sizes = [8, 192], strides = [1, 1]} : vector<128x192xbf16> to vector<8x192xbf16>
    %102 = vector.extract_strided_slice %99 {offsets = [16, 0], sizes = [8, 192], strides = [1, 1]} : vector<128x192xbf16> to vector<8x192xbf16>
    %103 = vector.extract_strided_slice %99 {offsets = [32, 0], sizes = [8, 192], strides = [1, 1]} : vector<128x192xbf16> to vector<8x192xbf16>
    %104 = vector.extract_strided_slice %99 {offsets = [48, 0], sizes = [8, 192], strides = [1, 1]} : vector<128x192xbf16> to vector<8x192xbf16>
    %105 = vector.extract_strided_slice %99 {offsets = [64, 0], sizes = [8, 192], strides = [1, 1]} : vector<128x192xbf16> to vector<8x192xbf16>
    %106 = vector.extract_strided_slice %99 {offsets = [80, 0], sizes = [8, 192], strides = [1, 1]} : vector<128x192xbf16> to vector<8x192xbf16>
    %107 = vector.extract_strided_slice %99 {offsets = [96, 0], sizes = [8, 192], strides = [1, 1]} : vector<128x192xbf16> to vector<8x192xbf16>
    %108 = tpu.concatenate %100, %101, %102, %103, %104, %105, %106, %107 in 0 : vector<8x192xbf16>, vector<8x192xbf16>, vector<8x192xbf16>, vector<8x192xbf16>, vector<8x192xbf16>, vector<8x192xbf16>, vector<8x192xbf16>, vector<8x192xbf16> -> vector<64x192xbf16>
    %cst_12 = arith.constant 0.000000e+00 : bf16
    %109 = vector.broadcast %cst_12 : bf16 to vector<8x192xbf16>
    %110 = vector.extract_strided_slice %99 {offsets = [8, 0], sizes = [8, 192], strides = [1, 1]} : vector<128x192xbf16> to vector<8x192xbf16>
    %111 = vector.extract_strided_slice %99 {offsets = [24, 0], sizes = [8, 192], strides = [1, 1]} : vector<128x192xbf16> to vector<8x192xbf16>
    %112 = vector.extract_strided_slice %99 {offsets = [40, 0], sizes = [8, 192], strides = [1, 1]} : vector<128x192xbf16> to vector<8x192xbf16>
    %113 = vector.extract_strided_slice %99 {offsets = [56, 0], sizes = [8, 192], strides = [1, 1]} : vector<128x192xbf16> to vector<8x192xbf16>
    %114 = vector.extract_strided_slice %99 {offsets = [72, 0], sizes = [8, 192], strides = [1, 1]} : vector<128x192xbf16> to vector<8x192xbf16>
    %115 = vector.extract_strided_slice %99 {offsets = [88, 0], sizes = [8, 192], strides = [1, 1]} : vector<128x192xbf16> to vector<8x192xbf16>
    %116 = vector.extract_strided_slice %99 {offsets = [104, 0], sizes = [8, 192], strides = [1, 1]} : vector<128x192xbf16> to vector<8x192xbf16>
    %117 = tpu.concatenate %109, %110, %111, %112, %113, %114, %115, %116 in 0 : vector<8x192xbf16>, vector<8x192xbf16>, vector<8x192xbf16>, vector<8x192xbf16>, vector<8x192xbf16>, vector<8x192xbf16>, vector<8x192xbf16>, vector<8x192xbf16> -> vector<64x192xbf16>
    %118 = vector.extract_strided_slice %99 {offsets = [0, 0], sizes = [8, 192], strides = [1, 1]} : vector<128x192xbf16> to vector<8x192xbf16>
    %119 = vector.extract_strided_slice %99 {offsets = [16, 0], sizes = [8, 192], strides = [1, 1]} : vector<128x192xbf16> to vector<8x192xbf16>
    %120 = vector.extract_strided_slice %99 {offsets = [32, 0], sizes = [8, 192], strides = [1, 1]} : vector<128x192xbf16> to vector<8x192xbf16>
    %121 = vector.extract_strided_slice %99 {offsets = [48, 0], sizes = [8, 192], strides = [1, 1]} : vector<128x192xbf16> to vector<8x192xbf16>
    %122 = vector.extract_strided_slice %99 {offsets = [64, 0], sizes = [8, 192], strides = [1, 1]} : vector<128x192xbf16> to vector<8x192xbf16>
    %123 = vector.extract_strided_slice %99 {offsets = [80, 0], sizes = [8, 192], strides = [1, 1]} : vector<128x192xbf16> to vector<8x192xbf16>
    %124 = vector.extract_strided_slice %99 {offsets = [96, 0], sizes = [8, 192], strides = [1, 1]} : vector<128x192xbf16> to vector<8x192xbf16>
    %125 = vector.extract_strided_slice %99 {offsets = [112, 0], sizes = [8, 192], strides = [1, 1]} : vector<128x192xbf16> to vector<8x192xbf16>
    %126 = tpu.concatenate %118, %119, %120, %121, %122, %123, %124, %125 in 0 : vector<8x192xbf16>, vector<8x192xbf16>, vector<8x192xbf16>, vector<8x192xbf16>, vector<8x192xbf16>, vector<8x192xbf16>, vector<8x192xbf16>, vector<8x192xbf16> -> vector<64x192xbf16>
    %127 = vector.extract_strided_slice %99 {offsets = [8, 0], sizes = [8, 192], strides = [1, 1]} : vector<128x192xbf16> to vector<8x192xbf16>
    %128 = vector.extract_strided_slice %99 {offsets = [24, 0], sizes = [8, 192], strides = [1, 1]} : vector<128x192xbf16> to vector<8x192xbf16>
    %129 = vector.extract_strided_slice %99 {offsets = [40, 0], sizes = [8, 192], strides = [1, 1]} : vector<128x192xbf16> to vector<8x192xbf16>
    %130 = vector.extract_strided_slice %99 {offsets = [56, 0], sizes = [8, 192], strides = [1, 1]} : vector<128x192xbf16> to vector<8x192xbf16>
    %131 = vector.extract_strided_slice %99 {offsets = [72, 0], sizes = [8, 192], strides = [1, 1]} : vector<128x192xbf16> to vector<8x192xbf16>
    %132 = vector.extract_strided_slice %99 {offsets = [88, 0], sizes = [8, 192], strides = [1, 1]} : vector<128x192xbf16> to vector<8x192xbf16>
    %133 = vector.extract_strided_slice %99 {offsets = [104, 0], sizes = [8, 192], strides = [1, 1]} : vector<128x192xbf16> to vector<8x192xbf16>
    %134 = vector.extract_strided_slice %99 {offsets = [120, 0], sizes = [8, 192], strides = [1, 1]} : vector<128x192xbf16> to vector<8x192xbf16>
    %135 = tpu.concatenate %127, %128, %129, %130, %131, %132, %133, %134 in 0 : vector<8x192xbf16>, vector<8x192xbf16>, vector<8x192xbf16>, vector<8x192xbf16>, vector<8x192xbf16>, vector<8x192xbf16>, vector<8x192xbf16>, vector<8x192xbf16> -> vector<64x192xbf16>
    %136 = vector.extract_strided_slice %99 {offsets = [16, 0], sizes = [8, 192], strides = [1, 1]} : vector<128x192xbf16> to vector<8x192xbf16>
    %137 = vector.extract_strided_slice %99 {offsets = [32, 0], sizes = [8, 192], strides = [1, 1]} : vector<128x192xbf16> to vector<8x192xbf16>
    %138 = vector.extract_strided_slice %99 {offsets = [48, 0], sizes = [8, 192], strides = [1, 1]} : vector<128x192xbf16> to vector<8x192xbf16>
    %139 = vector.extract_strided_slice %99 {offsets = [64, 0], sizes = [8, 192], strides = [1, 1]} : vector<128x192xbf16> to vector<8x192xbf16>
    %140 = vector.extract_strided_slice %99 {offsets = [80, 0], sizes = [8, 192], strides = [1, 1]} : vector<128x192xbf16> to vector<8x192xbf16>
    %141 = vector.extract_strided_slice %99 {offsets = [96, 0], sizes = [8, 192], strides = [1, 1]} : vector<128x192xbf16> to vector<8x192xbf16>
    %142 = vector.extract_strided_slice %99 {offsets = [112, 0], sizes = [8, 192], strides = [1, 1]} : vector<128x192xbf16> to vector<8x192xbf16>
    %cst_13 = arith.constant 0.000000e+00 : bf16
    %143 = vector.broadcast %cst_13 : bf16 to vector<8x192xbf16>
    %144 = tpu.concatenate %136, %137, %138, %139, %140, %141, %142, %143 in 0 : vector<8x192xbf16>, vector<8x192xbf16>, vector<8x192xbf16>, vector<8x192xbf16>, vector<8x192xbf16>, vector<8x192xbf16>, vector<8x192xbf16>, vector<8x192xbf16> -> vector<64x192xbf16>
    %145 = tpu.concatenate %108, %117, %126, %135, %144 in 1 : vector<64x192xbf16>, vector<64x192xbf16>, vector<64x192xbf16>, vector<64x192xbf16>, vector<64x192xbf16> -> vector<64x960xbf16>
    %c0_14 = arith.constant 0 : index
    %c0_15 = arith.constant 0 : index
    %146 = vector.load %arg4[%c0_14, %c0_15] : memref<960x96xbf16, #tpu.memory_space<vmem>>, vector<960x96xbf16>
    %cst_16 = arith.constant dense<0.000000e+00> : vector<64x96xf32>
    %147 = tpu.matmul %145, %146, %cst_16 {dimension_numbers = #tpu.dot_dimension_numbers<[1], [0], [0], [1], [0, 0, 1, 1], [], []>} : vector<64x960xbf16>, vector<960x96xbf16>, vector<64x96xf32> -> vector<64x96xf32>
    %c0_17 = arith.constant 0 : index
    %c0_18 = arith.constant 0 : index
    %148 = vector.load %arg5[%c0_17, %c0_18] : memref<1x96xf32, #tpu.memory_space<vmem>>, vector<1x96xf32>
    %149 = vector.broadcast %148 : vector<1x96xf32> to vector<64x96xf32>
    %150 = arith.addf %147, %149 : vector<64x96xf32>
    %cst_19 = arith.constant 0.000000e+00 : f32
    %151 = vector.broadcast %cst_19 : f32 to vector<64x96xf32>
    %152 = arith.subf %151, %150 : vector<64x96xf32>
    %153 = math.exp %152 : vector<64x96xf32>
    %cst_20 = arith.constant 1.000000e+00 : f32
    %154 = vector.broadcast %cst_20 : f32 to vector<64x96xf32>
    %155 = arith.addf %154, %153 : vector<64x96xf32>
    %156 = tpu.reciprocal %155 {approx = true} : vector<64x96xf32> -> vector<64x96xf32>
    %157 = arith.truncf %156 : vector<64x96xf32> to vector<64x96xbf16>
    %cst_21 = arith.constant 0.000000e+00 : bf16
    %158 = vector.broadcast %cst_21 : bf16 to vector<16x96xbf16>
    %159 = vector.extract_strided_slice %157 {offsets = [0, 0], sizes = [48, 96], strides = [1, 1]} : vector<64x96xbf16> to vector<48x96xbf16>
    %160 = tpu.concatenate %158, %159 in 0 : vector<16x96xbf16>, vector<48x96xbf16> -> vector<64x96xbf16>
    %cst_22 = arith.constant 0.000000e+00 : bf16
    %161 = vector.broadcast %cst_22 : bf16 to vector<8x96xbf16>
    %162 = vector.extract_strided_slice %157 {offsets = [0, 0], sizes = [56, 96], strides = [1, 1]} : vector<64x96xbf16> to vector<56x96xbf16>
    %163 = tpu.concatenate %161, %162 in 0 : vector<8x96xbf16>, vector<56x96xbf16> -> vector<64x96xbf16>
    %164 = vector.extract_strided_slice %157 {offsets = [8, 0], sizes = [56, 96], strides = [1, 1]} : vector<64x96xbf16> to vector<56x96xbf16>
    %cst_23 = arith.constant 0.000000e+00 : bf16
    %165 = vector.broadcast %cst_23 : bf16 to vector<8x96xbf16>
    %166 = tpu.concatenate %164, %165 in 0 : vector<56x96xbf16>, vector<8x96xbf16> -> vector<64x96xbf16>
    %167 = vector.extract_strided_slice %157 {offsets = [16, 0], sizes = [48, 96], strides = [1, 1]} : vector<64x96xbf16> to vector<48x96xbf16>
    %cst_24 = arith.constant 0.000000e+00 : bf16
    %168 = vector.broadcast %cst_24 : bf16 to vector<16x96xbf16>
    %169 = tpu.concatenate %167, %168 in 0 : vector<48x96xbf16>, vector<16x96xbf16> -> vector<64x96xbf16>
    %170 = tpu.concatenate %160, %163, %157, %166, %169 in 1 : vector<64x96xbf16>, vector<64x96xbf16>, vector<64x96xbf16>, vector<64x96xbf16>, vector<64x96xbf16> -> vector<64x480xbf16>
    %c0_25 = arith.constant 0 : index
    %c0_26 = arith.constant 0 : index
    %171 = vector.load %arg6[%c0_25, %c0_26] : memref<480x96xbf16, #tpu.memory_space<vmem>>, vector<480x96xbf16>
    %cst_27 = arith.constant dense<0.000000e+00> : vector<64x96xf32>
    %172 = tpu.matmul %170, %171, %cst_27 {dimension_numbers = #tpu.dot_dimension_numbers<[1], [0], [0], [1], [0, 0, 1, 1], [], []>} : vector<64x480xbf16>, vector<480x96xbf16>, vector<64x96xf32> -> vector<64x96xf32>
    %c0_28 = arith.constant 0 : index
    %c0_29 = arith.constant 0 : index
    %173 = vector.load %arg7[%c0_28, %c0_29] : memref<1x96xf32, #tpu.memory_space<vmem>>, vector<1x96xf32>
    %174 = vector.broadcast %173 : vector<1x96xf32> to vector<64x96xf32>
    %175 = arith.addf %172, %174 : vector<64x96xf32>
    %cst_30 = arith.constant 0.000000e+00 : f32
    %176 = vector.broadcast %cst_30 : f32 to vector<64x96xf32>
    %177 = arith.subf %176, %175 : vector<64x96xf32>
    %178 = math.exp %177 : vector<64x96xf32>
    %cst_31 = arith.constant 1.000000e+00 : f32
    %179 = vector.broadcast %cst_31 : f32 to vector<64x96xf32>
    %180 = arith.addf %179, %178 : vector<64x96xf32>
    %181 = tpu.reciprocal %180 {approx = true} : vector<64x96xf32> -> vector<64x96xf32>
    %182 = arith.truncf %181 : vector<64x96xf32> to vector<64x96xbf16>
    %183 = vector.extract_strided_slice %182 {offsets = [0, 0], sizes = [8, 96], strides = [1, 1]} : vector<64x96xbf16> to vector<8x96xbf16>
    %184 = vector.extract_strided_slice %182 {offsets = [8, 0], sizes = [8, 96], strides = [1, 1]} : vector<64x96xbf16> to vector<8x96xbf16>
    %185 = vector.extract_strided_slice %182 {offsets = [16, 0], sizes = [8, 96], strides = [1, 1]} : vector<64x96xbf16> to vector<8x96xbf16>
    %186 = vector.extract_strided_slice %182 {offsets = [24, 0], sizes = [8, 96], strides = [1, 1]} : vector<64x96xbf16> to vector<8x96xbf16>
    %187 = vector.extract_strided_slice %182 {offsets = [32, 0], sizes = [8, 96], strides = [1, 1]} : vector<64x96xbf16> to vector<8x96xbf16>
    %188 = vector.extract_strided_slice %182 {offsets = [40, 0], sizes = [8, 96], strides = [1, 1]} : vector<64x96xbf16> to vector<8x96xbf16>
    %189 = vector.extract_strided_slice %182 {offsets = [48, 0], sizes = [8, 96], strides = [1, 1]} : vector<64x96xbf16> to vector<8x96xbf16>
    %190 = vector.extract_strided_slice %182 {offsets = [56, 0], sizes = [8, 96], strides = [1, 1]} : vector<64x96xbf16> to vector<8x96xbf16>
    %191 = tpu.concatenate %183, %184, %185, %186, %187, %188, %189, %190 in 1 : vector<8x96xbf16>, vector<8x96xbf16>, vector<8x96xbf16>, vector<8x96xbf16>, vector<8x96xbf16>, vector<8x96xbf16>, vector<8x96xbf16>, vector<8x96xbf16> -> vector<8x768xbf16>
    %c0_32 = arith.constant 0 : index
    %c0_33 = arith.constant 0 : index
    %192 = vector.load %arg8[%c0_32, %c0_33] : memref<768x128xbf16, #tpu.memory_space<vmem>>, vector<768x128xbf16>
    %cst_34 = arith.constant dense<0.000000e+00> : vector<8x128xf32>
    %193 = tpu.matmul %191, %192, %cst_34 {dimension_numbers = #tpu.dot_dimension_numbers<[1], [0], [0], [1], [0, 0, 1, 1], [], []>} : vector<8x768xbf16>, vector<768x128xbf16>, vector<8x128xf32> -> vector<8x128xf32>
    %c0_35 = arith.constant 0 : index
    %c0_36 = arith.constant 0 : index
    %194 = vector.load %arg9[%c0_35, %c0_36] : memref<1x128xf32, #tpu.memory_space<vmem>>, vector<1x128xf32>
    %195 = vector.broadcast %194 : vector<1x128xf32> to vector<8x128xf32>
    %196 = arith.addf %193, %195 : vector<8x128xf32>
    %c0_37 = arith.constant 0 : index
    %c0_38 = arith.constant 0 : index
    %c0_39 = arith.constant 0 : index
    %197 = vector.load %arg10[%c0_37, %c0_38, %c0_39] : memref<1x8x128xf32, #tpu.memory_space<vmem>>, vector<1x8x128xf32>
    %198 = vector.shape_cast %197 : vector<1x8x128xf32> to vector<8x128xf32>
    %199 = vector.shape_cast %196 : vector<8x128xf32> to vector<1x8x128xf32>
    tpu.vector_store %arg10[%c0_37, %c0_38, %c0_39], %199 {strides = array<i32>} : memref<1x8x128xf32, #tpu.memory_space<vmem>>, vector<1x8x128xf32>,
    return
  }
  func.func @transform_0(%arg0: i32) -> (i32, i32, i32) {
    %c0_i32 = arith.constant 0 : i32
    %c0_i32_0 = arith.constant 0 : i32
    %c0_i32_1 = arith.constant 0 : i32
    return %arg0, %c0_i32, %c0_i32_0 : i32, i32, i32
  }
  func.func @transform_1(%arg0: i32) -> (i32, i32) {
    %c0_i32 = arith.constant 0 : i32
    %c0_i32_0 = arith.constant 0 : i32
    %c0_i32_1 = arith.constant 0 : i32
    return %c0_i32, %c0_i32_0 : i32, i32
  }
  func.func @transform_2(%arg0: i32) -> (i32, i32) {
    %c0_i32 = arith.constant 0 : i32
    %c0_i32_0 = arith.constant 0 : i32
    %c0_i32_1 = arith.constant 0 : i32
    return %c0_i32, %c0_i32_0 : i32, i32
  }
  func.func @transform_3(%arg0: i32) -> (i32, i32) {
    %c0_i32 = arith.constant 0 : i32
    %c0_i32_0 = arith.constant 0 : i32
    %c0_i32_1 = arith.constant 0 : i32
    return %c0_i32, %c0_i32_0 : i32, i32
  }
  func.func @transform_4(%arg0: i32) -> (i32, i32) {
    %c0_i32 = arith.constant 0 : i32
    %c0_i32_0 = arith.constant 0 : i32
    %c0_i32_1 = arith.constant 0 : i32
    return %c0_i32, %c0_i32_0 : i32, i32
  }
  func.func @transform_5(%arg0: i32) -> (i32, i32) {
    %c0_i32 = arith.constant 0 : i32
    %c0_i32_0 = arith.constant 0 : i32
    %c0_i32_1 = arith.constant 0 : i32
    return %c0_i32, %c0_i32_0 : i32, i32
  }
  func.func @transform_6(%arg0: i32) -> (i32, i32) {
    %c0_i32 = arith.constant 0 : i32
    %c0_i32_0 = arith.constant 0 : i32
    %c0_i32_1 = arith.constant 0 : i32
    return %c0_i32, %c0_i32_0 : i32, i32
  }
  func.func @transform_7(%arg0: i32) -> (i32, i32) {
    %c0_i32 = arith.constant 0 : i32
    %c0_i32_0 = arith.constant 0 : i32
    %c0_i32_1 = arith.constant 0 : i32
    return %c0_i32, %c0_i32_0 : i32, i32
  }
  func.func @transform_8(%arg0: i32) -> (i32, i32) {
    %c0_i32 = arith.constant 0 : i32
    %c0_i32_0 = arith.constant 0 : i32
    %c0_i32_1 = arith.constant 0 : i32
    return %c0_i32, %c0_i32_0 : i32, i32
  }
  func.func @transform_9(%arg0: i32) -> (i32, i32, i32) {
    %c0_i32 = arith.constant 0 : i32
    %c0_i32_0 = arith.constant 0 : i32
    %c0_i32_1 = arith.constant 0 : i32
    return %arg0, %c0_i32, %c0_i32_0 : i32, i32, i32
  }
}

</mosaic_0001>

<bundles_post_ra>
// kernel: dlgnet_forward.1
= control target key start
LH: loop header
LB: loop body
LE: loop exit
PB: predicated region body
PF: predicated region fallthrough
CT: control target
= control target key end

     0   :  { %s6868_s0 = inlined_call_operand.vmem [shape: bf16[2,256,96], index: 0, kind: input, shape index: {}]   ;;  %s6869_s1 = inlined_call_operand.vmem [shape: bf16[480,192], index: 1, kind: input, shape index: {}]   ;;  %s6870_s2 = inlined_call_operand.vmem [shape: f32[1,192], index: 2, kind: input, shape index: {}]   ;;  %s6871_s3 = inlined_call_operand.vmem [shape: bf16[960,96], index: 3, kind: input, shape index: {}]   ;;  %s6872_s4 = inlined_call_operand.vmem [shape: f32[1,96], index: 4, kind: input, shape index: {}]   ;;  %s6873_s5 = inlined_call_operand.vmem [shape: bf16[480,96], index: 5, kind: input, shape index: {}]   ;;  %s6874_s6 = inlined_call_operand.vmem [shape: f32[1,96], index: 6, kind: input, shape index: {}]   ;;  %s6875_s7 = inlined_call_operand.vmem [shape: bf16[768,128], index: 7, kind: input, shape index: {}]   ;;  %s6876_s8 = inlined_call_operand.vmem [shape: f32[1,128], index: 8, kind: input, shape index: {}]   ;;  %s6877_s9 = inlined_call_operand.hbm [shape: f32[2,8,128], index: 9, kind: output, shape index: {}]  }
   0x1   :  { %6884 = sst [smem:[#allocation6_spill]] %s6868_s0 }
   0x2   :  { %14 = vsyncpa [#allocation3], 0 }
   0x3   :  { %16 = vsyncpa [#allocation3 + $0x1], 0  ;;  %s5160_s30 = smov 0   ;;  %s5162_s10 = smov 0  }
   0x4   :  { %s5164_s11 = smov 0   ;;  %s5166_s12 = smov 0  }
   0x5 LB: > { %s5181_s13 = sadd.s32 4294967295, %s5104_s12   ;;  %s3774_s14 = sadd.s32 4294967294, %s5104_s12   ;;  %s5104_s12 = sphi %s5166_s12, %s6896_s12   ;;  %s5100_s11 = sphi %s5164_s11, %s6895_s11   ;;  %s5096_s10 = sphi %s5162_s10, %s6894_s10   ;;  %s5092_s30 = sphi %s5160_s30, %s6893_s30  }
   0x6   : > { %s5185_s15 = sadd.s32 1, %s5104_s12   ;;  %s223_s16 = sadd.s32 1, %s5100_s11 }
   0x7   : > { %s220_s17 = ssub.s32 %s5104_s12, %s5185_s15  ;;  %p233_p0 = scmp.ne.s32.totalorder %s5100_s11, %s5096_s10 }
   0x8   : > { %p221_p1 = scmp.eq.s32.totalorder %s220_s17, 0  ;;  %p234_p2 = scmp.eq.s32.totalorder %s5181_s13, 1 }
   0x9   : > { %p239_p3 = scmp.ne.s32.totalorder %s5096_s10, %s5092_s30  ;;  %p240_p4 = scmp.eq.s32.totalorder %s3774_s14, 1 }
   0xa   : > { %s5196_s18 = scalar_select %p221_p1, %s5100_s11, %s223_s16  }
   0xb   : > { %p5198_p5 = por %p234_p2, %p233_p0  ;;  %p5202_p6 = por %p240_p4, %p239_p3 }
   0xc   : > { %6885 = sst [smem:[#allocation5_spill]] %s5196_s18  ;;  %p3777_p7 = scmp.ge.s32.totalorder %s5104_s12, 1 }
   0xd   : > { %p290_p8 = scmp.lt.s32.totalorder %s5104_s12, 3 }
   0xf   : > { %p291_p9 = pnand %p3777_p7, %p290_p8 }
  0x10   : > { %p326_p10 = scmp.lt.s32.totalorder (!%p291_p9), %s5181_s13, 1  ;;  %s6888_s0 = sld [smem:[#allocation6_spill]] (!%p291_p9) }
  0x11   : > { %294 = sbr.rel (%p291_p9) target bundleno = 1435 (0x59b), region = 56  ;;  %s6878_s23 = smov (!%p291_p9), 64  }
  0x12   : > { %s6882_s29 = smov (!%p291_p9), 32   ;;  %s6889_s16 = smov (!%p291_p9), 32  }
  0x13   : > { %s6891_s26 = smov (!%p291_p9), 64   ;;  %s323_s24 = sand.u32 (!%p291_p9), 1, %s5096_s10  }
  0x16   : > { %v4015_v0 = vld [vmem:[%s6869_s1 + $0x1d0] sm:$0xf]  ;;  %v4665_v1 = vld [vmem:[%s6869_s1 + $0x1d4] sm:$0xf0]  ;;  %v4007_v2 = vld [vmem:[%s6869_s1 + $0x1c0] sm:$0xf] }
  0x17   : > { %v4016_v3 = vor.u32 %v4665_v1, %v4015_v0  ;;  %v4663_v4 = vld [vmem:[%s6869_s1 + $0x1c4] sm:$0xf0]  ;;  %v3999_v6 = vld [vmem:[%s6869_s1 + $0x1b0] sm:$0xf]  ;;  %v4661_v7 = vld [vmem:[%s6869_s1 + $0x1b4] sm:$0xf0] }
  0x18   : > { %v4008_v5 = vor.u32 %v4663_v4, %v4007_v2  ;;  %s327_s21 = scalar_select %p326_p10, %s5181_s13, 1  ;;  %v4000_v8 = vor.u32 %v4661_v7, %v3999_v6  ;;  %v3991_v9 = vld [vmem:[%s6869_s1 + $0x1a0] sm:$0xf]  ;;  %v4659_v12 = vld [vmem:[%s6869_s1 + $0x1a4] sm:$0xf0]  ;;  %vm388_vm0 = vcmask 1043456  }
  0x19   : > { %1236 = vmatpush.bf16.msra.mxu3 %v4016_v3  ;;  %v3992_v22 = vor.u32 %v4659_v12, %v3991_v9  ;;  %v3983_v25 = vld [vmem:[%s6869_s1 + $0x190] sm:$0xf]  ;;  %v4657_v26 = vld [vmem:[%s6869_s1 + $0x194] sm:$0xf0]  ;;  %v3975_v34 = vld [vmem:[%s6869_s1 + $0x180] sm:$0xf] }
  0x1a   : > { %s4605_s22 = sshll.u32 %s327_s21, 7  ;;  %v3984_v33 = vor.u32 %v4657_v26, %v3983_v25  ;;  %v4655_v35 = vld [vmem:[%s6869_s1 + $0x184] sm:$0xf0]  ;;  %vm630_vm1 = vcmask 785408   ;;  %vm655_vm2 = vcmask 523264   ;;  %vm680_vm3 = vcmask 261120   ;;  %vm4277_vm4 = vmneg %vm388_vm0 }
  0x1b   : > { %s5231_s25 = scalar_lea.vmem %s6888_s0, %s4605_s22  ;;  %s6880_s22 = smov 96   ;;  %v3976_v43 = vor.u32 %v4655_v35, %v3975_v34  ;;  %vm4404_vm5 = vmneg %vm630_vm1 }
  0x1c   : > { %v333_v10 = vld [vmem:[%s5231_s25 + $0x4] sm:$0xf]  ;;  %v334_v11 = vld [vmem:[%s5231_s25 + $0x8] sm:$0xf]  ;;  %v335_v15 = vld [vmem:[%s5231_s25 + $0xc] sm:$0xf] }
  0x1d   : > { %1237 = vmatpush.bf16.msra.mxu3 %v4008_v5  ;;  %v414_v13 = vunpack.c.l.b16 %v333_v10  ;;  %v461_v14 = vunpack.c.l.b16 %v334_v11  ;;  %v5243_v16 = vld [vmem:[%s5231_s25 + $0x18] sm:$0xf]  ;;  %v5246_v17 = vld [vmem:[%s5231_s25] sm:$0xf]  ;;  %v509_v18 = vunpack.c.l.b16 %v335_v15  ;;  %v5249_v19 = vld [vmem:[%s5231_s25 + $0x1c] sm:$0xf] }
  0x1e   : > { %v336_v23 = vld [vmem:[%s5231_s25 + $0x10] sm:$0xf]  ;;  %v464_v24 = vunpack.c.l.b16 %v5243_v16  ;;  %v512_v27 = vunpack.c.l.b16 %v5249_v19  ;;  %v337_v32 = vld [vmem:[%s5231_s25 + $0x14] sm:$0xf]  ;;  %v5273_v39 = vld [vmem:[%s5231_s25 + $0x28] sm:$0xf] }
  0x1f   : > { %v415_v20 = vpack.c.b16 %v414_v13, %v414_v13  ;;  %v462_v21 = vpack.c.b16 %v461_v14, %v461_v14  ;;  %v510_v30 = vpack.c.b16 %v509_v18, %v509_v18  ;;  %v368_v31 = vunpack.c.l.b16 %v336_v23  ;;  %v343_v40 = vld [vmem:[%s5231_s25 + $0x2c] sm:$0xf]  ;;  %v341_v49 = vld [vmem:[%s5231_s25 + $0x24] sm:$0xf]  ;;  %v5289_v55 = vld [vmem:[%s5231_s25 + $0x38] sm:$0xf] }
  0x20   : > { %v465_v36 = vpack.c.b16 %v464_v24, %v464_v24  ;;  %v513_v37 = vpack.c.b16 %v512_v27, %v512_v27  ;;  %v417_v38 = vunpack.c.l.b16 %v337_v32  ;;  %v467_v47 = vunpack.c.l.b16 %v5273_v39  ;;  %v340_v56 = vld [vmem:[%s5231_s25 + $0x20] sm:$0xf]  ;;  %v347_v58 = vld [vmem:[%s5231_s25 + $0x3c] sm:$0xf]  ;;  %v345_v3 = vld [vmem:[%s5231_s25 + $0x34] sm:$0xf] }
  0x21   : > { %1238 = vmatpush.bf16.msra.mxu3 %v4000_v8  ;;  %v438_v28 = vsel %vm388_vm0, 0, %v415_v20  ;;  %v486_v29 = vsel %vm388_vm0, %v5246_v17, %v462_v21  ;;  %v534_v42 = vsel %vm388_vm0, %v333_v10, %v510_v30  ;;  %v369_v44 = vpack.c.b16 %v368_v31, %v368_v31  ;;  %v344_v4 = vld [vmem:[%s5231_s25 + $0x30] sm:$0xf]  ;;  %v5322_v14 = vld [vmem:[%s5231_s25 + $0x4c] sm:$0xf]  ;;  %s5062_s21 = scalar_lea.hbm %s6877_s9, 16 }
  0x22   : > { %566 = vrot.lane.b32.xlu1 %v438_v28, %s6880_s22  ;;  %590 = vrot.lane.b32.xlu0 %v486_v29, %s6878_s23  ;;  %v537_v41 = vsel %vm388_vm0, %v337_v32, %v513_v37  ;;  %v489_v45 = vsel %vm388_vm0, %v336_v23, %v465_v36  ;;  %v418_v46 = vpack.c.b16 %v417_v38, %v417_v38  ;;  %v515_v48 = vunpack.c.l.b16 %v343_v40  ;;  %v5337_v28 = vld [vmem:[%s5231_s25 + $0x58] sm:$0xf]  ;;  %v3839_v30 = vld [vmem:[%s6869_s1 + $0x70] sm:$0xf] }
  0x23   : > { %616 = vrot.lane.b32.xlu2 %v537_v41, %s6882_s29  ;;  %v420_v50 = vunpack.c.l.b16 %v341_v49  ;;  %v5285_v51 = vsel %vm388_vm0, %v334_v11, %v369_v44  ;;  %v468_v52 = vpack.c.b16 %v467_v47, %v467_v47  ;;  %v470_v61 = vunpack.c.l.b16 %v5289_v55  ;;  %v5315_v11 = vld [vmem:[%s5231_s25 + $0x48] sm:$0xf]  ;;  %v4621_v31 = vld [vmem:[%s6869_s1 + $0x74] sm:$0xf0]  ;;  %v3903_v32 = vld [vmem:[%s6869_s1 + $0xf0] sm:$0xf] }
  0x24   : > { %v441_v53 = vsel %vm388_vm0, %v335_v15, %v418_v46  ;;  %v516_v54 = vpack.c.b16 %v515_v48, %v515_v48  ;;  %v518_v62 = vunpack.c.l.b16 %v347_v58  ;;  %v371_v63 = vunpack.c.l.b16 %v340_v56  ;;  %v5353_v34 = vld [vmem:[%s5231_s25 + $0x50] sm:$0xf]  ;;  %v4637_v37 = vld [vmem:[%s6869_s1 + $0xf4] sm:$0xf0]  ;;  %v5360_v38 = vld [vmem:[%s5231_s25 + $0x5c] sm:$0xf] }
  0x25   : > { %1239 = vmatpush.bf16.msra.mxu3 %v3992_v22  ;;  %v421_v57 = vpack.c.b16 %v420_v50, %v420_v50  ;;  %v492_v59 = vsel %vm388_vm0, %v340_v56, %v468_v52  ;;  %v471_v0 = vpack.c.b16 %v470_v61, %v470_v61  ;;  %v423_v5 = vunpack.c.l.b16 %v345_v3  ;;  %v3831_v41 = vld [vmem:[%s6869_s1 + $0x60] sm:$0xf]  ;;  %v4635_v47 = vld [vmem:[%s6869_s1 + $0xe4] sm:$0xf0]  ;;  %v3823_v50 = vld [vmem:[%s6869_s1 + $0x50] sm:$0xf] }
  0x26   : > { %v540_v60 = vsel %vm388_vm0, %v341_v49, %v516_v54  ;;  %v519_v2 = vpack.c.b16 %v518_v62, %v518_v62  ;;  %v372_v6 = vpack.c.b16 %v371_v63, %v371_v63  ;;  %v473_v12 = vunpack.c.l.b16 %v5315_v11  ;;  %v4617_v52 = vld [vmem:[%s6869_s1 + $0x54] sm:$0xf0]  ;;  %v3887_v56 = vld [vmem:[%s6869_s1 + $0xd0] sm:$0xf] }
  0x27   : > { %v444_v1 = vsel %vm388_vm0, %v5249_v19, %v421_v57  ;;  %v495_v7 = vsel %vm388_vm0, %v344_v4, %v471_v0  ;;  %v424_v9 = vpack.c.b16 %v423_v5, %v423_v5  ;;  %v521_v18 = vunpack.c.l.b16 %v5322_v14  ;;  %v348_v19 = vld [vmem:[%s5231_s25 + $0x40] sm:$0xf]  ;;  %v4633_v57 = vld [vmem:[%s6869_s1 + $0xd4] sm:$0xf0] }
  0x28   : > { %v543_v8 = vsel %vm388_vm0, %v345_v3, %v519_v2  ;;  %v5312_v10 = vsel %vm388_vm0, %v5243_v16, %v372_v6  ;;  %v474_v15 = vpack.c.b16 %v473_v12, %v473_v12  ;;  %v349_v16 = vld [vmem:[%s5231_s25 + $0x44] sm:$0xf]  ;;  %v374_v22 = vunpack.c.l.b16 %v344_v4  ;;  %v5404_v3 = vld [vmem:[%s5231_s25 + $0x68] sm:$0xf]  ;;  %v5410_v5 = vld [vmem:[%s5231_s25 + $0x60] sm:$0xf] }
  0x29   : > { %1240 = vmatpush.bf16.msra.mxu3 %v3984_v33  ;;  %v447_v13 = vsel %vm388_vm0, %v343_v40, %v424_v9  ;;  %v522_v21 = vpack.c.b16 %v521_v18, %v521_v18  ;;  %v426_v24 = vunpack.c.l.b16 %v349_v16  ;;  %v476_v29 = vunpack.c.l.b16 %v5337_v28  ;;  %v3815_v6 = vld [vmem:[%s6869_s1 + $0x40] sm:$0xf]  ;;  %v4651_v18 = vld [vmem:[%s6869_s1 + $0x164] sm:$0xf0] }
  0x2a   : > { %614 = vrot.lane.b32.xlu0 %v534_v42, %s6882_s29  ;;  %592 = vrot.lane.b32.xlu1 %v489_v45, %s6878_s23  ;;  %v498_v20 = vsel %vm388_vm0, %v348_v19, %v474_v15  ;;  %v375_v25 = vpack.c.b16 %v374_v22, %v374_v22  ;;  %v3840_v36 = vor.u32 %v4621_v31, %v3839_v30  ;;  %v524_v40 = vunpack.c.l.b16 %v5360_v38  ;;  %v4619_v42 = vld [vmem:[%s6869_s1 + $0x64] sm:$0xf0]  ;;  %v353_v45 = vld [vmem:[%s5231_s25 + $0x54] sm:$0xf] }
  0x2b   : > { %568 = vrot.lane.b32.xlu2 %v441_v53, %s6880_s22  ;;  %v546_v23 = vsel %vm388_vm0, %v349_v16, %v522_v21  ;;  %v427_v26 = vpack.c.b16 %v426_v24, %v426_v24  ;;  %v477_v35 = vpack.c.b16 %v476_v29, %v476_v29  ;;  %v3832_v46 = vor.u32 %v4619_v42, %v3831_v41  ;;  %v3967_v53 = vld [vmem:[%s6869_s1 + $0x170] sm:$0xf]  ;;  %v3959_v15 = vld [vmem:[%s6869_s1 + $0x160] sm:$0xf]  ;;  %v4629_v24 = vld [vmem:[%s6869_s1 + $0xb4] sm:$0xf0] }
  0x2c   : > { %v5334_v27 = vsel %vm388_vm0, %v5273_v39, %v375_v25  ;;  %v3904_v39 = vor.u32 %v4637_v37, %v3903_v32  ;;  %1087 = vmatpush.bf16.msra.mxu0 %v3840_v36  ;;  %v525_v48 = vpack.c.b16 %v524_v40, %v524_v40  ;;  %v377_v54 = vunpack.c.l.b16 %v348_v19  ;;  %v3871_v21 = vld [vmem:[%s6869_s1 + $0xb0] sm:$0xf]  ;;  %v5455_v30 = vld [vmem:[%s5231_s25 + $0x6c] sm:$0xf]  ;;  %v3799_v31 = vld [vmem:[%s6869_s1 + $0x20] sm:$0xf] }
  0x2d   : > { %1241 = vmatpush.bf16.msra.mxu3 %v3976_v43  ;;  %v450_v33 = vsel %vm388_vm0, %v347_v58, %v427_v26  ;;  %v3895_v43 = vld [vmem:[%s6869_s1 + $0xe0] sm:$0xf]  ;;  %v501_v44 = vsel %vm388_vm0, %v5353_v34, %v477_v35  ;;  %v4653_v58 = vld [vmem:[%s6869_s1 + $0x174] sm:$0xf0]  ;;  %v3824_v61 = vor.u32 %v4617_v52, %v3823_v50  ;;  %v429_v62 = vunpack.c.l.b16 %v353_v45  ;;  %v3951_v25 = vld [vmem:[%s6869_s1 + $0x150] sm:$0xf] }
  0x2e   : > { %1136 = vmatpush.bf16.msra.mxu1 %v3904_v39  ;;  %v3896_v49 = vor.u32 %v4635_v47, %v3895_v43  ;;  %v3888_v63 = vor.u32 %v4633_v57, %v3887_v56  ;;  %v378_v0 = vpack.c.b16 %v377_v54, %v377_v54  ;;  %v479_v4 = vunpack.c.l.b16 %v5404_v3  ;;  %v4649_v26 = vld [vmem:[%s6869_s1 + $0x154] sm:$0xf0]  ;;  %v4611_v36 = vld [vmem:[%s6869_s1 + $0x24] sm:$0xf0]  ;;  %v3863_v37 = vld [vmem:[%s6869_s1 + $0xa0] sm:$0xf] }
  0x2f   : > { %v3960_v16 = vor.u32 %v4651_v18, %v3959_v15  ;;  %v3872_v29 = vor.u32 %v4629_v24, %v3871_v21  ;;  %v380_v32 = vunpack.c.l.b16 %v5353_v34  ;;  %v527_v35 = vunpack.c.l.b16 %v5455_v30  ;;  %v4627_v39 = vld [vmem:[%s6869_s1 + $0xa4] sm:$0xf0]  ;;  %v357_v40 = vld [vmem:[%s5231_s25 + $0x64] sm:$0xf]  ;;  %v3943_v34 = vld [vmem:[%s6869_s1 + $0x140] sm:$0xf] }
  0x30   : > { %4021 = vmatmul.msk.bf16.vlgmr.msra.gmra.mxu3 %vm630_vm1, %v5285_v51  ;;  %1088 = vmatpush.bf16.msra.mxu0 %v3832_v46  ;;  %v5401_v2 = vsel %vm388_vm0, %v5289_v55, %v378_v0  ;;  %v3879_v55 = vld [vmem:[%s6869_s1 + $0xc0] sm:$0xf]  ;;  %v480_v9 = vpack.c.b16 %v479_v4, %v479_v4  ;;  %v4647_v41 = vld [vmem:[%s6869_s1 + $0x144] sm:$0xf0]  ;;  %v3800_v43 = vor.u32 %v4611_v36, %v3799_v31  ;;  %v4609_v46 = vld [vmem:[%s6869_s1 + $0x14] sm:$0xf0]  ;;  %v383_v21 = vunpack.c.l.b16 %v5410_v5 }
  0x31   : > { %v528_v42 = vpack.c.b16 %v527_v35, %v527_v35  ;;  %v381_v47 = vpack.c.b16 %v380_v32, %v380_v32  ;;  %v3855_v50 = vld [vmem:[%s6869_s1 + $0x90] sm:$0xf]  ;;  %v4625_v52 = vld [vmem:[%s6869_s1 + $0x94] sm:$0xf0]  ;;  %v3783_v0 = vld [vmem:[%s6869_s1] sm:$0xf] }
  0x32   : > { %594 = vrot.lane.b32.xlu0 %v492_v59, %s6878_s23  ;;  %618 = vrot.lane.b32.xlu1 %v540_v60, %s6882_s29  ;;  %v549_v59 = vsel %vm388_vm0, %v353_v45, %v525_v48  ;;  %v3968_v60 = vor.u32 %v4653_v58, %v3967_v53  ;;  %v504_v22 = vsel %vm388_vm0, %v5410_v5, %v480_v9  ;;  %v3791_v45 = vld [vmem:[%s6869_s1 + $0x10] sm:$0xf]  ;;  %v4645_v54 = vld [vmem:[%s6869_s1 + $0x134] sm:$0xf0] }
  0x33   : > { %570 = vrot.lane.b32.xlu2 %v444_v1, %s6880_s22  ;;  %1137 = vmatpush.bf16.msra.mxu1 %v3896_v49  ;;  %v430_v1 = vpack.c.b16 %v429_v62, %v429_v62  ;;  %v552_v48 = vsel %vm388_vm0, %v357_v40, %v528_v42  ;;  %v3944_v49 = vor.u32 %v4647_v41, %v3943_v34  ;;  %v3935_v53 = vld [vmem:[%s6869_s1 + $0x130] sm:$0xf]  ;;  %v432_v62 = vunpack.c.l.b16 %v357_v40  ;;  %v4643_v15 = vld [vmem:[%s6869_s1 + $0x124] sm:$0xf0]  ;;  %v4641_v24 = vld [vmem:[%s6869_s1 + $0x114] sm:$0xf0] }
  0x34   : > { %1185 = vmatpush.bf16.msra.mxu2 %v3968_v60  ;;  %1089 = vmatpush.bf16.msra.mxu0 %v3824_v61  ;;  %v3792_v56 = vor.u32 %v4609_v46, %v3791_v45  ;;  %v3856_v57 = vor.u32 %v4625_v52, %v3855_v50  ;;  %v5500_v58 = vsel %vm388_vm0, %v5315_v11, %v381_v47  ;;  %v5503_v60 = vld [vmem:[%s5231_s25 + $0x78] sm:$0xf]  ;;  %v3841_v11 = vld [vmem:[%s6869_s1 + $0x78] sm:$0xf0]  ;;  %v361_v36 = vld [vmem:[%s5231_s25 + $0x74] sm:$0xf] }
  0x35   : > { %v482_v61 = vunpack.c.l.b16 %v5503_v60  ;;  %v3825_v5 = vld [vmem:[%s6869_s1 + $0x58] sm:$0xf0]  ;;  %v4614_v41 = vld [vmem:[%s6869_s1 + $0x44] sm:$0xf]  ;;  %v3817_v42 = vld [vmem:[%s6869_s1 + $0x48] sm:$0xf0]  ;;  %v435_v45 = vunpack.c.l.b16 %v361_v36 }
  0x36   : > { %v4664_v46 = vld [vmem:[%s6869_s1 + $0x1d4] sm:$0xf]  ;;  %v4017_v47 = vld [vmem:[%s6869_s1 + $0x1d8] sm:$0xf0] }
  0x37   : > { %1138 = vmatpush.bf16.msra.mxu1 %v3888_v63  ;;  %v4620_v63 = vld [vmem:[%s6869_s1 + $0x74] sm:$0xf]  ;;  %v483_v4 = vpack.c.b16 %v482_v61, %v482_v61  ;;  %v4610_v61 = vld [vmem:[%s6869_s1 + $0x24] sm:$0xf] }
  0x38   : > { %1186 = vmatpush.bf16.msra.mxu2 %v3960_v16  ;;  %v433_v16 = vpack.c.b16 %v432_v62, %v432_v62  ;;  %v4612_v50 = vld [vmem:[%s6869_s1 + $0x34] sm:$0xf]  ;;  %v3801_v62 = vld [vmem:[%s6869_s1 + $0x28] sm:$0xf0] }
  0x3a   : > { %596 = vrot.lane.b32.xlu0 %v495_v7, %s6878_s23  ;;  %620 = vrot.lane.b32.xlu1 %v543_v8, %s6882_s29  ;;  %v4615_v7 = vld [vmem:[%s6869_s1 + $0x44] sm:$0xf0]  ;;  %v453_v8 = vsel %vm388_vm0, %v5322_v14, %v430_v1  ;;  %v3807_v14 = vld [vmem:[%s6869_s1 + $0x30] sm:$0xf]  ;;  %v3844_v1 = vor.u32 %v4620_v63, %v3841_v11  ;;  %v456_v31 = vsel %vm388_vm0, %v5360_v38, %v433_v16 }
  0x3b   : > { %572 = vrot.lane.b32.xlu2 %v447_v13, %s6880_s22  ;;  %v3816_v12 = vor.u32 %v4615_v7, %v3815_v6  ;;  %v4631_v13 = vld [vmem:[%s6869_s1 + $0xc4] sm:$0xf0]  ;;  %v3847_v7 = vld [vmem:[%s6869_s1 + $0x80] sm:$0xf]  ;;  %v436_v63 = vpack.c.b16 %v435_v45, %v435_v45  ;;  %v3961_v16 = vld [vmem:[%s6869_s1 + $0x168] sm:$0xf0] }
  0x3c   : > { %v3880_v19 = vor.u32 %v4631_v13, %v3879_v55  ;;  %v4607_v6 = vld [vmem:[%s6869_s1 + $0x4] sm:$0xf0]  ;;  %v3927_v13 = vld [vmem:[%s6869_s1 + $0x120] sm:$0xf]  ;;  %1283 = vmatpush.bf16.msrb.mxu3 %v3844_v1  ;;  %v4608_v1 = vld [vmem:[%s6869_s1 + $0x14] sm:$0xf] }
  0x3d   : > { %1090 = vmatpush.bf16.msra.mxu0 %v3816_v12  ;;  %v4623_v55 = vld [vmem:[%s6869_s1 + $0x84] sm:$0xf0]  ;;  %v3784_v9 = vor.u32 %v4607_v6, %v3783_v0  ;;  %v3804_v0 = vor.u32 %v4610_v61, %v3801_v62  ;;  %v459_v6 = vsel %vm388_vm0, %v5455_v30, %v436_v63  ;;  %v4001_v45 = vld [vmem:[%s6869_s1 + $0x1b8] sm:$0xf0]  ;;  %v4658_v63 = vld [vmem:[%s6869_s1 + $0x1a4] sm:$0xf] }
  0x3e   : > { %1139 = vmatpush.bf16.msra.mxu1 %v3880_v19  ;;  %v3848_v12 = vor.u32 %v4623_v55, %v3847_v7  ;;  %v3928_v19 = vor.u32 %v4643_v15, %v3927_v13 }
  0x40   : > { %4022 = vmatmul.msk.bf16.gmra.mxu3 %vm630_vm1, %v5312_v10 }
  0x42   : > { %598 = vrot.lane.b32.xlu0 %v498_v20, %s6878_s23  ;;  %622 = vrot.lane.b32.xlu1 %v546_v23, %s6882_s29  ;;  %s6890_s29 = smov 96   ;;  %v4613_v20 = vld [vmem:[%s6869_s1 + $0x34] sm:$0xf0] }
  0x43   : > { %574 = vrot.lane.b32.xlu2 %v450_v33, %s6880_s22  ;;  %v3808_v23 = vor.u32 %v4613_v20, %v3807_v14  ;;  %v3952_v33 = vor.u32 %v4649_v26, %v3951_v25  ;;  %1140 = vmatpush.bf16.msra.mxu1 %v3872_v29  ;;  %v4618_v14 = vld [vmem:[%s6869_s1 + $0x64] sm:$0xf]  ;;  %v3833_v20 = vld [vmem:[%s6869_s1 + $0x68] sm:$0xf0]  ;;  %v363_v26 = vld [vmem:[%s5231_s25 + $0x7c] sm:$0xf] }
  0x44   : > { %v4616_v29 = vld [vmem:[%s6869_s1 + $0x54] sm:$0xf]  ;;  %v530_v32 = vunpack.c.l.b16 %v363_v26 }
  0x45   : > { %1091 = vmatpush.bf16.msra.mxu0 %v3808_v23  ;;  %1187 = vmatpush.bf16.msra.mxu2 %v3952_v33  ;;  %v3919_v23 = vld [vmem:[%s6869_s1 + $0x110] sm:$0xf]  ;;  %v384_v33 = vpack.c.b16 %v383_v21, %v383_v21  ;;  %v3828_v35 = vor.u32 %v4616_v29, %v3825_v5  ;;  %v4009_v21 = vld [vmem:[%s6869_s1 + $0x1c8] sm:$0xf0] }
  0x46   : > { %v3920_v25 = vor.u32 %v4641_v24, %v3919_v23  ;;  %v531_v40 = vpack.c.b16 %v530_v32, %v530_v32 }
  0x48   : > { %v555_v38 = vsel %vm388_vm0, %v361_v36, %v531_v40  ;;  %v3889_v36 = vld [vmem:[%s6869_s1 + $0xd8] sm:$0xf0] }
  0x49   : > { %1092 = vmatpush.bf16.msra.mxu0 %v3800_v43  ;;  %1188 = vmatpush.bf16.msra.mxu2 %v3944_v49  ;;  %v5577_v43 = vsel %vm388_vm0, %v5337_v28, %v384_v33  ;;  %v4636_v28 = vld [vmem:[%s6869_s1 + $0xf4] sm:$0xf]  ;;  %v3905_v49 = vld [vmem:[%s6869_s1 + $0xf8] sm:$0xf0] }
  0x4a   : > { %600 = vrot.lane.b32.xlu0 %v501_v44, %s6878_s23  ;;  %624 = vrot.lane.b32.xlu1 %v549_v59, %s6889_s16  ;;  %v3864_v44 = vor.u32 %v4627_v39, %v3863_v37  ;;  %v3936_v59 = vor.u32 %v4645_v54, %v3935_v53  ;;  %v3911_v37 = vld [vmem:[%s6869_s1 + $0x100] sm:$0xf]  ;;  %v4639_v39 = vld [vmem:[%s6869_s1 + $0x104] sm:$0xf0]  ;;  %v3908_v52 = vor.u32 %v4636_v28, %v3905_v49 }
  0x4b   : > { %576 = vrot.lane.b32.xlu2 %v453_v8, %s6890_s29  ;;  %v5527_v8 = vld [vmem:[%s5231_s25 + $0x70] sm:$0xf]  ;;  %v3912_v34 = vor.u32 %v4639_v39, %v3911_v37  ;;  %v3809_v53 = vld [vmem:[%s6869_s1 + $0x38] sm:$0xf0]  ;;  %v4652_v54 = vld [vmem:[%s6869_s1 + $0x174] sm:$0xf] }
  0x4c   : > { %1141 = vmatpush.bf16.msra.mxu1 %v3864_v44  ;;  %v507_v18 = vsel %vm388_vm0, %v5527_v8, %v483_v4  ;;  %v3820_v44 = vor.u32 %v4614_v41, %v3817_v42  ;;  %v386_v11 = vunpack.c.l.b16 %v5527_v8  ;;  %v3793_v4 = vld [vmem:[%s6869_s1 + $0x18] sm:$0xf0]  ;;  %v4606_v8 = vld [vmem:[%s6869_s1 + $0x4] sm:$0xf]  ;;  %v3881_v28 = vld [vmem:[%s6869_s1 + $0xc8] sm:$0xf0] }
  0x4d   : > { %1093 = vmatpush.bf16.msra.mxu0 %v3792_v56  ;;  %1189 = vmatpush.bf16.msra.mxu2 %v3936_v59  ;;  %v3969_v56 = vld [vmem:[%s6869_s1 + $0x178] sm:$0xf0]  ;;  %v3796_v55 = vor.u32 %v4608_v1, %v3793_v4  ;;  %v4646_v49 = vld [vmem:[%s6869_s1 + $0x144] sm:$0xf]  ;;  %s4602_s25 = sshll.u32 %s5181_s13, 3  ;;  %s3700_s13 = scalar_lea.sflag [#allocation3], %s323_s24 }
  0x4e   : > { %v3972_v59 = vor.u32 %v4652_v54, %v3969_v56  ;;  %v387_v7 = vpack.c.b16 %v386_v11, %v386_v11  ;;  %v3953_v39 = vld [vmem:[%s6869_s1 + $0x158] sm:$0xf0]  ;;  %v3993_v11 = vld [vmem:[%s6869_s1 + $0x1a8] sm:$0xf0]  ;;  %s3710_s14 = scalar_lea.hbm %s6877_s9, %s4602_s25 }
  0x4f   : > { %v3996_v1 = vor.u32 %v4658_v63, %v3993_v11  ;;  %v3873_v4 = vld [vmem:[%s6869_s1 + $0xb8] sm:$0xf0]  ;;  %v4638_v63 = vld [vmem:[%s6869_s1 + $0x104] sm:$0xf]  ;;  %s3714_s17 = sshll.u32 %s3710_s14, 4  ;;  %s3715_s17 = int_to_ptr.hbm [resolvable:$true] %s3714_s17 }
  0x50   : > { %4023 = vmatmul.msk.bf16.gmra.mxu3 %vm630_vm1, %v5334_v27  ;;  %1142 = vmatpush.bf16.msra.mxu1 %v3856_v57  ;;  %v3812_v57 = vor.u32 %v4612_v50, %v3809_v53  ;;  %v5631_v13 = vsel %vm388_vm0, %v5404_v3, %v387_v7  ;;  %v3937_v7 = vld [vmem:[%s6869_s1 + $0x138] sm:$0xf0] }
  0x51   : > { %1094 = vmatpush.bf16.msra.mxu0 %v3784_v9  ;;  %1190 = vmatpush.bf16.msra.mxu2 %v3928_v19  ;;  %v3785_v9 = vld [vmem:[%s6869_s1 + $0x8] sm:$0xf0] }
  0x52   : > { %602 = vrot.lane.b32.xlu0 %v504_v22, %s6891_s26  ;;  %626 = vrot.lane.b32.xlu1 %v552_v48, %s6889_s16  ;;  %v3836_v22 = vor.u32 %v4618_v14, %v3833_v20  ;;  %v4020_v48 = vor.u32 %v4664_v46, %v4017_v47  ;;  %v3788_v30 = vor.u32 %v4606_v8, %v3785_v9  ;;  %v3897_v19 = vld [vmem:[%s6869_s1 + $0xe8] sm:$0xf0]  ;;  %v4662_v20 = vld [vmem:[%s6869_s1 + $0x1c4] sm:$0xf] }
  0x53   : > { %578 = vrot.lane.b32.xlu2 %v456_v31, %s6890_s29  ;;  %v4012_v23 = vor.u32 %v4662_v20, %v4009_v21  ;;  %v5661_v31 = vsel %vm388_vm0, %v5503_v60, 0  ;;  %v4648_v60 = vld [vmem:[%s6869_s1 + $0x154] sm:$0xf]  ;;  %v3929_v20 = vld [vmem:[%s6869_s1 + $0x128] sm:$0xf0] }
  0x54   : > { %1143 = vmatpush.bf16.msra.mxu1 %v3848_v12  ;;  %1284 = vmatpush.bf16.msrb.mxu3 %v3836_v22  ;;  %v365_v12 = vunpack.c.l.b16 %v5246_v17  ;;  %v4650_v17 = vld [vmem:[%s6869_s1 + $0x164] sm:$0xf] }
  0x55   : > { %1191 = vmatpush.bf16.msra.mxu2 %v3920_v25  ;;  %1332 = vmatpush.bf16.msrb.mxu0 %v3908_v52  ;;  %v3964_v14 = vor.u32 %v4650_v17, %v3961_v16  ;;  %v3945_v52 = vld [vmem:[%s6869_s1 + $0x148] sm:$0xf0]  ;;  %v4626_v17 = vld [vmem:[%s6869_s1 + $0xa4] sm:$0xf] }
  0x56   : > { %v366_v15 = vpack.c.b16 %v365_v12, %v365_v12  ;;  %v3948_v56 = vor.u32 %v4646_v49, %v3945_v52  ;;  %v4642_v16 = vld [vmem:[%s6869_s1 + $0x124] sm:$0xf] }
  0x57   : > { %v4654_v49 = vld [vmem:[%s6869_s1 + $0x184] sm:$0xf] }
  0x58   : > { %1285 = vmatpush.bf16.msrb.mxu3 %v3828_v35  ;;  %1381 = vmatpush.bf16.msrb.mxu1 %v3972_v59  ;;  %v391_v22 = vsel %vm388_vm0, 0, %v366_v15  ;;  %v4632_v35 = vld [vmem:[%s6869_s1 + $0xd4] sm:$0xf] }
  0x59   : > { %1192 = vmatpush.bf16.msra.mxu2 %v3912_v34  ;;  %v3892_v37 = vor.u32 %v4632_v35, %v3889_v36 }
  0x5a   : > { %604 = vrot.lane.b32.xlu0 %v507_v18, %s6891_s26  ;;  %628 = vrot.lane.b32.xlu1 %v555_v38, %s6889_s16  ;;  %v4634_v18 = vld [vmem:[%s6869_s1 + $0xe4] sm:$0xf]  ;;  %v3956_v38 = vor.u32 %v4648_v60, %v3953_v39  ;;  %v3857_v39 = vld [vmem:[%s6869_s1 + $0x98] sm:$0xf0] }
  0x5b   : > { %580 = vrot.lane.b32.xlu2 %v459_v6, %s6890_s29  ;;  %v3900_v3 = vor.u32 %v4634_v18, %v3897_v19  ;;  %v4644_v6 = vld [vmem:[%s6869_s1 + $0x134] sm:$0xf] }
  0x5c   : > { %1286 = vmatpush.bf16.msrb.mxu3 %v3820_v44  ;;  %1382 = vmatpush.bf16.msrb.mxu1 %v3964_v14  ;;  %v4660_v44 = vld [vmem:[%s6869_s1 + $0x1b4] sm:$0xf]  ;;  %v3940_v12 = vor.u32 %v4644_v6, %v3937_v7 }
  0x5d   : > { %1432 = vmatpush.bf16.msrb.mxu2 %v4020_v48  ;;  %1333 = vmatpush.bf16.msrb.mxu0 %v3900_v3  ;;  %v4004_v46 = vor.u32 %v4660_v44, %v4001_v45  ;;  %v4630_v48 = vld [vmem:[%s6869_s1 + $0xc4] sm:$0xf]  ;;  %v3865_v3 = vld [vmem:[%s6869_s1 + $0xa8] sm:$0xf0] }
  0x5e   : > { %v3884_v50 = vor.u32 %v4630_v48, %v3881_v28  ;;  %v3868_v14 = vor.u32 %v4626_v17, %v3865_v3 }
  0x60   : > { %4024 = vmatmul.msk.bf16.gmra.mxu3 %vm630_vm1, %v5401_v2  ;;  %1383 = vmatpush.bf16.msrb.mxu1 %v3956_v38  ;;  %v3921_v38 = vld [vmem:[%s6869_s1 + $0x118] sm:$0xf0] }
  0x61   : > { %1287 = vmatpush.bf16.msrb.mxu3 %v3812_v57  ;;  %1433 = vmatpush.bf16.msrb.mxu2 %v4012_v23  ;;  %v3932_v23 = vor.u32 %v4642_v16, %v3929_v20 }
  0x62   : > { %1334 = vmatpush.bf16.msrb.mxu0 %v3892_v37  ;;  %v4624_v37 = vld [vmem:[%s6869_s1 + $0x94] sm:$0xf] }
  0x64   : > { %1384 = vmatpush.bf16.msrb.mxu1 %v3948_v56 }
  0x65   : > { %1288 = vmatpush.bf16.msrb.mxu3 %v3804_v0  ;;  %1434 = vmatpush.bf16.msrb.mxu2 %v4004_v46  ;;  %v4628_v0 = vld [vmem:[%s6869_s1 + $0xb4] sm:$0xf] }
  0x66   : > { %1335 = vmatpush.bf16.msrb.mxu0 %v3884_v50  ;;  %v3876_v9 = vor.u32 %v4628_v0, %v3873_v4  ;;  %v3977_v50 = vld [vmem:[%s6869_s1 + $0x188] sm:$0xf0] }
  0x67   : > { %v3980_v52 = vor.u32 %v4654_v49, %v3977_v50  ;;  %v3913_v0 = vld [vmem:[%s6869_s1 + $0x108] sm:$0xf0] }
  0x68   : > { %1385 = vmatpush.bf16.msrb.mxu1 %v3940_v12  ;;  %v3916_v6 = vor.u32 %v4638_v63, %v3913_v0 }
  0x69   : > { %1289 = vmatpush.bf16.msrb.mxu3 %v3796_v55  ;;  %1435 = vmatpush.bf16.msrb.mxu2 %v3996_v1 }
  0x6a   : > { %1336 = vmatpush.bf16.msrb.mxu0 %v3876_v9 }
  0x6c   : > { %1386 = vmatpush.bf16.msrb.mxu1 %v3932_v23 }
  0x6d   : > { %1290 = vmatpush.bf16.msrb.mxu3 %v3788_v30 }
  0x6e   : > { %1337 = vmatpush.bf16.msrb.mxu0 %v3868_v14 }
  0x70   : > { %4025 = vmatmul.msk.bf16.gmra.mxu3 %vm630_vm1, %v5500_v58 }
  0x7d   : > { %v617_v5 = vpop.permute.xlu2 %616 }
  0x80   : > { %4026 = vmatmul.msk.bf16.gmra.mxu3 %vm630_vm1, %v5577_v43 }
  0x85   : > { %v569_v40 = vpop.permute.xlu2 %568 }
  0x86   : > { %v635_v41 = vsel %vm630_vm1, %v5285_v51, %v569_v40 }
  0x8d   : > { %v571_v53 = vpop.permute.xlu2 %570 }
  0x8e   : > { %v638_v57 = vsel %vm630_vm1, %v5312_v10, %v571_v53 }
  0x90   : > { %4027 = vmatmul.msk.bf16.gmra.mxu3 %vm630_vm1, %v5631_v13 }
  0x94   : > { %v567_v24 = vpop.permute.xlu1 %566  ;;  %v591_v25 = vpop.permute.xlu0 %590 }
  0x95   : > { %v632_v26 = vsel %vm630_vm1, %v391_v22, %v567_v24  ;;  %v5656_v29 = vsel %vm655_vm2, %v567_v24, %v591_v25  ;;  %v573_v55 = vpop.permute.xlu2 %572  ;;  %v4656_v24 = vld [vmem:[%s6869_s1 + $0x194] sm:$0xf] }
  0x96   : > { %1095 = vmatmul.bf16.vlgmr.msra.gmra.mxu0 %v632_v26  ;;  %1144 = vmatmul.bf16.vlgmr.msra.gmra.mxu1 %v5656_v29  ;;  %v641_v30 = vsel %vm630_vm1, %v5334_v27, %v573_v55 }
  0x9c   : > { %v615_v32 = vpop.permute.xlu0 %614  ;;  %v593_v34 = vpop.permute.xlu1 %592 }
  0x9d   : > { %v5664_v33 = vsel %vm680_vm3, %v591_v25, %v615_v32  ;;  %v5684_v42 = vsel %vm655_vm2, %v569_v40, %v593_v34  ;;  %v5694_v47 = vsel %vm680_vm3, %v593_v34, %v617_v5  ;;  %v575_v21 = vpop.permute.xlu2 %574  ;;  %v3985_v25 = vld [vmem:[%s6869_s1 + $0x198] sm:$0xf0]  ;;  %v4640_v40 = vld [vmem:[%s6869_s1 + $0x114] sm:$0xf]  ;;  %v3860_v34 = vor.u32 %v4624_v37, %v3857_v39 }
  0x9e   : > { %1193 = vmatmul.bf16.vlgmr.msra.gmra.mxu2 %v5664_v33  ;;  %v644_v5 = vsel %vm630_vm1, %v5401_v2, %v575_v21  ;;  %v3924_v45 = vor.u32 %v4640_v40, %v3921_v38 }
  0x9f   : > { %1338 = vmatpush.bf16.msrb.mxu0 %v3860_v34 }
  0xa0   : > { %4028 = vmatmul.msk.bf16.gmra.mxu3 %vm630_vm1, %v5661_v31  ;;  %1387 = vmatpush.bf16.msrb.mxu1 %v3924_v45 }
  0xa4   : > { %v595_v54 = vpop.permute.xlu0 %594  ;;  %v619_v61 = vpop.permute.xlu1 %618  ;;  %1388 = vmatpush.bf16.msrb.mxu1 %v3916_v6 }
  0xa5   : > { %v5712_v59 = vsel %vm655_vm2, %v571_v53, %v595_v54  ;;  %v5716_v62 = vsel %vm680_vm3, %v595_v54, %v619_v61  ;;  %v3849_v61 = vld [vmem:[%s6869_s1 + $0x88] sm:$0xf0] }
  0xa6   : > { %1100 = vmatmul.bf16.gmra.mxu0 %v635_v41  ;;  %1149 = vmatmul.bf16.gmra.mxu1 %v5684_v42 }
  0xac   : > { %v597_v8 = vpop.permute.xlu0 %596  ;;  %v621_v18 = vpop.permute.xlu1 %620 }
  0xad   : > { %v5740_v15 = vsel %vm655_vm2, %v573_v55, %v597_v8  ;;  %v5744_v19 = vsel %vm680_vm3, %v597_v8, %v621_v18 }
  0xae   : > { %1198 = vmatmul.bf16.gmra.mxu2 %v5694_v47 }
  0xb0   : > { %1291 = vmatmul.bf16.vlgmr.msrb.gmra.mxu3 %v632_v26  ;;  %v3988_v26 = vor.u32 %v4656_v24, %v3985_v25 }
  0xb2   : > { %1436 = vmatpush.bf16.msrb.mxu2 %v3988_v26 }
  0xb3   : > { %v5771_v35 = vpop.f32.mrf.mxu3 }
  0xb4   : > { %v599_v22 = vpop.permute.xlu0 %598  ;;  %v623_v36 = vpop.permute.xlu1 %622 }
  0xb5   : > { %v5768_v32 = vsel %vm655_vm2, %v575_v21, %v599_v22  ;;  %v5774_v60 = vsel %vm680_vm3, %v599_v22, %v623_v36  ;;  %v5849_v22 = vld [vmem:[%s6870_s2] sm:$0x3] }
  0xb6   : > { %1105 = vmatmul.bf16.gmra.mxu0 %v638_v57  ;;  %1154 = vmatmul.bf16.gmra.mxu1 %v5712_v59  ;;  %v5853_v23 = vperm.slane %v5849_v22, 0 }
  0xb7   : > { %1437 = vmatpush.bf16.msrb.mxu2 %v3980_v52 }
  0xbb   : > { %v5789_v46 = vpop.f32.mrf.mxu3 }
  0xbc   : > { %v601_v44 = vpop.permute.xlu0 %600  ;;  %v625_v53 = vpop.permute.xlu1 %624 }
  0xbd   : > { %v5806_v56 = vsel %vm680_vm3, %v601_v44, %v625_v53 }
  0xbe   : > { %1203 = vmatmul.bf16.gmra.mxu2 %v5716_v62 }
  0xc0   : > { %1296 = vmatmul.bf16.gmra.mxu3 %v635_v41  ;;  %v577_v41 = vpop.permute.xlu2 %576 }
  0xc1   : > { %v647_v48 = vsel %vm630_vm1, %v5500_v58, %v577_v41  ;;  %v5794_v28 = vsel %vm655_vm2, %v577_v41, %v601_v44 }
  0xc3   : > { %v5803_v54 = vpop.f32.mrf.mxu3 }
  0xc4   : > { %v603_v4 = vpop.permute.xlu0 %602  ;;  %v627_v9 = vpop.permute.xlu1 %626 }
  0xc5   : > { %v5830_v12 = vsel %vm680_vm3, %v603_v4, %v627_v9 }
  0xc6   : > { %1110 = vmatmul.bf16.gmra.mxu0 %v641_v30  ;;  %1159 = vmatmul.bf16.gmra.mxu1 %v5740_v15 }
  0xc8   : > { %v579_v1 = vpop.permute.xlu2 %578 }
  0xc9   : > { %v650_v7 = vsel %vm630_vm1, %v5577_v43, %v579_v1  ;;  %v5824_v55 = vsel %vm655_vm2, %v579_v1, %v603_v4 }
  0xcb   : > { %v5826_v8 = vpop.f32.mrf.mxu3 }
  0xcc   : > { %v605_v17 = vpop.permute.xlu0 %604  ;;  %v629_v14 = vpop.permute.xlu1 %628 }
  0xcd   : > { %v5844_v21 = vsel %vm680_vm3, %v605_v17, %v629_v14 }
  0xce   : > { %1208 = vmatmul.bf16.gmra.mxu2 %v5744_v19 }
  0xd0   : > { %1301 = vmatmul.bf16.gmra.mxu3 %v638_v57  ;;  %v4622_v57 = vld [vmem:[%s6869_s1 + $0x84] sm:$0xf]  ;;  %v581_v18 = vpop.permute.xlu2 %580 }
  0xd1   : > { %v3852_v11 = vor.u32 %v4622_v57, %v3849_v61  ;;  %v653_v3 = vsel %vm630_vm1, %v5631_v13, %v581_v18  ;;  %v5838_v16 = vsel %vm655_vm2, %v581_v18, %v605_v17 }
  0xd3   : > { %1339 = vmatpush.bf16.msrb.mxu0 %v3852_v11 }
  0xd6   : > { %1115 = vmatmul.bf16.gmra.mxu0 %v644_v5  ;;  %1164 = vmatmul.bf16.gmra.mxu1 %v5768_v32 }
  0xde   : > { %1213 = vmatmul.bf16.gmra.mxu2 %v5774_v60 }
  0xe0   : > { %1306 = vmatmul.bf16.gmra.mxu3 %v641_v30  ;;  %v5833_v30 = vpop.f32.mrf.mxu3 }
  0xe6   : > { %1120 = vmatmul.bf16.gmra.mxu0 %v647_v48  ;;  %1169 = vmatmul.bf16.gmra.mxu1 %v5794_v28 }
  0xe8   : > { %v5841_v20 = vpop.f32.mrf.mxu3 }
  0xee   : > { %1218 = vmatmul.bf16.gmra.mxu2 %v5806_v56 }
  0xf0   : > { %1311 = vmatmul.bf16.gmra.mxu3 %v644_v5  ;;  %v5855_v26 = vpop.f32.mrf.mxu3 }
  0xf6   : > { %1125 = vmatmul.bf16.gmra.mxu0 %v650_v7  ;;  %1174 = vmatmul.bf16.gmra.mxu1 %v5824_v55 }
  0xf8   : > { %v5861_v34 = vpop.f32.mrf.mxu3 }
  0xfe   : > { %1223 = vmatmul.bf16.gmra.mxu2 %v5830_v12 }
 0x100   : > { %1316 = vmatmul.bf16.gmra.mxu3 %v647_v48 }
 0x106   : > { %1130 = vmatmul.bf16.gmra.mxu0 %v653_v3  ;;  %1179 = vmatmul.bf16.gmra.mxu1 %v5838_v16 }
 0x10e   : > { %1228 = vmatmul.bf16.gmra.mxu2 %v5844_v21 }
 0x110   : > { %1321 = vmatmul.bf16.gmra.mxu3 %v650_v7 }
 0x113   : > { %v1096_v24 = vpop.f32.mrf.mxu0  ;;  %v1145_v25 = vpop.f32.mrf.mxu1 }
 0x114   : > { %v1097_v5 = vadd.f32 %v1096_v24, %v5853_v23 }
 0x116   : > { %v1146_v36 = vadd.f32 %v1145_v25, %v1097_v5  ;;  %1340 = vmatmul.bf16.vlgmr.msrb.gmra.mxu0 %v5656_v29  ;;  %1389 = vmatmul.bf16.vlgmr.msrb.gmra.mxu1 %v5664_v33  ;;  %v5870_v33 = vpop.f32.mrf.mxu3 }
 0x11b   : > { %v1098_v37 = vpop.f32.mrf.mxu0  ;;  %v1147_v39 = vpop.f32.mrf.mxu1 }
 0x11c   : > { %v1099_v40 = vadd.f32 %v1098_v37, %v5853_v23 }
 0x11e   : > { %v1148_v38 = vadd.f32 %v1147_v39, %v1099_v40  ;;  %4029 = vmatmul.msk.bf16.vlgmr.msrb.gmra.mxu2 %vm630_vm1, %v5285_v51  ;;  %v5877_v11 = vpop.f32.mrf.mxu3 }
 0x120   : > { %1326 = vmatmul.bf16.gmra.mxu3 %v653_v3 }
 0x121   : > { %v1194_v41 = vpop.f32.mrf.mxu2 }
 0x122   : > { %v5865_v44 = vadd.f32 %v1194_v41, %v1146_v36 }
 0x123   : > { %v1101_v45 = vpop.f32.mrf.mxu0  ;;  %v1150_v48 = vpop.f32.mrf.mxu1 }
 0x124   : > { %v1102_v29 = vadd.f32 %v1101_v45, %v5853_v23 }
 0x126   : > { %v1151_v49 = vadd.f32 %v1150_v48, %v1102_v29  ;;  %1345 = vmatmul.bf16.gmra.mxu0 %v5684_v42  ;;  %1394 = vmatmul.bf16.gmra.mxu1 %v5694_v47 }
 0x129   : > { %v1196_v50 = vpop.f32.mrf.mxu2 }
 0x12a   : > { %v5872_v52 = vadd.f32 %v1196_v50, %v1148_v38 }
 0x12b   : > { %v1103_v53 = vpop.f32.mrf.mxu0  ;;  %v1152_v51 = vpop.f32.mrf.mxu1 }
 0x12c   : > { %v1104_v57 = vadd.f32 %v1103_v53, %v5853_v23 }
 0x12e   : > { %v1153_v61 = vadd.f32 %v1152_v51, %v1104_v57  ;;  %4030 = vmatmul.msk.bf16.gmra.mxu2 %vm630_vm1, %v5312_v10  ;;  %v5886_v10 = vpop.f32.mrf.mxu3 }
 0x131   : > { %v1199_v63 = vpop.f32.mrf.mxu2 }
 0x132   : > { %v5879_v0 = vadd.f32 %v1199_v63, %v1151_v49 }
 0x133   : > { %v1106_v42 = vpop.f32.mrf.mxu0  ;;  %v1155_v47 = vpop.f32.mrf.mxu1 }
 0x134   : > { %v1107_v1 = vadd.f32 %v1106_v42, %v5853_v23 }
 0x136   : > { %v1156_v4 = vadd.f32 %v1155_v47, %v1107_v1  ;;  %1350 = vmatmul.bf16.gmra.mxu0 %v5712_v59  ;;  %1399 = vmatmul.bf16.gmra.mxu1 %v5716_v62  ;;  %v5894_v5 = vpop.f32.mrf.mxu3 }
 0x139   : > { %v1201_v6 = vpop.f32.mrf.mxu2 }
 0x13a   : > { %v5884_v7 = vadd.f32 %v1201_v6, %v1153_v61 }
 0x13b   : > { %v1108_v9 = vpop.f32.mrf.mxu0  ;;  %v1157_v18 = vpop.f32.mrf.mxu1 }
 0x13c   : > { %v1109_v17 = vadd.f32 %v1108_v9, %v5853_v23 }
 0x13e   : > { %v1158_v3 = vadd.f32 %v1157_v18, %v1109_v17  ;;  %4031 = vmatmul.msk.bf16.gmra.mxu2 %vm630_vm1, %v5334_v27  ;;  %v5903_v45 = vpop.f32.mrf.mxu3 }
 0x141   : > { %v1204_v14 = vpop.f32.mrf.mxu2 }
 0x142   : > { %v5891_v24 = vadd.f32 %v1204_v14, %v1156_v4 }
 0x143   : > { %v1111_v25 = vpop.f32.mrf.mxu0  ;;  %v1160_v59 = vpop.f32.mrf.mxu1 }
 0x144   : > { %v1112_v62 = vadd.f32 %v1111_v25, %v5853_v23 }
 0x146   : > { %v1161_v36 = vadd.f32 %v1160_v59, %v1112_v62  ;;  %1355 = vmatmul.bf16.gmra.mxu0 %v5740_v15  ;;  %1404 = vmatmul.bf16.gmra.mxu1 %v5744_v19  ;;  %v5910_v51 = vpop.f32.mrf.mxu3 }
 0x149   : > { %v1206_v37 = vpop.f32.mrf.mxu2 }
 0x14a   : > { %v5898_v39 = vadd.f32 %v1206_v37, %v1158_v3 }
 0x14b   : > { %v1113_v40 = vpop.f32.mrf.mxu0  ;;  %v1162_v38 = vpop.f32.mrf.mxu1 }
 0x14c   : > { %v1114_v27 = vadd.f32 %v1113_v40, %v5853_v23 }
 0x14e   : > { %v1163_v41 = vadd.f32 %v1162_v38, %v1114_v27  ;;  %4032 = vmatmul.msk.bf16.gmra.mxu2 %vm630_vm1, %v5401_v2 }
 0x151   : > { %v1209_v48 = vpop.f32.mrf.mxu2 }
 0x152   : > { %v5905_v29 = vadd.f32 %v1209_v48, %v1161_v36 }
 0x153   : > { %v1116_v49 = vpop.f32.mrf.mxu0  ;;  %v1165_v15 = vpop.f32.mrf.mxu1 }
 0x154   : > { %v1117_v19 = vadd.f32 %v1116_v49, %v5853_v23  ;;  %v4671_v49 = vld [vmem:[%s6871_s3 + $0x28] sm:$0xff] }
 0x156   : > { %v1166_v50 = vadd.f32 %v1165_v15, %v1117_v19  ;;  %1360 = vmatmul.bf16.gmra.mxu0 %v5768_v32  ;;  %1409 = vmatmul.bf16.gmra.mxu1 %v5774_v60  ;;  %v5922_v32 = vpop.f32.mrf.mxu3  ;;  %v4670_v19 = vld [vmem:[%s6871_s3 + $0x20] sm:$0xff] }
 0x159   : > { %v1211_v53 = vpop.f32.mrf.mxu2 }
 0x15a   : > { %v5912_v57 = vadd.f32 %v1211_v53, %v1163_v41 }
 0x15b   : > { %v5914_v2 = vpop.f32.mrf.mxu0  ;;  %v5916_v61 = vpop.f32.mrf.mxu1 }
 0x15e   : > { %4033 = vmatmul.msk.bf16.gmra.mxu2 %vm630_vm1, %v5500_v58  ;;  %v5933_v58 = vpop.f32.mrf.mxu3 }
 0x161   : > { %v1214_v63 = vpop.f32.mrf.mxu2 }
 0x162   : > { %v5920_v42 = vadd.f32 %v1214_v63, %v1166_v50 }
 0x163   : > { %v1121_v47 = vpop.f32.mrf.mxu0  ;;  %v1170_v1 = vpop.f32.mrf.mxu1 }
 0x164   : > { %v1122_v60 = vadd.f32 %v1121_v47, %v5853_v23  ;;  %v4669_v47 = vld [vmem:[%s6871_s3 + $0x18] sm:$0xff] }
 0x166   : > { %v1171_v4 = vadd.f32 %v1170_v1, %v1122_v60  ;;  %1365 = vmatmul.bf16.gmra.mxu0 %v5794_v28  ;;  %1414 = vmatmul.bf16.gmra.mxu1 %v5806_v56  ;;  %v1292_v56 = vpop.f32.mrf.mxu3  ;;  %v4668_v1 = vld [vmem:[%s6871_s3 + $0x10] sm:$0xff] }
 0x169   : > { %v5927_v6 = vpop.f32.mrf.mxu2 }
 0x16b   : > { %v5929_v9 = vpop.f32.mrf.mxu0  ;;  %v5931_v18 = vpop.f32.mrf.mxu1 }
 0x16e   : > { %4034 = vmatmul.msk.bf16.gmra.mxu2 %vm630_vm1, %v5577_v43  ;;  %v4673_v43 = vld [vmem:[%s6871_s3 + $0x38] sm:$0xff] }
 0x16f   : > { %2391 = vmatpush.bf16.msra.mxu3 %v4673_v43  ;;  %v4695_v43 = vld [vmem:[%s6871_s3 + $0xe8] sm:$0xff] }
 0x171   : > { %v1219_v17 = vpop.f32.mrf.mxu2 }
 0x172   : > { %v5937_v3 = vadd.f32 %v1219_v17, %v1171_v4  ;;  %v4696_v4 = vld [vmem:[%s6871_s3 + $0xf0] sm:$0xff] }
 0x173   : > { %v1126_v14 = vpop.f32.mrf.mxu0  ;;  %v1175_v25 = vpop.f32.mrf.mxu1 }
 0x174   : > { %v1127_v28 = vadd.f32 %v1126_v14, %v5853_v23 }
 0x176   : > { %v1176_v59 = vadd.f32 %v1175_v25, %v1127_v28  ;;  %1370 = vmatmul.bf16.gmra.mxu0 %v5824_v55  ;;  %1419 = vmatmul.bf16.gmra.mxu1 %v5830_v12  ;;  %v4672_v55 = vld [vmem:[%s6871_s3 + $0x30] sm:$0xff]  ;;  %v1294_v12 = vpop.f32.mrf.mxu3  ;;  %v4667_v25 = vld [vmem:[%s6871_s3 + $0x8] sm:$0xff]  ;;  %v5995_v28 = vperm.slane %v5849_v22, 1  ;;  %v4694_v22 = vld [vmem:[%s6871_s3 + $0xe0] sm:$0xff] }
 0x177   : > { %2392 = vmatpush.bf16.msra.mxu3 %v4672_v55 }
 0x179   : > { %v5942_v62 = vpop.f32.mrf.mxu2 }
 0x17b   : > { %v5944_v36 = vpop.f32.mrf.mxu0  ;;  %v5946_v37 = vpop.f32.mrf.mxu1  ;;  %2393 = vmatpush.bf16.msra.mxu3 %v4671_v49 }
 0x17e   : > { %4035 = vmatmul.msk.bf16.gmra.mxu2 %vm630_vm1, %v5631_v13  ;;  %v1297_v63 = vpop.f32.mrf.mxu3 }
 0x17f   : > { %2394 = vmatpush.bf16.msra.mxu3 %v4670_v19  ;;  %v4693_v19 = vld [vmem:[%s6871_s3 + $0xd8] sm:$0xff] }
 0x181   : > { %v1224_v40 = vpop.f32.mrf.mxu2 }
 0x182   : > { %v5956_v38 = vadd.f32 %v1224_v40, %v1176_v59 }
 0x183   : > { %v1131_v27 = vpop.f32.mrf.mxu0  ;;  %v1180_v41 = vpop.f32.mrf.mxu1  ;;  %2395 = vmatpush.bf16.msra.mxu3 %v4669_v47 }
 0x184   : > { %v1132_v48 = vadd.f32 %v1131_v27, %v5853_v23 }
 0x186   : > { %v1181_v15 = vadd.f32 %v1180_v41, %v1132_v48  ;;  %1375 = vmatmul.bf16.gmra.mxu0 %v5838_v16  ;;  %1424 = vmatmul.bf16.gmra.mxu1 %v5844_v21  ;;  %v4697_v16 = vld [vmem:[%s6871_s3 + $0xf8] sm:$0xff]  ;;  %v5997_v59 = vpop.f32.mrf.mxu3 }
 0x187   : > { %2478 = vmatpush.bf16.msra.mxu2 %v4697_v16  ;;  %2396 = vmatpush.bf16.msra.mxu3 %v4668_v1  ;;  %v1295_v1 = vadd.f32 %v1294_v12, %v5995_v28 }
 0x189   : > { %v5964_v13 = vpop.f32.mrf.mxu2 }
 0x18b   : > { %v5969_v50 = vpop.f32.mrf.mxu0  ;;  %v5971_v53 = vpop.f32.mrf.mxu1  ;;  %2479 = vmatpush.bf16.msra.mxu2 %v4696_v4  ;;  %2397 = vmatpush.bf16.msra.mxu3 %v4667_v25 }
 0x18e   : > { %4036 = vmatmul.msk.bf16.gmra.mxu2 %vm630_vm1, %v5661_v31  ;;  %v1244_v31 = vadd.f32 %v5771_v35, %v5865_v44  ;;  %v4666_v35 = vld [vmem:[%s6871_s3] sm:$0xff]  ;;  %v1293_v44 = vadd.f32 %v1292_v56, %v5995_v28  ;;  %v6016_v47 = vpop.f32.mrf.mxu3 }
 0x18f   : > { %2480 = vmatpush.bf16.msra.mxu2 %v4695_v43  ;;  %2398 = vmatpush.bf16.msra.mxu3 %v4666_v35  ;;  %v4691_v35 = vld [vmem:[%s6871_s3 + $0xc8] sm:$0xff] }
 0x190   : > { %v1479_v40 = vsub.f32 0.0, %v1244_v31 }
 0x191   : > { %v1229_v21 = vpop.f32.mrf.mxu2 }
 0x192   : > { %v5984_v60 = vadd.f32 %v1229_v21, %v1181_v15  ;;  %v1511_v49 = vmul.f32 1.442695, %v1479_v40  ;;  %v1246_v15 = vadd.f32 %v5789_v46, %v5872_v52  ;;  %v1249_v46 = vadd.f32 %v5803_v54, %v5879_v0 }
 0x193   : > { %v1341_v17 = vpop.f32.mrf.mxu0  ;;  %v1390_v14 = vpop.f32.mrf.mxu1  ;;  %2481 = vmatpush.bf16.msra.mxu2 %v4694_v22  ;;  %v1298_v54 = vadd.f32 %v1297_v63, %v5995_v28 }
 0x194   : > { %v1342_v48 = vadd.f32 %v1341_v17, %v1293_v44  ;;  %4850 = vpow2.f32 %v1511_v49  ;;  %v1481_v16 = vsub.f32 0.0, %v1246_v15  ;;  %v4692_v17 = vld [vmem:[%s6871_s3 + $0xd0] sm:$0xff]  ;;  %v1483_v44 = vsub.f32 0.0, %v1249_v46  ;;  %v4690_v15 = vld [vmem:[%s6871_s3 + $0xc0] sm:$0xff] }
 0x196   : > { %v1391_v56 = vadd.f32 %v1390_v14, %v1342_v48  ;;  %v1515_v14 = vmul.f32 1.442695, %v1481_v16  ;;  %v6028_v0 = vpop.f32.mrf.mxu3 }
 0x197   : > { %2482 = vmatpush.bf16.msra.mxu2 %v4693_v19  ;;  %v1519_v19 = vmul.f32 1.442695, %v1483_v44 }
 0x199   : > { %v6002_v55 = vpop.f32.mrf.mxu2 }
 0x19a   : > { %v4851_v12 = vpop.eup %4850 }
 0x19b   : > { %v1343_v27 = vpop.f32.mrf.mxu0  ;;  %v1392_v41 = vpop.f32.mrf.mxu1  ;;  %2483 = vmatpush.bf16.msra.mxu2 %v4692_v17  ;;  %v1575_v49 = vadd.f32 1.0, %v4851_v12 }
 0x19c   : > { %v1344_v25 = vadd.f32 %v1343_v27, %v1295_v1 }
 0x19e   : > { %v1393_v22 = vadd.f32 %v1392_v41, %v1344_v25 }
 0x19f   : > { %2484 = vmatpush.bf16.msra.mxu2 %v4691_v35 }
 0x1a1   : > { %v1439_v21 = vpop.f32.mrf.mxu2 }
 0x1a2   : > { %v1440_v4 = vadd.f32 %v1439_v21, %v1391_v56  ;;  %v1251_v56 = vadd.f32 %v5826_v8, %v5884_v7  ;;  %v1300_v8 = vadd.f32 %v5997_v59, %v5995_v28 }
 0x1a3   : > { %v1346_v52 = vpop.f32.mrf.mxu0  ;;  %v1395_v31 = vpop.f32.mrf.mxu1  ;;  %2485 = vmatpush.bf16.msra.mxu2 %v4690_v15 }
 0x1a4   : > { %v1480_v43 = vsub.f32 0.0, %v1440_v4  ;;  %v1347_v21 = vadd.f32 %v1346_v52, %v1298_v54  ;;  %v1485_v46 = vsub.f32 0.0, %v1251_v56  ;;  %v1254_v52 = vadd.f32 %v5833_v30, %v5891_v24 }
 0x1a6   : > { %v1513_v40 = vmul.f32 1.442695, %v1480_v43  ;;  %v1396_v43 = vadd.f32 %v1395_v31, %v1347_v21  ;;  %v1523_v35 = vmul.f32 1.442695, %v1485_v46  ;;  %v1487_v56 = vsub.f32 0.0, %v1254_v52 }
 0x1a7   : > { %v1256_v46 = vadd.f32 %v5841_v20, %v5898_v39 }
 0x1a8   : > { %4852 = vpow2.f32 %v1513_v40 }
 0x1a9   : > { %4854 = vpow2.f32 %v1515_v14  ;;  %v1441_v48 = vpop.f32.mrf.mxu2  ;;  %v1489_v20 = vsub.f32 0.0, %v1256_v46 }
 0x1aa   : > { %v1442_v27 = vadd.f32 %v1441_v48, %v1393_v22  ;;  %4856 = vrcp.f32 %v1575_v49  ;;  %v6039_v48 = vpop.f32.mrf.mxu3 }
 0x1ab   : > { %v1348_v16 = vpop.f32.mrf.mxu0  ;;  %v1397_v41 = vpop.f32.mrf.mxu1  ;;  %4858 = vpow2.f32 %v1519_v19 }
 0x1ac   : > { %v1482_v1 = vsub.f32 0.0, %v1442_v27  ;;  %v1349_v49 = vadd.f32 %v1348_v16, %v1300_v8 }
 0x1ae   : > { %v4853_v4 = vpop.eup %4852  ;;  %v1517_v17 = vmul.f32 1.442695, %v1482_v1  ;;  %v1398_v1 = vadd.f32 %v1397_v41, %v1349_v49 }
 0x1af   : > { %v4855_v63 = vpop.eup %4854  ;;  %v1576_v25 = vadd.f32 1.0, %v4853_v4  ;;  %v1303_v4 = vadd.f32 %v6016_v47, %v5995_v28 }
 0x1b0   : > { %4860 = vpow2.f32 %v1517_v17  ;;  %v1577_v40 = vadd.f32 1.0, %v4855_v63  ;;  %v4857_v22 = vpop.eup %4856  ;;  %v1527_v63 = vmul.f32 1.442695, %v1487_v56 }
 0x1b1   : > { %4862 = vrcp.f32 %v1576_v25  ;;  %v1444_v14 = vpop.f32.mrf.mxu2  ;;  %v4859_v31 = vpop.eup %4858 }
 0x1b2   : > { %v1445_v7 = vadd.f32 %v1444_v14, %v1396_v43  ;;  %4864 = vrcp.f32 %v1577_v40  ;;  %v1579_v24 = vadd.f32 1.0, %v4859_v31  ;;  %v6051_v47 = vpop.f32.mrf.mxu3 }
 0x1b3   : > { %v1351_v12 = vpop.f32.mrf.mxu0  ;;  %v1400_v44 = vpop.f32.mrf.mxu1  ;;  %4866 = vpow2.f32 %v1523_v35 }
 0x1b4   : > { %v1484_v54 = vsub.f32 0.0, %v1445_v7  ;;  %v1352_v40 = vadd.f32 %v1351_v12, %v1303_v4  ;;  %v1305_v12 = vadd.f32 %v6028_v0, %v5995_v28 }
 0x1b6   : > { %v4861_v27 = vpop.eup %4860  ;;  %v1521_v15 = vmul.f32 1.442695, %v1484_v54  ;;  %v1401_v49 = vadd.f32 %v1400_v44, %v1352_v40 }
 0x1b7   : > { %v4863_v19 = vpop.eup %4862  ;;  %v1578_v59 = vadd.f32 1.0, %v4861_v27 }
 0x1b8   : > { %v6041_v21 = vpack.c.bf16 %v4863_v19, %v4857_v22  ;;  %4868 = vpow2.f32 %v1521_v15  ;;  %v4865_v14 = vpop.eup %4864 }
 0x1b9   : > { %4870 = vrcp.f32 %v1578_v59  ;;  %v1446_v30 = vpop.f32.mrf.mxu2  ;;  %v4867_v7 = vpop.eup %4866  ;;  %v1531_v59 = vmul.f32 1.442695, %v1489_v20 }
 0x1ba   : > { %v1656_v16 = vunpack.c.l.b16 %v6041_v21  ;;  %v1447_v17 = vadd.f32 %v1446_v30, %v1398_v1  ;;  %4872 = vrcp.f32 %v1579_v24  ;;  %v1581_v31 = vadd.f32 1.0, %v4867_v7 }
 0x1bb   : > { %v1353_v25 = vpop.f32.mrf.mxu0  ;;  %v1402_v43 = vpop.f32.mrf.mxu1  ;;  %4874 = vpow2.f32 %v1527_v63  ;;  %v1259_v1 = vadd.f32 %v5855_v26, %v5905_v29 }
 0x1bc   : > { %v6049_v41 = vpack.c.b16 %v1656_v16, %v1656_v16  ;;  %v1486_v8 = vsub.f32 0.0, %v1447_v17  ;;  %v1354_v16 = vadd.f32 %v1353_v25, %v1305_v12  ;;  %v1657_v25 = vunpack.c.h.b16 %v6041_v21 }
 0x1bd   : > { %v1491_v29 = vsub.f32 0.0, %v1259_v1 }
 0x1be   : > { %v4869_v35 = vpop.eup %4868  ;;  %v1525_v52 = vmul.f32 1.442695, %v1486_v8  ;;  %4278 = vmatmul.msk.bf16.vlgmr.msra.gmra.mxu3 %vm4277_vm4, %v6049_v41 }
 0x1bf   : > { %v4871_v22 = vpop.eup %4870  ;;  %v1580_v39 = vadd.f32 1.0, %v4869_v35  ;;  %v6069_v35 = vpop.f32.mrf.mxu3  ;;  %v1535_v12 = vmul.f32 1.442695, %v1491_v29  ;;  %v1119_v29 = vadd.f32 %v5914_v2, %v5853_v23 }
 0x1c0   : > { %4876 = vpow2.f32 %v1525_v52  ;;  %v1640_v54 = vpack.c.bf16 %v4871_v22, %v4865_v14  ;;  %v4873_v4 = vpop.eup %4872  ;;  %v1403_v22 = vadd.f32 %v1402_v43, %v1354_v16 }
 0x1c1   : > { %4878 = vrcp.f32 %v1580_v39  ;;  %v1449_v27 = vpop.f32.mrf.mxu2  ;;  %v4875_v46 = vpop.eup %4874 }
 0x1c2   : > { %v1450_v15 = vadd.f32 %v1449_v27, %v1401_v49  ;;  %v1718_v19 = vunpack.c.h.b16 %v1640_v54  ;;  %v1717_v56 = vunpack.c.l.b16 %v1640_v54  ;;  %4880 = vrcp.f32 %v1581_v31 }
 0x1c3   : > { %v1356_v30 = vpop.f32.mrf.mxu0  ;;  %v1405_v24 = vpop.f32.mrf.mxu1  ;;  %4882 = vpow2.f32 %v1531_v59  ;;  %v1583_v20 = vadd.f32 1.0, %v4875_v46  ;;  %v1308_v49 = vadd.f32 %v6039_v48, %v5995_v28 }
 0x1c4   : > { %v1488_v44 = vsub.f32 0.0, %v1450_v15  ;;  %v6058_v17 = vpack.c.b16 %v1718_v19, %v1718_v19  ;;  %v6060_v63 = vpack.c.b16 %v1717_v56, %v1717_v56  ;;  %v1261_v15 = vadd.f32 %v5861_v34, %v5912_v57 }
 0x1c5   : > { %v6075_v56 = vpack.c.b16 %v1657_v25, %v1657_v25  ;;  %v1357_v43 = vadd.f32 %v1356_v30, %v1308_v49 }
 0x1c6   : > { %v4877_v14 = vpop.eup %4876  ;;  %v1529_v0 = vmul.f32 1.442695, %v1488_v44  ;;  %v1754_v40 = vsel %vm388_vm0, 0, %v6058_v17  ;;  %v1752_v8 = vsel %vm388_vm0, 0, %v6060_v63  ;;  %v1493_v30 = vsub.f32 0.0, %v1261_v15 }
 0x1c7   : > { %v4879_v26 = vpop.eup %4878  ;;  %v1582_v7 = vadd.f32 1.0, %v4877_v14  ;;  %1820 = vrot.lane.b32.xlu1 %v1754_v40, %s6891_s26  ;;  %1818 = vrot.lane.b32.xlu0 %v1752_v8, %s6891_s26  ;;  %v1406_v40 = vadd.f32 %v1405_v24, %v1357_v43  ;;  %v6093_v25 = vpop.f32.mrf.mxu3  ;;  %v1264_v24 = vadd.f32 %v5870_v33, %v5920_v42 }
 0x1c8   : > { %v1641_v52 = vpack.c.bf16 %v4879_v26, %v4873_v4  ;;  %4884 = vpow2.f32 %v1529_v0  ;;  %v4881_v59 = vpop.eup %4880 }
 0x1c9   : > { %4886 = vrcp.f32 %v1582_v7  ;;  %v1451_v39 = vpop.f32.mrf.mxu2  ;;  %v4883_v44 = vpop.eup %4882 }
 0x1ca   : > { %v1662_v54 = vunpack.c.h.b16 %v1641_v52  ;;  %v1452_v31 = vadd.f32 %v1451_v39, %v1403_v22  ;;  %v1661_v27 = vunpack.c.l.b16 %v1641_v52  ;;  %4888 = vrcp.f32 %v1583_v20 }
 0x1cb   : > { %v1358_v19 = vpop.f32.mrf.mxu0  ;;  %v1407_v21 = vpop.f32.mrf.mxu1  ;;  %4890 = vpow2.f32 %v1535_v12  ;;  %v1585_v26 = vadd.f32 1.0, %v4883_v44  ;;  %v1539_v39 = vmul.f32 1.442695, %v1493_v30 }
 0x1cc   : > { %v1490_v1 = vsub.f32 0.0, %v1452_v31  ;;  %v6077_v4 = vpack.c.b16 %v1661_v27, %v1661_v27  ;;  %v6079_v16 = vpack.c.b16 %v1662_v54, %v1662_v54 }
 0x1ce   : > { %v4885_v48 = vpop.eup %4884  ;;  %v1533_v46 = vmul.f32 1.442695, %v1490_v1  ;;  %v1778_v14 = vsel %vm388_vm0, %v6049_v41, %v6077_v4  ;;  %v6087_v34 = vsel %vm388_vm0, %v6075_v56, %v6079_v16  ;;  %v1310_v41 = vadd.f32 %v6051_v47, %v5995_v28 }
 0x1cf   : > { %v4887_v57 = vpop.eup %4886  ;;  %v1584_v0 = vadd.f32 1.0, %v4885_v48  ;;  %2486 = vmatmul.bf16.vlgmr.msra.gmra.mxu2 %v1778_v14  ;;  %v1168_v47 = vadd.f32 %v5916_v61, %v1119_v29 }
 0x1d0   : > { %4892 = vpow2.f32 %v1533_v46  ;;  %v1642_v8 = vpack.c.bf16 %v4887_v57, %v4881_v59  ;;  %v4889_v31 = vpop.eup %4888  ;;  %v1359_v27 = vadd.f32 %v1358_v19, %v1310_v41  ;;  %v1495_v19 = vsub.f32 0.0, %v1264_v24 }
 0x1d1   : > { %4894 = vrcp.f32 %v1584_v0  ;;  %v1454_v7 = vpop.f32.mrf.mxu2  ;;  %v4891_v59 = vpop.eup %4890  ;;  %v1217_v48 = vadd.f32 %v5927_v6, %v1168_v47  ;;  %v1313_v0 = vadd.f32 %v6069_v35, %v5995_v28 }
 0x1d2   : > { %v1455_v52 = vadd.f32 %v1454_v7, %v1406_v40  ;;  %v1722_v22 = vunpack.c.l.b16 %v1642_v8  ;;  %v1723_v20 = vunpack.c.h.b16 %v1642_v8  ;;  %4896 = vrcp.f32 %v1585_v26 }
 0x1d3   : > { %v1361_v49 = vpop.f32.mrf.mxu0  ;;  %v1410_v54 = vpop.f32.mrf.mxu1  ;;  %4898 = vpow2.f32 %v1539_v39  ;;  %v1408_v61 = vadd.f32 %v1407_v21, %v1359_v27  ;;  %v1587_v57 = vadd.f32 1.0, %v4891_v59  ;;  %v1543_v21 = vmul.f32 1.442695, %v1495_v19 }
 0x1d4   : > { %v1492_v12 = vsub.f32 0.0, %v1455_v52  ;;  %v6097_v2 = vpack.c.b16 %v1722_v22, %v1722_v22  ;;  %v6099_v15 = vpack.c.b16 %v1723_v20, %v1723_v20  ;;  %v1266_v26 = vadd.f32 %v5877_v11, %v1217_v48 }
 0x1d5   : > { %v1362_v52 = vadd.f32 %v1361_v49, %v1313_v0 }
 0x1d6   : > { %v4893_v43 = vpop.eup %4892  ;;  %v1537_v1 = vmul.f32 1.442695, %v1492_v12  ;;  %v6105_v44 = vsel %vm388_vm0, %v6060_v63, %v6097_v2  ;;  %v6110_v33 = vsel %vm388_vm0, %v6058_v17, %v6099_v15  ;;  %v4681_v63 = vld [vmem:[%s6871_s3 + $0x78] sm:$0xff]  ;;  %v1497_v59 = vsub.f32 0.0, %v1266_v26 }
 0x1d7   : > { %v4895_v42 = vpop.eup %4894  ;;  %v1586_v46 = vadd.f32 1.0, %v4893_v43  ;;  %v4689_v17 = vld [vmem:[%s6871_s3 + $0xb8] sm:$0xff]  ;;  %2420 = vmatpush.bf16.msra.mxu0 %v4681_v63  ;;  %v1411_v43 = vadd.f32 %v1410_v54, %v1362_v52 }
 0x1d8   : > { %4900 = vpow2.f32 %v1537_v1  ;;  %v1643_v14 = vpack.c.bf16 %v4895_v42, %v4889_v31  ;;  %2449 = vmatpush.bf16.msra.mxu1 %v4689_v17  ;;  %v4897_v41 = vpop.eup %4896  ;;  %v1317_v31 = vpop.f32.mrf.mxu3 }
 0x1d9   : > { %4902 = vrcp.f32 %v1586_v46  ;;  %v1456_v30 = vpop.f32.mrf.mxu2  ;;  %v4899_v24 = vpop.eup %4898 }
 0x1da   : > { %v1457_v40 = vadd.f32 %v1456_v30, %v1408_v61  ;;  %v1666_v6 = vunpack.c.l.b16 %v1643_v14  ;;  %v1667_v8 = vunpack.c.h.b16 %v1643_v14  ;;  %4904 = vrcp.f32 %v1587_v57 }
 0x1db   : > { %v1363_v29 = vpop.f32.mrf.mxu0  ;;  %v1412_v7 = vpop.f32.mrf.mxu1  ;;  %4906 = vpow2.f32 %v1543_v21  ;;  %v1589_v42 = vadd.f32 1.0, %v4899_v24  ;;  %v1269_v14 = vadd.f32 %v5886_v10, %v5937_v3 }
 0x1dc   : > { %v1494_v22 = vsub.f32 0.0, %v1457_v40  ;;  %v6122_v20 = vpack.c.b16 %v1666_v6, %v1666_v6  ;;  %v6124_v39 = vpack.c.b16 %v1667_v8, %v1667_v8 }
 0x1dd   : > { %v1499_v26 = vsub.f32 0.0, %v1269_v14 }
 0x1de   : > { %v4901_v35 = vpop.eup %4900  ;;  %v1541_v27 = vmul.f32 1.442695, %v1494_v22  ;;  %v6129_v11 = vsel %vm388_vm0, %v6077_v4, %v6122_v20  ;;  %v6134_v12 = vsel %vm388_vm0, %v6079_v16, %v6124_v39  ;;  %v1315_v4 = vadd.f32 %v6093_v25, %v5995_v28 }
 0x1df   : > { %v4903_v49 = vpop.eup %4902  ;;  %v1588_v47 = vadd.f32 1.0, %v4901_v35  ;;  %2404 = vmatmul.bf16.gmra.mxu3 %v6129_v11  ;;  %v1547_v16 = vmul.f32 1.442695, %v1497_v59 }
 0x1e0   : > { %4908 = vpow2.f32 %v1541_v27  ;;  %v1644_v1 = vpack.c.bf16 %v4903_v49, %v4897_v41  ;;  %v4905_v30 = vpop.eup %4904  ;;  %v1364_v63 = vadd.f32 %v1363_v29, %v1315_v4  ;;  %v1319_v29 = vpop.f32.mrf.mxu3  ;;  %v1318_v27 = vadd.f32 %v1317_v31, %v5995_v28 }
 0x1e1   : > { %4910 = vrcp.f32 %v1588_v47  ;;  %v1459_v19 = vpop.f32.mrf.mxu2  ;;  %v4907_v40 = vpop.eup %4906 }
 0x1e2   : > { %v1460_v48 = vadd.f32 %v1459_v19, %v1411_v43  ;;  %v1727_v46 = vunpack.c.l.b16 %v1644_v1  ;;  %v1728_v61 = vunpack.c.h.b16 %v1644_v1  ;;  %4912 = vrcp.f32 %v1589_v42 }
 0x1e3   : > { %v1366_v57 = vpop.f32.mrf.mxu0  ;;  %v1415_v6 = vpop.f32.mrf.mxu1  ;;  %4914 = vpow2.f32 %v1547_v16  ;;  %v1413_v52 = vadd.f32 %v1412_v7, %v1364_v63  ;;  %v1591_v24 = vadd.f32 1.0, %v4907_v40  ;;  %v1551_v43 = vmul.f32 1.442695, %v1499_v26 }
 0x1e4   : > { %v1496_v17 = vsub.f32 0.0, %v1460_v48  ;;  %v6141_v54 = vpack.c.b16 %v1727_v46, %v1727_v46  ;;  %v6143_v0 = vpack.c.b16 %v1728_v61, %v1728_v61  ;;  %v1367_v42 = vadd.f32 %v1366_v57, %v1318_v27 }
 0x1e6   : > { %v4909_v8 = vpop.eup %4908  ;;  %v1545_v25 = vmul.f32 1.442695, %v1496_v17  ;;  %v1757_v21 = vsel %vm388_vm0, %v6097_v2, %v6141_v54  ;;  %v1760_v10 = vsel %vm388_vm0, %v6099_v15, %v6143_v0  ;;  %v4680_v2 = vld [vmem:[%s6871_s3 + $0x70] sm:$0xff]  ;;  %v1416_v17 = vadd.f32 %v1415_v6, %v1367_v42 }
 0x1e7   : > { %v4911_v3 = vpop.eup %4910  ;;  %v1590_v41 = vadd.f32 1.0, %v4909_v8  ;;  %1822 = vrot.lane.b32.xlu2 %v1757_v21, %s6891_s26  ;;  %1824 = vrot.lane.b32.xlu0 %v1760_v10, %s6891_s26  ;;  %v4688_v15 = vld [vmem:[%s6871_s3 + $0xb0] sm:$0xff]  ;;  %v1124_v8 = vadd.f32 %v5929_v9, %v5853_v23  ;;  %v1274_v6 = vadd.f32 %v5903_v45, %v5956_v38 }
 0x1e8   : > { %4916 = vpow2.f32 %v1545_v25  ;;  %v1645_v22 = vpack.c.bf16 %v4911_v3, %v4905_v30  ;;  %2421 = vmatpush.bf16.msra.mxu0 %v4680_v2  ;;  %2450 = vmatpush.bf16.msra.mxu1 %v4688_v15  ;;  %v4913_v1 = vpop.eup %4912  ;;  %v1322_v25 = vpop.f32.mrf.mxu3 }
 0x1e9   : > { %4918 = vrcp.f32 %v1590_v41  ;;  %v1461_v35 = vpop.f32.mrf.mxu2  ;;  %v4915_v46 = vpop.eup %4914  ;;  %v1129_v41 = vadd.f32 %v5944_v36, %v5853_v23 }
 0x1ea   : > { %v1462_v49 = vadd.f32 %v1461_v35, %v1413_v52  ;;  %v1671_v59 = vunpack.c.l.b16 %v1645_v22  ;;  %v1672_v47 = vunpack.c.h.b16 %v1645_v22  ;;  %4920 = vrcp.f32 %v1591_v24 }
 0x1eb   : > { %v1368_v7 = vpop.f32.mrf.mxu0  ;;  %4922 = vpow2.f32 %v1551_v43  ;;  %v1417_v63 = vpop.f32.mrf.mxu1  ;;  %v1593_v26 = vadd.f32 1.0, %v4915_v46 }
 0x1ec   : > { %v1498_v19 = vsub.f32 0.0, %v1462_v49  ;;  %v6160_v4 = vpack.c.b16 %v1671_v59, %v1671_v59  ;;  %v6162_v48 = vpack.c.b16 %v1672_v47, %v1672_v47  ;;  %v1178_v47 = vadd.f32 %v5946_v37, %v1129_v41 }
 0x1ed   : > { %v1323_v37 = vadd.f32 %v1322_v25, %v5995_v28 }
 0x1ee   : > { %v4917_v61 = vpop.eup %4916  ;;  %v1549_v16 = vmul.f32 1.442695, %v1498_v19  ;;  %v1781_v31 = vsel %vm388_vm0, %v6122_v20, %v6160_v4  ;;  %v6170_v14 = vsel %vm388_vm0, %v6124_v39, %v6162_v48  ;;  %v1320_v20 = vadd.f32 %v1319_v29, %v5995_v28 }
 0x1ef   : > { %v4919_v30 = vpop.eup %4918  ;;  %v1592_v57 = vadd.f32 1.0, %v4917_v61  ;;  %2491 = vmatmul.bf16.gmra.mxu2 %v1781_v31  ;;  %v1173_v29 = vadd.f32 %v5931_v18, %v1124_v8  ;;  %v1503_v18 = vsub.f32 0.0, %v1274_v6  ;;  %v1227_v42 = vadd.f32 %v5964_v13, %v1178_v47 }
 0x1f0   : > { %4924 = vpow2.f32 %v1549_v16  ;;  %v1646_v40 = vpack.c.bf16 %v4919_v30, %v4913_v1  ;;  %v4921_v22 = vpop.eup %4920  ;;  %v1369_v24 = vadd.f32 %v1368_v7, %v1320_v20  ;;  %v1324_v13 = vpop.f32.mrf.mxu3 }
 0x1f1   : > { %4926 = vrcp.f32 %v1592_v57  ;;  %v1464_v21 = vpop.f32.mrf.mxu2  ;;  %v4923_v15 = vpop.eup %4922  ;;  %v1222_v59 = vadd.f32 %v5942_v62, %v1173_v29  ;;  %v4687_v62 = vld [vmem:[%s6871_s3 + $0xa8] sm:$0xff]  ;;  %v1559_v57 = vmul.f32 1.442695, %v1503_v18 }
 0x1f2   : > { %v1465_v10 = vadd.f32 %v1464_v21, %v1416_v17  ;;  %v1733_v3 = vunpack.c.h.b16 %v1646_v40  ;;  %v1732_v39 = vunpack.c.l.b16 %v1646_v40  ;;  %4928 = vrcp.f32 %v1593_v26  ;;  %2451 = vmatpush.bf16.msra.mxu1 %v4687_v62 }
 0x1f3   : > { %v1371_v52 = vpop.f32.mrf.mxu0  ;;  %v1418_v7 = vadd.f32 %v1417_v63, %v1369_v24  ;;  %v1595_v31 = vadd.f32 1.0, %v4923_v15  ;;  %v1271_v30 = vadd.f32 %v5894_v5, %v1222_v59  ;;  %v1276_v21 = vadd.f32 %v5910_v51, %v1227_v42 }
 0x1f4   : > { %v1500_v35 = vsub.f32 0.0, %v1465_v10  ;;  %v6179_v9 = vpack.c.b16 %v1733_v3, %v1733_v3  ;;  %v6181_v2 = vpack.c.b16 %v1732_v39, %v1732_v39  ;;  %v1372_v63 = vadd.f32 %v1371_v52, %v1323_v37 }
 0x1f5   : > { %v1501_v26 = vsub.f32 0.0, %v1271_v30  ;;  %v1505_v52 = vsub.f32 0.0, %v1276_v21 }
 0x1f6   : > { %v4925_v27 = vpop.eup %4924  ;;  %v1553_v49 = vmul.f32 1.442695, %v1500_v35  ;;  %v6187_v36 = vsel %vm388_vm0, %v6143_v0, %v6179_v9  ;;  %v6192_v45 = vsel %vm388_vm0, %v6141_v54, %v6181_v2  ;;  %v1420_v0 = vpop.f32.mrf.mxu1  ;;  %v4679_v54 = vld [vmem:[%s6871_s3 + $0x68] sm:$0xff] }
 0x1f7   : > { %v4927_v38 = vpop.eup %4926  ;;  %v1594_v43 = vadd.f32 1.0, %v4925_v27  ;;  %2422 = vmatpush.bf16.msra.mxu0 %v4679_v54  ;;  %v1421_v51 = vadd.f32 %v1420_v0, %v1372_v63  ;;  %v1134_v27 = vadd.f32 %v5969_v50, %v5853_v23  ;;  %v4678_v54 = vld [vmem:[%s6871_s3 + $0x60] sm:$0xff] }
 0x1f8   : > { %4930 = vpow2.f32 %v1553_v49  ;;  %v1647_v1 = vpack.c.bf16 %v4927_v38, %v4921_v22  ;;  %v4929_v8 = vpop.eup %4928  ;;  %v1325_v22 = vadd.f32 %v1324_v13, %v5995_v28  ;;  %v1327_v42 = vpop.f32.mrf.mxu3 }
 0x1f9   : > { %4932 = vrcp.f32 %v1594_v43  ;;  %v1466_v19 = vpop.f32.mrf.mxu2  ;;  %v1183_v62 = vadd.f32 %v5971_v53, %v1134_v27  ;;  %v4685_v53 = vld [vmem:[%s6871_s3 + $0x98] sm:$0xff]  ;;  %v1328_v30 = vadd.f32 %v1327_v42, %v5995_v28  ;;  %v4724_v42 = vld [vmem:[%s6871_s3 + $0x1d0] sm:$0xff] }
 0x1fa   : > { %v1467_v46 = vadd.f32 %v1466_v19, %v1418_v7  ;;  %v1676_v61 = vunpack.c.l.b16 %v1647_v1  ;;  %v1677_v16 = vunpack.c.h.b16 %v1647_v1  ;;  %4934 = vrcp.f32 %v1595_v31  ;;  %v4677_v31 = vld [vmem:[%s6871_s3 + $0x58] sm:$0xff] }
 0x1fb   : > { %v1373_v20 = vpop.f32.mrf.mxu0  ;;  %4936 = vpow2.f32 %v1559_v57  ;;  %v1563_v7 = vmul.f32 1.442695, %v1505_v52  ;;  %v1279_v1 = vadd.f32 %v5922_v32, %v5984_v60  ;;  %v4686_v32 = vld [vmem:[%s6871_s3 + $0xa0] sm:$0xff]  ;;  %2423 = vmatpush.bf16.msra.mxu0 %v4678_v54 }
 0x1fc   : > { %v6205_v17 = vpack.c.b16 %v1676_v61, %v1676_v61  ;;  %v6207_v40 = vpack.c.b16 %v1677_v16, %v1677_v16  ;;  %v1502_v10 = vsub.f32 0.0, %v1467_v46  ;;  %v1374_v38 = vadd.f32 %v1373_v20, %v1325_v22  ;;  %2452 = vmatpush.bf16.msra.mxu1 %v4686_v32 }
 0x1fd   : > { %v1507_v46 = vsub.f32 0.0, %v1279_v1  ;;  %v1232_v61 = vadd.f32 %v6002_v55, %v1183_v62 }
 0x1fe   : > { %v4931_v25 = vpop.eup %4930  ;;  %v6213_v3 = vsel %vm388_vm0, %v6160_v4, %v6205_v17  ;;  %v6218_v5 = vsel %vm388_vm0, %v6162_v48, %v6207_v40  ;;  %v1557_v24 = vmul.f32 1.442695, %v1502_v10  ;;  %v1555_v48 = vmul.f32 1.442695, %v1501_v26  ;;  %v1422_v49 = vpop.f32.mrf.mxu1 }
 0x1ff   : > { %v4933_v39 = vpop.eup %4932  ;;  %v1596_v41 = vadd.f32 1.0, %v4931_v25  ;;  %2409 = vmatmul.bf16.gmra.mxu3 %v6213_v3  ;;  %2424 = vmatpush.bf16.msra.mxu0 %v4677_v31  ;;  %v1567_v26 = vmul.f32 1.442695, %v1507_v46  ;;  %v4723_v46 = vld [vmem:[%s6871_s3 + $0x1c8] sm:$0xff] }
 0x200   : > { %v1648_v6 = vpack.c.bf16 %v4933_v39, %v4929_v8  ;;  %v4935_v18 = vpop.eup %4934  ;;  %2453 = vmatpush.bf16.msra.mxu1 %v4685_v53 }
 0x201   : > { %4938 = vrcp.f32 %v1596_v41  ;;  %v1469_v4 = vpop.f32.mrf.mxu2  ;;  %v4937_v0 = vpop.eup %4936 }
 0x202   : > { %v1470_v35 = vadd.f32 %v1469_v4, %v1421_v51  ;;  %v1738_v15 = vunpack.c.h.b16 %v1648_v6  ;;  %v1737_v29 = vunpack.c.l.b16 %v1648_v6  ;;  %4940 = vpow2.f32 %v1557_v24 }
 0x203   : > { %4942 = vpow2.f32 %v1555_v48  ;;  %v1376_v37 = vpop.f32.mrf.mxu0  ;;  %v1599_v8 = vadd.f32 1.0, %v4937_v0  ;;  %v1281_v6 = vadd.f32 %v5933_v58, %v1232_v61  ;;  %v4676_v58 = vld [vmem:[%s6871_s3 + $0x50] sm:$0xff] }
 0x204   : > { %v1504_v59 = vsub.f32 0.0, %v1470_v35  ;;  %v6224_v47 = vpack.c.b16 %v1738_v15, %v1738_v15  ;;  %v6226_v43 = vpack.c.b16 %v1737_v29, %v1737_v29  ;;  %v1377_v20 = vadd.f32 %v1376_v37, %v1328_v30  ;;  %v1329_v35 = vpop.f32.mrf.mxu3  ;;  %2425 = vmatpush.bf16.msra.mxu0 %v4676_v58 }
 0x206   : > { %v1561_v19 = vmul.f32 1.442695, %v1504_v59  ;;  %v1766_v23 = vsel %vm388_vm0, %v6179_v9, %v6224_v47  ;;  %v1763_v50 = vsel %vm388_vm0, %v6181_v2, %v6226_v43  ;;  %v1423_v9 = vadd.f32 %v1422_v49, %v1374_v38  ;;  %v1425_v41 = vpop.f32.mrf.mxu1  ;;  %v4683_v59 = vld [vmem:[%s6871_s3 + $0x88] sm:$0xff] }
 0x207   : > { %v4939_v60 = vpop.eup %4938  ;;  %1828 = vrot.lane.b32.xlu2 %v1766_v23, %s6891_s26  ;;  %1826 = vrot.lane.b32.xlu1 %v1763_v50, %s6891_s26  ;;  %v1426_v48 = vadd.f32 %v1425_v41, %v1377_v20 }
 0x208   : > { %4944 = vpow2.f32 %v1561_v19  ;;  %v1649_v2 = vpack.c.bf16 %v4939_v60, %v4935_v18  ;;  %v4941_v21 = vpop.eup %4940  ;;  %v1509_v18 = vsub.f32 0.0, %v1281_v6 }
 0x209   : > { %4946 = vpow2.f32 %v1563_v7  ;;  %v1471_v16 = vpop.f32.mrf.mxu2  ;;  %v4943_v39 = vpop.eup %4942  ;;  %v1598_v15 = vadd.f32 1.0, %v4941_v21  ;;  %v1330_v7 = vadd.f32 %v1329_v35, %v5995_v28  ;;  %v4722_v21 = vld [vmem:[%s6871_s3 + $0x1c0] sm:$0xff] }
 0x20a   : > { %v1472_v13 = vadd.f32 %v1471_v16, %v1423_v9  ;;  %v1681_v57 = vunpack.c.l.b16 %v1649_v2  ;;  %v1682_v63 = vunpack.c.h.b16 %v1649_v2  ;;  %4948 = vrcp.f32 %v1599_v8  ;;  %v4674_v9 = vld [vmem:[%s6871_s3 + $0x40] sm:$0xff] }
 0x20b   : > { %v1597_v27 = vadd.f32 1.0, %v4943_v39  ;;  %v1378_v49 = vpop.f32.mrf.mxu0  ;;  %v1571_v32 = vmul.f32 1.442695, %v1509_v18  ;;  %v4682_v2 = vld [vmem:[%s6871_s3 + $0x80] sm:$0xff] }
 0x20c   : > { %v1506_v25 = vsub.f32 0.0, %v1472_v13  ;;  %v6253_v10 = vpack.c.b16 %v1681_v57, %v1681_v57  ;;  %v6255_v55 = vpack.c.b16 %v1682_v63, %v1682_v63  ;;  %v1379_v19 = vadd.f32 %v1378_v49, %v1330_v7 }
 0x20e   : > { %v4945_v51 = vpop.eup %4944  ;;  %v1565_v52 = vmul.f32 1.442695, %v1506_v25  ;;  %v1784_v22 = vsel %vm388_vm0, %v6205_v17, %v6253_v10  ;;  %v6264_v4 = vsel %vm388_vm0, %v6207_v40, %v6255_v55  ;;  %v4684_v17 = vld [vmem:[%s6871_s3 + $0x90] sm:$0xff]  ;;  %v4725_v40 = vld [vmem:[%s6871_s3 + $0x1d8] sm:$0xff]  ;;  %v1427_v37 = vpop.f32.mrf.mxu1 }
 0x20f   : > { %v4947_v24 = vpop.eup %4946  ;;  %v1600_v29 = vadd.f32 1.0, %v4945_v51  ;;  %1851 = vrot.lane.b32.xlu2 %v6105_v44, %s6891_s26  ;;  %2496 = vmatmul.bf16.gmra.mxu2 %v1784_v22  ;;  %v4675_v44 = vld [vmem:[%s6871_s3 + $0x48] sm:$0xff]  ;;  %v1428_v16 = vadd.f32 %v1427_v37, %v1379_v19 }
 0x210   : > { %4950 = vpow2.f32 %v1565_v52  ;;  %2454 = vmatpush.bf16.msra.mxu1 %v4684_v17  ;;  %2598 = vmatpush.bf16.msrb.mxu2 %v4725_v40  ;;  %v1601_v0 = vadd.f32 1.0, %v4947_v24  ;;  %v4949_v50 = vpop.eup %4948 }
 0x211   : > { %4952 = vrcp.f32 %v1600_v29  ;;  %v1474_v38 = vpop.f32.mrf.mxu2  ;;  %2426 = vmatpush.bf16.msra.mxu0 %v4675_v44 }
 0x212   : > { %4954 = vpow2.f32 %v1567_v26  ;;  %v1475_v1 = vadd.f32 %v1474_v38, %v1426_v48 }
 0x213   : > { %4956 = vrcp.f32 %v1598_v15 }
 0x214   : > { %v1508_v23 = vsub.f32 0.0, %v1475_v1  ;;  %4958 = vrcp.f32 %v1597_v27  ;;  %2455 = vmatpush.bf16.msra.mxu1 %v4683_v59  ;;  %2599 = vmatpush.bf16.msrb.mxu2 %v4724_v42 }
 0x215   : > { %4960 = vrcp.f32 %v1601_v0  ;;  %2427 = vmatpush.bf16.msra.mxu0 %v4674_v9  ;;  %v4704_v9 = vld [vmem:[%s6871_s3 + $0x130] sm:$0xff] }
 0x216   : > { %v4951_v54 = vpop.eup %4950  ;;  %v1569_v60 = vmul.f32 1.442695, %v1508_v23 }
 0x217   : > { %v4953_v62 = vpop.eup %4952  ;;  %v1602_v28 = vadd.f32 1.0, %v4951_v54  ;;  %1857 = vrot.lane.b32.xlu2 %v6187_v36, %s6891_s26 }
 0x218   : > { %v4955_v61 = vpop.eup %4954  ;;  %4962 = vpow2.f32 %v1569_v60  ;;  %v1651_v31 = vpack.c.bf16 %v4953_v62, %v4949_v50  ;;  %2456 = vmatpush.bf16.msra.mxu1 %v4682_v2  ;;  %2600 = vmatpush.bf16.msrb.mxu2 %v4723_v46  ;;  %v4705_v50 = vld [vmem:[%s6871_s3 + $0x138] sm:$0xff] }
 0x219   : > { %v4957_v53 = vpop.eup %4956  ;;  %4964 = vrcp.f32 %v1602_v28  ;;  %v1476_v30 = vpop.f32.mrf.mxu2  ;;  %v1603_v8 = vadd.f32 1.0, %v4955_v61  ;;  %2507 = vmatpush.bf16.msrb.mxu3 %v4705_v50  ;;  %v4703_v61 = vld [vmem:[%s6871_s3 + $0x128] sm:$0xff] }
 0x21a   : > { %4966 = vpow2.f32 %v1571_v32  ;;  %v1477_v36 = vadd.f32 %v1476_v30, %v1428_v16  ;;  %v1686_v13 = vunpack.c.l.b16 %v1651_v31  ;;  %v1687_v57 = vunpack.c.h.b16 %v1651_v31  ;;  %v4959_v63 = vpop.eup %4958 }
 0x21b   : > { %v1650_v39 = vpack.c.bf16 %v4957_v53, %v4959_v63  ;;  %v4961_v41 = vpop.eup %4960  ;;  %4968 = vrcp.f32 %v1603_v8 }
 0x21c   : > { %v1510_v20 = vsub.f32 0.0, %v1477_v36  ;;  %v1688_v25 = vpack.c.b16 %v1686_v13, %v1686_v13  ;;  %v1689_v26 = vpack.c.b16 %v1687_v57, %v1687_v57  ;;  %2601 = vmatpush.bf16.msrb.mxu2 %v4722_v21  ;;  %v1694_v57 = vsel %vm388_vm0, 0, %v6075_v56  ;;  %v4699_v56 = vld [vmem:[%s6871_s3 + $0x108] sm:$0xff] }
 0x21d   : > { %v1743_v58 = vunpack.c.h.b16 %v1650_v39  ;;  %v1742_v17 = vunpack.c.l.b16 %v1650_v39  ;;  %2508 = vmatpush.bf16.msrb.mxu3 %v4704_v9 }
 0x21e   : > { %v4963_v51 = vpop.eup %4962  ;;  %v1573_v6 = vmul.f32 1.442695, %v1510_v20  ;;  %v6303_v52 = vsel %vm388_vm0, %v6253_v10, %v1688_v25  ;;  %v6307_v22 = vsel %vm388_vm0, %v6255_v55, %v1689_v26  ;;  %v4700_v20 = vld [vmem:[%s6871_s3 + $0x110] sm:$0xff] }
 0x21f   : > { %v4965_v24 = vpop.eup %4964  ;;  %v1604_v35 = vadd.f32 1.0, %v4963_v51  ;;  %2414 = vmatmul.bf16.gmra.mxu3 %v6303_v52  ;;  %v1745_v27 = vpack.c.b16 %v1743_v58, %v1743_v58  ;;  %v1744_v38 = vpack.c.b16 %v1742_v17, %v1742_v17  ;;  %v4721_v51 = vld [vmem:[%s6871_s3 + $0x1b8] sm:$0xff]  ;;  %v4710_v17 = vld [vmem:[%s6871_s3 + $0x160] sm:$0xff] }
 0x220   : > { %v4967_v15 = vpop.eup %4966  ;;  %4970 = vpow2.f32 %v1573_v6  ;;  %v1652_v29 = vpack.c.bf16 %v4965_v24, %v4961_v41  ;;  %v4713_v41 = vld [vmem:[%s6871_s3 + $0x178] sm:$0xff]  ;;  %2565 = vmatpush.bf16.msrb.mxu1 %v4721_v51  ;;  %v4712_v6 = vld [vmem:[%s6871_s3 + $0x170] sm:$0xff] }
 0x221   : > { %4972 = vrcp.f32 %v1604_v35  ;;  %v1605_v10 = vadd.f32 1.0, %v4967_v15  ;;  %v4969_v55 = vpop.eup %4968  ;;  %2509 = vmatpush.bf16.msrb.mxu3 %v4703_v61  ;;  %v1801_v53 = vsel %vm388_vm0, %v6226_v43, %v1744_v38  ;;  %v4701_v43 = vld [vmem:[%s6871_s3 + $0x118] sm:$0xff]  ;;  %2536 = vmatpush.bf16.msrb.mxu0 %v4713_v41  ;;  %v4711_v15 = vld [vmem:[%s6871_s3 + $0x168] sm:$0xff] }
 0x222   : > { %v1748_v40 = vunpack.c.h.b16 %v1652_v29  ;;  %v1747_v48 = vunpack.c.l.b16 %v1652_v29  ;;  %v4719_v29 = vld [vmem:[%s6871_s3 + $0x1a8] sm:$0xff] }
 0x223   : > { %4974 = vrcp.f32 %v1605_v10 }
 0x224   : > { %v1750_v49 = vpack.c.b16 %v1748_v40, %v1748_v40  ;;  %v1749_v44 = vpack.c.b16 %v1747_v48, %v1747_v48  ;;  %v4718_v40 = vld [vmem:[%s6871_s3 + $0x1a0] sm:$0xff] }
 0x225   : > { %2537 = vmatpush.bf16.msrb.mxu0 %v4712_v6 }
 0x226   : > { %v4971_v59 = vpop.eup %4970  ;;  %v1772_v18 = vsel %vm388_vm0, %v1745_v27, %v1750_v49  ;;  %v1769_v7 = vsel %vm388_vm0, %v1744_v38, %v1749_v44 }
 0x227   : > { %v4973_v1 = vpop.eup %4972  ;;  %v1606_v42 = vadd.f32 1.0, %v4971_v59  ;;  %1832 = vrot.lane.b32.xlu1 %v1772_v18, %s6891_s26  ;;  %1830 = vrot.lane.b32.xlu0 %v1769_v7, %s6891_s26  ;;  %v4707_v7 = vld [vmem:[%s6871_s3 + $0x148] sm:$0xff] }
 0x228   : > { %v1653_v0 = vpack.c.bf16 %v4973_v1, %v4969_v55  ;;  %v4715_v1 = vld [vmem:[%s6871_s3 + $0x188] sm:$0xff] }
 0x229   : > { %4976 = vrcp.f32 %v1606_v42  ;;  %v4975_v60 = vpop.eup %4974  ;;  %2538 = vmatpush.bf16.msrb.mxu0 %v4711_v15  ;;  %v4706_v42 = vld [vmem:[%s6871_s3 + $0x140] sm:$0xff] }
 0x22a   : > { %v1774_v19 = vunpack.c.l.b16 %v1653_v0  ;;  %v1775_v23 = vunpack.c.h.b16 %v1653_v0 }
 0x22c   : > { %v6317_v54 = vpack.c.b16 %v1774_v19, %v1774_v19  ;;  %v6319_v32 = vpack.c.b16 %v1775_v23, %v1775_v23 }
 0x22d   : > { %2539 = vmatpush.bf16.msrb.mxu0 %v4710_v17 }
 0x22e   : > { %v1788_v62 = vsel %vm388_vm0, %v1688_v25, %v6317_v54  ;;  %v6325_v28 = vsel %vm388_vm0, %v1689_v26, %v6319_v32  ;;  %v4698_v25 = vld [vmem:[%s6871_s3 + $0x100] sm:$0xff]  ;;  %v1809_v38 = vsel %vm388_vm0, %v6319_v32, 0 }
 0x22f   : > { %v4977_v37 = vpop.eup %4976  ;;  %1855 = vrot.lane.b32.xlu1 %v6192_v45, %s6891_s26  ;;  %1853 = vrot.lane.b32.xlu0 %v6110_v33, %s6891_s26  ;;  %v4702_v45 = vld [vmem:[%s6871_s3 + $0x120] sm:$0xff]  ;;  %v1802_v33 = vsel %vm388_vm0, %v6224_v47, %v1745_v27  ;;  %v4709_v27 = vld [vmem:[%s6871_s3 + $0x158] sm:$0xff] }
 0x230   : > { %2501 = vmatmul.bf16.gmra.mxu2 %v1788_v62  ;;  %v1654_v2 = vpack.c.bf16 %v4977_v37, %v4975_v60  ;;  %2510 = vmatpush.bf16.msrb.mxu3 %v4702_v45 }
 0x231   : > { %2540 = vmatpush.bf16.msrb.mxu0 %v4709_v27 }
 0x232   : > { %v1793_v46 = vunpack.c.l.b16 %v1654_v2  ;;  %v1794_v30 = vunpack.c.h.b16 %v1654_v2 }
 0x234   : > { %v1795_v16 = vpack.c.b16 %v1793_v46, %v1793_v46  ;;  %v1796_v8 = vpack.c.b16 %v1794_v30, %v1794_v30  ;;  %2511 = vmatpush.bf16.msrb.mxu3 %v4701_v43 }
 0x236   : > { %v1804_v31 = vsel %vm388_vm0, %v1749_v44, %v1795_v16  ;;  %v1806_v21 = vsel %vm388_vm0, %v1750_v49, %v1796_v8  ;;  %v4717_v49 = vld [vmem:[%s6871_s3 + $0x198] sm:$0xff]  ;;  %v4716_v44 = vld [vmem:[%s6871_s3 + $0x190] sm:$0xff] }
 0x237   : > { %1861 = vrot.lane.b32.xlu1 %v1802_v33, %s6891_s26  ;;  %1863 = vrot.lane.b32.xlu2 %v1804_v31, %s6891_s26 }
 0x238   : > { %1859 = vrot.lane.b32.xlu0 %v1801_v53, %s6891_s26  ;;  %2512 = vmatpush.bf16.msrb.mxu3 %v4700_v20 }
 0x239   : > { %v1821_v36 = vpop.permute.xlu1 %1820  ;;  %v1819_v13 = vpop.permute.xlu0 %1818 }
 0x23a   : > { %v1835_v47 = vsel %vm655_vm2, %v1819_v13, %v1821_v36  ;;  %v1876_v63 = vsel %vm655_vm2, %v1694_v57, %v1819_v13 }
 0x23b   : > { %2428 = vmatmul.bf16.vlgmr.msra.gmra.mxu0 %v1876_v63  ;;  %2457 = vmatmul.bf16.vlgmr.msra.gmra.mxu1 %v1835_v47 }
 0x23c   : > { %2513 = vmatpush.bf16.msrb.mxu3 %v4699_v56 }
 0x240   : > { %1865 = vrot.lane.b32.xlu0 %v1806_v21, %s6891_s26  ;;  %4280 = vmatmul.msk.bf16.vlgmr.msrb.gmra.mxu2 %vm655_vm2, %v6134_v12 }
 0x241   : > { %v1823_v39 = vpop.permute.xlu2 %1822  ;;  %2514 = vmatpush.bf16.msrb.mxu3 %v4698_v25 }
 0x242   : > { %v1879_v26 = vsel %vm655_vm2, %v6134_v12, %v1823_v39  ;;  %v4720_v12 = vld [vmem:[%s6871_s3 + $0x1b0] sm:$0xff] }
 0x243   : > { %2566 = vmatpush.bf16.msrb.mxu1 %v4720_v12 }
 0x247   : > { %2567 = vmatpush.bf16.msrb.mxu1 %v4719_v29  ;;  %v6482_v29 = vld [vmem:[%s6872_s4] ss:$0 sm:$0xff] }
 0x24b   : > { %2433 = vmatmul.bf16.gmra.mxu0 %v1879_v26  ;;  %2568 = vmatpush.bf16.msrb.mxu1 %v4718_v40 }
 0x24f   : > { %2569 = vmatpush.bf16.msrb.mxu1 %v4717_v49 }
 0x250   : > { %4281 = vmatmul.msk.bf16.gmra.mxu2 %vm655_vm2, %v6218_v5 }
 0x253   : > { %2570 = vmatpush.bf16.msrb.mxu1 %v4716_v44 }
 0x257   : > { %2571 = vmatpush.bf16.msrb.mxu1 %v4715_v1 }
 0x259   : > { %v1825_v24 = vpop.permute.xlu0 %1824 }
 0x25a   : > { %v1836_v35 = vsel %vm655_vm2, %v1823_v39, %v1825_v24 }
 0x25b   : > { %2462 = vmatmul.bf16.gmra.mxu1 %v1836_v35 }
 0x260   : > { %4282 = vmatmul.msk.bf16.gmra.mxu2 %vm655_vm2, %v6307_v22 }
 0x261   : > { %v1829_v58 = vpop.permute.xlu2 %1828 }
 0x269   : > { %v1852_v48 = vpop.permute.xlu2 %1851 }
 0x26a   : > { %v1888_v10 = vsel %vm655_vm2, %v6087_v34, %v1852_v48  ;;  %v4708_v34 = vld [vmem:[%s6871_s3 + $0x150] sm:$0xff] }
 0x26b   : > { %2515 = vmatmul.bf16.vlgmr.msrb.gmra.mxu3 %v1888_v10  ;;  %2541 = vmatpush.bf16.msrb.mxu0 %v4708_v34 }
 0x26f   : > { %2542 = vmatpush.bf16.msrb.mxu0 %v4707_v7 }
 0x270   : > { %4283 = vmatmul.msk.bf16.gmra.mxu2 %vm655_vm2, %v1809_v38 }
 0x273   : > { %2543 = vmatpush.bf16.msrb.mxu0 %v4706_v42 }
 0x279   : > { %v1827_v55 = vpop.permute.xlu1 %1826 }
 0x27a   : > { %v1882_v59 = vsel %vm655_vm2, %v6218_v5, %v1827_v55  ;;  %v1837_v18 = vsel %vm655_vm2, %v1827_v55, %v1829_v58  ;;  %v4714_v5 = vld [vmem:[%s6871_s3 + $0x180] sm:$0xff] }
 0x27b   : > { %2438 = vmatmul.bf16.gmra.mxu0 %v1882_v59  ;;  %2467 = vmatmul.bf16.gmra.mxu1 %v1837_v18 }
 0x27c   : > { %2572 = vmatpush.bf16.msrb.mxu1 %v4714_v5 }
 0x299   : > { %v1833_v0 = vpop.permute.xlu1 %1832  ;;  %v1831_v19 = vpop.permute.xlu0 %1830 }
 0x29a   : > { %v1885_v23 = vsel %vm655_vm2, %v6307_v22, %v1831_v19  ;;  %v1838_v50 = vsel %vm655_vm2, %v1831_v19, %v1833_v0  ;;  %v1858_v22 = vpop.permute.xlu2 %1857 }
 0x29b   : > { %2443 = vmatmul.bf16.gmra.mxu0 %v1885_v23  ;;  %2472 = vmatmul.bf16.gmra.mxu1 %v1838_v50  ;;  %v4755_v50 = vld [vmem:[%s6873_s5 + $0xe8] sm:$0xff] }
 0x29c   : > { %3107 = vmatpush.bf16.msra.mxu2 %v4755_v50 }
 0x2a1   : > { %v1856_v32 = vpop.permute.xlu1 %1855  ;;  %v1854_v62 = vpop.permute.xlu0 %1853 }
 0x2a2   : > { %v1891_v60 = vsel %vm655_vm2, %v6170_v14, %v1856_v32  ;;  %v1867_v37 = vsel %vm655_vm2, %v1852_v48, %v1854_v62  ;;  %v1868_v46 = vsel %vm655_vm2, %v1856_v32, %v1858_v22  ;;  %v1864_v61 = vpop.permute.xlu2 %1863 }
 0x2a3   : > { %2520 = vmatmul.bf16.gmra.mxu3 %v1891_v60  ;;  %v1897_v14 = vsel %vm655_vm2, %v6325_v28, %v1864_v61 }
 0x2a9   : > { %v1862_v16 = vpop.permute.xlu1 %1861 }
 0x2aa   : > { %v1860_v9 = vpop.permute.xlu0 %1859 }
 0x2ab   : > { %2544 = vmatmul.bf16.vlgmr.msrb.gmra.mxu0 %v1867_v37  ;;  %2573 = vmatmul.bf16.vlgmr.msrb.gmra.mxu1 %v6129_v11  ;;  %v1894_v2 = vsel %vm655_vm2, %v6264_v4, %v1860_v9  ;;  %v1869_v45 = vsel %vm655_vm2, %v1860_v9, %v1862_v16  ;;  %v2400_v11 = vpop.f32.mrf.mxu3  ;;  %v2487_v4 = vpop.f32.mrf.mxu2  ;;  %v4754_v9 = vld [vmem:[%s6873_s5 + $0xe0] sm:$0xff] }
 0x2ac   : > { %v2401_v48 = vadd.f32 %v6482_v29, %v2400_v11  ;;  %3108 = vmatpush.bf16.msra.mxu2 %v4754_v9 }
 0x2b2   : > { %v1866_v33 = vpop.permute.xlu0 %1865 }
 0x2b3   : > { %2525 = vmatmul.bf16.gmra.mxu3 %v1894_v2  ;;  %v2402_v31 = vpop.f32.mrf.mxu3  ;;  %v1870_v53 = vsel %vm655_vm2, %v1864_v61, %v1866_v33  ;;  %v4753_v33 = vld [vmem:[%s6873_s5 + $0xd8] sm:$0xff] }
 0x2b4   : > { %v2403_v55 = vadd.f32 %v6482_v29, %v2402_v31  ;;  %3109 = vmatpush.bf16.msra.mxu2 %v4753_v33 }
 0x2b8   : > { %v2429_v30 = vpop.f32.mrf.mxu0  ;;  %v2458_v36 = vpop.f32.mrf.mxu1 }
 0x2b9   : > { %v2430_v10 = vadd.f32 %v2429_v30, %v2401_v48 }
 0x2bb   : > { %2549 = vmatmul.bf16.gmra.mxu0 %v1868_v46  ;;  %2578 = vmatmul.bf16.gmra.mxu1 %v6213_v3  ;;  %v2489_v3 = vpop.f32.mrf.mxu2  ;;  %v2405_v28 = vpop.f32.mrf.mxu3  ;;  %v2459_v34 = vadd.f32 %v2458_v36, %v2430_v10  ;;  %v4752_v36 = vld [vmem:[%s6873_s5 + $0xd0] sm:$0xff] }
 0x2bc   : > { %v2406_v60 = vadd.f32 %v6482_v29, %v2405_v28  ;;  %3110 = vmatpush.bf16.msra.mxu2 %v4752_v36 }
 0x2bd   : > { %v2488_v18 = vadd.f32 %v2487_v4, %v2459_v34 }
 0x2c0   : > { %v2431_v57 = vpop.f32.mrf.mxu0  ;;  %v2460_v63 = vpop.f32.mrf.mxu1 }
 0x2c1   : > { %v2432_v59 = vadd.f32 %v2431_v57, %v2403_v55 }
 0x2c3   : > { %2530 = vmatmul.bf16.gmra.mxu3 %v1897_v14  ;;  %v6449_v13 = vpop.f32.mrf.mxu2  ;;  %v2407_v47 = vpop.f32.mrf.mxu3  ;;  %v2461_v0 = vadd.f32 %v2460_v63, %v2432_v59 }
 0x2c5   : > { %v2490_v62 = vadd.f32 %v2489_v3, %v2461_v0  ;;  %v2408_v3 = vadd.f32 %v6482_v29, %v2407_v47 }
 0x2c8   : > { %v2434_v43 = vpop.f32.mrf.mxu0 }
 0x2c9   : > { %v2435_v2 = vadd.f32 %v2434_v43, %v2406_v60 }
 0x2cb   : > { %2554 = vmatmul.bf16.gmra.mxu0 %v1869_v45  ;;  %2583 = vmatmul.bf16.gmra.mxu1 %v6303_v52  ;;  %v6451_v52 = vpop.f32.mrf.mxu2  ;;  %v6453_v8 = vpop.f32.mrf.mxu3 }
 0x2d3   : > { %v6455_v20 = vpop.f32.mrf.mxu2  ;;  %v6457_v56 = vpop.f32.mrf.mxu3 }
 0x2d8   : > { %v2463_v21 = vpop.f32.mrf.mxu1 }
 0x2d9   : > { %v2464_v45 = vadd.f32 %v2463_v21, %v2435_v2 }
 0x2db   : > { %2559 = vmatmul.bf16.gmra.mxu0 %v1870_v53  ;;  %4279 = vmatmul.msk.bf16.gmra.mxu1 %vm388_vm0, %v6317_v54  ;;  %v2436_v54 = vpop.f32.mrf.mxu0  ;;  %v6461_v39 = vpop.f32.mrf.mxu2  ;;  %v2493_v30 = vadd.f32 %v6449_v13, %v2464_v45  ;;  %v4751_v13 = vld [vmem:[%s6873_s5 + $0xc8] sm:$0xff] }
 0x2dc   : > { %v6463_v26 = vpop.f32.mrf.mxu3  ;;  %v2437_v57 = vadd.f32 %v2436_v54, %v2408_v3  ;;  %3111 = vmatpush.bf16.msra.mxu2 %v4751_v13 }
 0x2e0   : > { %v6459_v25 = vpop.f32.mrf.mxu1 }
 0x2e1   : > { %v2466_v10 = vadd.f32 %v6459_v25, %v2437_v57 }
 0x2e3   : > { %v6469_v6 = vpop.f32.mrf.mxu2 }
 0x2e4   : > { %v6471_v12 = vpop.f32.mrf.mxu3 }
 0x2eb   : > { %v6477_v15 = vpop.f32.mrf.mxu2 }
 0x2ee   : > { %v2516_v58 = vpop.f32.mrf.mxu3 }
 0x2ef   : > { %v2517_v1 = vadd.f32 %v2516_v58, %v2488_v18  ;;  %v2495_v18 = vadd.f32 %v6451_v52, %v2466_v10  ;;  %v2413_v52 = vadd.f32 %v6482_v29, %v6457_v56 }
 0x2f3   : > { %v2603_v27 = vpop.f32.mrf.mxu2 }
 0x2f6   : > { %v2518_v44 = vpop.f32.mrf.mxu3 }
 0x2f7   : > { %v2519_v22 = vadd.f32 %v2518_v44, %v2490_v62  ;;  %v2411_v44 = vadd.f32 %v6482_v29, %v6453_v8 }
 0x2f8   : > { %v6465_v41 = vpop.f32.mrf.mxu0  ;;  %v6467_v51 = vpop.f32.mrf.mxu1 }
 0x2f9   : > { %v2440_v59 = vadd.f32 %v6465_v41, %v2411_v44 }
 0x2fb   : > { %v2605_v7 = vpop.f32.mrf.mxu2 }
 0x300   : > { %v6473_v24 = vpop.f32.mrf.mxu0  ;;  %v6475_v35 = vpop.f32.mrf.mxu1 }
 0x301   : > { %v2442_v2 = vadd.f32 %v6473_v24, %v2413_v52 }
 0x303   : > { %v2608_v16 = vpop.f32.mrf.mxu2  ;;  %v2471_v56 = vadd.f32 %v6475_v35, %v2442_v2 }
 0x30b   : > { %v2610_v55 = vpop.f32.mrf.mxu2 }
 0x313   : > { %v2613_v9 = vpop.f32.mrf.mxu2 }
 0x318   : > { %v6484_v17 = vpop.f32.mrf.mxu0  ;;  %v6486_v40 = vpop.f32.mrf.mxu1 }
 0x320   : > { %v6489_v49 = vpop.f32.mrf.mxu0  ;;  %v6491_v38 = vpop.f32.mrf.mxu1 }
 0x326   : > { %v2521_v19 = vpop.f32.mrf.mxu3 }
 0x327   : > { %v2522_v63 = vadd.f32 %v2521_v19, %v2493_v30 }
 0x328   : > { %v2545_v42 = vpop.f32.mrf.mxu0  ;;  %v2574_v5 = vpop.f32.mrf.mxu1 }
 0x329   : > { %v2546_v23 = vadd.f32 %v2545_v42, %v2517_v1  ;;  %v4750_v1 = vld [vmem:[%s6873_s5 + $0xc0] sm:$0xff] }
 0x32a   : > { %3112 = vmatpush.bf16.msra.mxu2 %v4750_v1 }
 0x32b   : > { %v2575_v32 = vadd.f32 %v2574_v5, %v2546_v23  ;;  %v2469_v23 = vadd.f32 %v6467_v51, %v2440_v59 }
 0x32d   : > { %v2604_v37 = vadd.f32 %v2603_v27, %v2575_v32 }
 0x32e   : > { %v2523_v31 = vpop.f32.mrf.mxu3 }
 0x32f   : > { %v2623_v46 = vsub.f32 0.0, %v2604_v37  ;;  %v2524_v42 = vadd.f32 %v2523_v31, %v2495_v18 }
 0x330   : > { %v2547_v61 = vpop.f32.mrf.mxu0  ;;  %v2576_v14 = vpop.f32.mrf.mxu1 }
 0x331   : > { %v2631_v11 = vmul.f32 1.442695, %v2623_v46  ;;  %v2548_v4 = vadd.f32 %v2547_v61, %v2519_v22  ;;  %v2498_v22 = vadd.f32 %v6455_v20, %v2469_v23  ;;  %v2416_v20 = vadd.f32 %v6482_v29, %v6463_v26 }
 0x333   : > { %4978 = vpow2.f32 %v2631_v11  ;;  %v2577_v53 = vadd.f32 %v2576_v14, %v2548_v4  ;;  %v2445_v57 = vadd.f32 %v6484_v17, %v2416_v20 }
 0x335   : > { %v2606_v28 = vadd.f32 %v2605_v7, %v2577_v53  ;;  %v2474_v26 = vadd.f32 %v6486_v40, %v2445_v57 }
 0x336   : > { %v2526_v25 = vpop.f32.mrf.mxu3 }
 0x337   : > { %v2624_v43 = vsub.f32 0.0, %v2606_v28  ;;  %v2527_v14 = vadd.f32 %v2526_v25, %v2498_v22 }
 0x338   : > { %v2550_v21 = vpop.f32.mrf.mxu0  ;;  %v2579_v58 = vpop.f32.mrf.mxu1 }
 0x339   : > { %v4979_v48 = vpop.eup %4978  ;;  %v2633_v27 = vmul.f32 1.442695, %v2624_v43  ;;  %v2551_v34 = vadd.f32 %v2550_v21, %v2522_v63  ;;  %v2500_v63 = vadd.f32 %v6461_v39, %v2471_v56  ;;  %v2615_v21 = vpop.f32.mrf.mxu2 }
 0x33a   : > { %v2647_v47 = vadd.f32 1.0, %v4979_v48 }
 0x33b   : > { %4980 = vpow2.f32 %v2633_v27  ;;  %v2580_v54 = vadd.f32 %v2579_v58, %v2551_v34 }
 0x33c   : > { %4982 = vrcp.f32 %v2647_v47 }
 0x33d   : > { %v2609_v7 = vadd.f32 %v2608_v16, %v2580_v54  ;;  %v2418_v54 = vadd.f32 %v6482_v29, %v6471_v12 }
 0x33e   : > { %v2528_v51 = vpop.f32.mrf.mxu3 }
 0x33f   : > { %v2625_v5 = vsub.f32 0.0, %v2609_v7  ;;  %v2529_v58 = vadd.f32 %v2528_v51, %v2500_v63  ;;  %v2447_v25 = vadd.f32 %v6489_v49, %v2418_v54  ;;  %v2503_v7 = vadd.f32 %v6469_v6, %v2474_v26  ;;  %v4731_v63 = vld [vmem:[%s6873_s5 + $0x28] sm:$0xff]  ;;  %v4738_v26 = vld [vmem:[%s6873_s5 + $0x60] sm:$0xff] }
 0x340   : > { %v2552_v0 = vpop.f32.mrf.mxu0  ;;  %v2581_v8 = vpop.f32.mrf.mxu1 }
 0x341   : > { %v4981_v19 = vpop.eup %4980  ;;  %v2635_v50 = vmul.f32 1.442695, %v2625_v5  ;;  %v2553_v32 = vadd.f32 %v2552_v0, %v2524_v42  ;;  %v2618_v49 = vpop.f32.mrf.mxu2 }
 0x342   : > { %v4983_v60 = vpop.eup %4982  ;;  %v2648_v41 = vadd.f32 1.0, %v4981_v19 }
 0x343   : > { %4984 = vpow2.f32 %v2635_v50  ;;  %v2582_v62 = vadd.f32 %v2581_v8, %v2553_v32  ;;  %v2663_v37 = vpack.c.bf16 %v4983_v60, %v4983_v60  ;;  %v2476_v50 = vadd.f32 %v6491_v38, %v2447_v25 }
 0x344   : > { %4986 = vrcp.f32 %v2648_v41 }
 0x345   : > { %v2611_v46 = vadd.f32 %v2610_v55, %v2582_v62  ;;  %v2677_v61 = vunpack.c.l.b16 %v2663_v37  ;;  %v2505_v37 = vadd.f32 %v6477_v15, %v2476_v50  ;;  %v4733_v15 = vld [vmem:[%s6873_s5 + $0x38] sm:$0xff] }
 0x346   : > { %v2531_v39 = vpop.f32.mrf.mxu3  ;;  %3018 = vmatpush.bf16.msra.mxu3 %v4733_v15  ;;  %v4745_v50 = vld [vmem:[%s6873_s5 + $0x98] sm:$0xff] }
 0x347   : > { %v2626_v16 = vsub.f32 0.0, %v2611_v46  ;;  %v2688_v45 = vpack.c.b16 %v2677_v61, %v2677_v61  ;;  %v2532_v42 = vadd.f32 %v2531_v39, %v2503_v7  ;;  %v4737_v39 = vld [vmem:[%s6873_s5 + $0x58] sm:$0xff]  ;;  %v4728_v7 = vld [vmem:[%s6873_s5 + $0x10] sm:$0xff] }
 0x348   : > { %v2555_v11 = vpop.f32.mrf.mxu0  ;;  %v2584_v4 = vpop.f32.mrf.mxu1 }
 0x349   : > { %v4985_v33 = vpop.eup %4984  ;;  %v2637_v31 = vmul.f32 1.442695, %v2626_v16  ;;  %v2556_v53 = vadd.f32 %v2555_v11, %v2527_v14  ;;  %v2693_v3 = vsel %vm388_vm0, 0, %v2688_v45 }
 0x34a   : > { %v4987_v30 = vpop.eup %4986  ;;  %v2649_v28 = vadd.f32 1.0, %v4985_v33  ;;  %2701 = vrot.lane.b32.xlu1 %v2693_v3, %s6890_s29  ;;  %v4732_v3 = vld [vmem:[%s6873_s5 + $0x30] sm:$0xff] }
 0x34b   : > { %4988 = vpow2.f32 %v2637_v31  ;;  %v2585_v24 = vadd.f32 %v2584_v4, %v2556_v53  ;;  %v2664_v36 = vpack.c.bf16 %v4987_v30, %v4987_v30  ;;  %v4741_v4 = vld [vmem:[%s6873_s5 + $0x78] sm:$0xff]  ;;  %v2620_v53 = vpop.f32.mrf.mxu2  ;;  %v4740_v30 = vld [vmem:[%s6873_s5 + $0x70] sm:$0xff]  ;;  %3019 = vmatpush.bf16.msra.mxu3 %v4732_v3 }
 0x34c   : > { %4990 = vrcp.f32 %v2649_v28  ;;  %v4749_v31 = vld [vmem:[%s6873_s5 + $0xb8] sm:$0xff]  ;;  %3047 = vmatpush.bf16.msra.mxu0 %v4741_v4 }
 0x34d   : > { %v2614_v35 = vadd.f32 %v2613_v9, %v2585_v24  ;;  %v2678_v43 = vunpack.c.l.b16 %v2664_v36  ;;  %3076 = vmatpush.bf16.msra.mxu1 %v4749_v31  ;;  %v4748_v24 = vld [vmem:[%s6873_s5 + $0xb0] sm:$0xff] }
 0x34e   : > { %v2533_v52 = vpop.f32.mrf.mxu3 }
 0x34f   : > { %v2627_v48 = vsub.f32 0.0, %v2614_v35  ;;  %v6532_v10 = vpack.c.b16 %v2678_v43, %v2677_v61  ;;  %v2534_v2 = vadd.f32 %v2533_v52, %v2505_v37  ;;  %v4739_v35 = vld [vmem:[%s6873_s5 + $0x68] sm:$0xff]  ;;  %3020 = vmatpush.bf16.msra.mxu3 %v4731_v63  ;;  %v4742_v52 = vld [vmem:[%s6873_s5 + $0x80] sm:$0xff] }
 0x350   : > { %v2557_v27 = vpop.f32.mrf.mxu0  ;;  %v2586_v34 = vpop.f32.mrf.mxu1  ;;  %3048 = vmatpush.bf16.msra.mxu0 %v4740_v30 }
 0x351   : > { %v4989_v13 = vpop.eup %4988  ;;  %v2639_v47 = vmul.f32 1.442695, %v2627_v48  ;;  %v2558_v44 = vadd.f32 %v2557_v27, %v2529_v58  ;;  %2709 = vrot.lane.b32.xlu2 %v6532_v10, %s6891_s26  ;;  %3077 = vmatpush.bf16.msra.mxu1 %v4748_v24  ;;  %v4747_v27 = vld [vmem:[%s6873_s5 + $0xa8] sm:$0xff] }
 0x352   : > { %v4991_v17 = vpop.eup %4990  ;;  %v2650_v55 = vadd.f32 1.0, %v4989_v13  ;;  %v4730_v13 = vld [vmem:[%s6873_s5 + $0x20] sm:$0xff] }
 0x353   : > { %4992 = vpow2.f32 %v2639_v47  ;;  %v2587_v59 = vadd.f32 %v2586_v34, %v2558_v44  ;;  %v2665_v18 = vpack.c.bf16 %v4991_v17, %v4991_v17  ;;  %v4746_v44 = vld [vmem:[%s6873_s5 + $0xa0] sm:$0xff]  ;;  %3021 = vmatpush.bf16.msra.mxu3 %v4730_v13 }
 0x354   : > { %4994 = vrcp.f32 %v2650_v55  ;;  %3049 = vmatpush.bf16.msra.mxu0 %v4739_v35  ;;  %v4729_v55 = vld [vmem:[%s6873_s5 + $0x18] sm:$0xff] }
 0x355   : > { %v2616_v40 = vadd.f32 %v2615_v21, %v2587_v59  ;;  %v2679_v1 = vunpack.c.l.b16 %v2665_v18  ;;  %3078 = vmatpush.bf16.msra.mxu1 %v4747_v27 }
 0x357   : > { %v2628_v5 = vsub.f32 0.0, %v2616_v40  ;;  %v2689_v0 = vpack.c.b16 %v2679_v1, %v2678_v43  ;;  %3022 = vmatpush.bf16.msra.mxu3 %v4729_v55 }
 0x358   : > { %v2560_v8 = vpop.f32.mrf.mxu0  ;;  %v2589_v19 = vpop.f32.mrf.mxu1  ;;  %3050 = vmatpush.bf16.msra.mxu0 %v4738_v26 }
 0x359   : > { %v4993_v23 = vpop.eup %4992  ;;  %v2641_v32 = vmul.f32 1.442695, %v2628_v5  ;;  %v2561_v12 = vadd.f32 %v2560_v8, %v2532_v42  ;;  %2718 = vrot.lane.b32.xlu0 %v2689_v0, %s6889_s16  ;;  %2703 = vrot.lane.b32.xlu1 %v2689_v0, %s6890_s29 }
 0x35a   : > { %v4995_v29 = vpop.eup %4994  ;;  %v2651_v60 = vadd.f32 1.0, %v4993_v23  ;;  %3079 = vmatpush.bf16.msra.mxu1 %v4746_v44 }
 0x35b   : > { %v2666_v6 = vpack.c.bf16 %v4995_v29, %v4995_v29  ;;  %4996 = vpow2.f32 %v2641_v32  ;;  %v2590_v41 = vadd.f32 %v2589_v19, %v2561_v12  ;;  %3023 = vmatpush.bf16.msra.mxu3 %v4728_v7  ;;  %v4727_v32 = vld [vmem:[%s6873_s5 + $0x8] sm:$0xff]  ;;  %v4736_v12 = vld [vmem:[%s6873_s5 + $0x50] sm:$0xff] }
 0x35c   : > { %4998 = vrcp.f32 %v2651_v60  ;;  %3051 = vmatpush.bf16.msra.mxu0 %v4737_v39  ;;  %v4744_v29 = vld [vmem:[%s6873_s5 + $0x90] sm:$0xff]  ;;  %v4735_v60 = vld [vmem:[%s6873_s5 + $0x48] sm:$0xff] }
 0x35d   : > { %v2680_v62 = vunpack.c.l.b16 %v2666_v6  ;;  %v2619_v9 = vadd.f32 %v2618_v49, %v2590_v41  ;;  %v4726_v49 = vld [vmem:[%s6873_s5] sm:$0xff]  ;;  %v4743_v41 = vld [vmem:[%s6873_s5 + $0x88] sm:$0xff] }
 0x35e   : > { %3080 = vmatpush.bf16.msra.mxu1 %v4745_v50  ;;  %v4734_v6 = vld [vmem:[%s6873_s5 + $0x40] sm:$0xff] }
 0x35f   : > { %v2629_v38 = vsub.f32 0.0, %v2619_v9  ;;  %v6545_v22 = vpack.c.b16 %v2680_v62, %v2679_v1  ;;  %3024 = vmatpush.bf16.msra.mxu3 %v4727_v32 }
 0x360   : > { %v2562_v46 = vpop.f32.mrf.mxu0  ;;  %v2591_v11 = vpop.f32.mrf.mxu1  ;;  %3052 = vmatpush.bf16.msra.mxu0 %v4736_v12 }
 0x361   : > { %v4997_v61 = vpop.eup %4996  ;;  %v2643_v14 = vmul.f32 1.442695, %v2629_v38  ;;  %v2563_v51 = vadd.f32 %v2562_v46, %v2534_v2  ;;  %4406 = vmatmul.msk.bf16.vlgmr.msra.gmra.mxu2 %vm630_vm1, %v6545_v22  ;;  %2711 = vrot.lane.b32.xlu2 %v6545_v22, %s6891_s26 }
 0x362   : > { %v4999_v16 = vpop.eup %4998  ;;  %v2652_v45 = vadd.f32 1.0, %v4997_v61  ;;  %3081 = vmatpush.bf16.msra.mxu1 %v4744_v29 }
 0x363   : > { %5000 = vpow2.f32 %v2643_v14  ;;  %v2592_v33 = vadd.f32 %v2591_v11, %v2563_v51  ;;  %v2667_v56 = vpack.c.bf16 %v4999_v16, %v4999_v16  ;;  %3025 = vmatpush.bf16.msra.mxu3 %v4726_v49  ;;  %v5109_v16 = vmov 0  }
 0x364   : > { %5002 = vrcp.f32 %v2652_v45  ;;  %3053 = vmatpush.bf16.msra.mxu0 %v4735_v60 }
 0x365   : > { %v2621_v28 = vadd.f32 %v2620_v53, %v2592_v33  ;;  %v2681_v20 = vunpack.c.l.b16 %v2667_v56 }
 0x366   : > { %3082 = vmatpush.bf16.msra.mxu1 %v4743_v41 }
 0x367   : > { %v2630_v36 = vsub.f32 0.0, %v2621_v28  ;;  %v2690_v57 = vpack.c.b16 %v2681_v20, %v2680_v62 }
 0x368   : > { %3054 = vmatpush.bf16.msra.mxu0 %v4734_v6 }
 0x369   : > { %v5001_v43 = vpop.eup %5000  ;;  %v2645_v21 = vmul.f32 1.442695, %v2630_v36  ;;  %2720 = vrot.lane.b32.xlu0 %v2690_v57, %s6889_s16  ;;  %2705 = vrot.lane.b32.xlu1 %v2690_v57, %s6890_s29  ;;  %v6655_v36 = vld [vmem:[%s6874_s6] ss:$0 sm:$0xff] }
 0x36a   : > { %v5003_v58 = vpop.eup %5002  ;;  %v2653_v48 = vadd.f32 1.0, %v5001_v43  ;;  %3083 = vmatpush.bf16.msra.mxu1 %v4742_v52 }
 0x36b   : > { %v2668_v34 = vpack.c.bf16 %v5003_v58, %v5003_v58  ;;  %5004 = vpow2.f32 %v2645_v21 }
 0x36c   : > { %5006 = vrcp.f32 %v2653_v48 }
 0x36d   : > { %v2682_v47 = vunpack.c.l.b16 %v2668_v34 }
 0x36f   : > { %v6589_v17 = vpack.c.b16 %v2682_v47, %v2681_v20 }
 0x371   : > { %v5005_v54 = vpop.eup %5004  ;;  %4407 = vmatmul.msk.bf16.gmra.mxu2 %vm630_vm1, %v6589_v17  ;;  %2713 = vrot.lane.b32.xlu2 %v6589_v17, %s6891_s26 }
 0x372   : > { %v5007_v59 = vpop.eup %5006  ;;  %v2654_v18 = vadd.f32 1.0, %v5005_v54 }
 0x373   : > { %v2669_v25 = vpack.c.bf16 %v5007_v59, %v5007_v59 }
 0x374   : > { %5008 = vrcp.f32 %v2654_v18 }
 0x375   : > { %v2687_v40 = vunpack.c.l.b16 %v2669_v25 }
 0x377   : > { %v2691_v1 = vpack.c.b16 %v2687_v40, %v2682_v47 }
 0x379   : > { %2722 = vrot.lane.b32.xlu0 %v2691_v1, %s6889_s16  ;;  %2707 = vrot.lane.b32.xlu1 %v2691_v1, %s6890_s29 }
 0x37a   : > { %v5009_v42 = vpop.eup %5008 }
 0x37b   : > { %v2670_v5 = vpack.c.bf16 %v5009_v42, %v5009_v42 }
 0x37d   : > { %v2695_v0 = vunpack.c.l.b16 %v2670_v5 }
 0x37f   : > { %v2699_v8 = vpack.c.b16 %v2695_v0, %v2687_v40  ;;  %v2696_v19 = vpack.c.b16 %v2695_v0, %v2695_v0 }
 0x381   : > { %4408 = vmatmul.msk.bf16.gmra.mxu2 %vm630_vm1, %v2699_v8  ;;  %2715 = vrot.lane.b32.xlu2 %v2699_v8, %s6891_s26  ;;  %v2698_v23 = vsel %vm388_vm0, %v2696_v19, 0 }
 0x382   : > { %2724 = vrot.lane.b32.xlu0 %v2698_v23, %s6889_s16 }
 0x391   : > { %3128 = vmatmul.bf16.gmra.mxu2 %v5109_v16 }
 0x3ab   : > { %v2710_v62 = vpop.permute.xlu2 %2709 }
 0x3bb   : > { %v2712_v2 = vpop.permute.xlu2 %2711 }
 0x3bc   : > { %v2702_v37 = vpop.permute.xlu1 %2701 }
 0x3bd   : > { %v2742_v9 = vsel %vm655_vm2, %v2702_v37, %v2710_v62  ;;  %4405 = vmatmul.msk.bf16.vlgmr.msra.gmra.mxu3 %vm4404_vm5, %v2702_v37 }
 0x3be   : > { %3055 = vmatmul.bf16.vlgmr.msra.gmra.mxu0 %v2742_v9 }
 0x3cb   : > { %v2719_v38 = vpop.permute.xlu0 %2718  ;;  %v2704_v46 = vpop.permute.xlu1 %2703 }
 0x3cc   : > { %v2754_v61 = vsel %vm680_vm3, %v2710_v62, %v2719_v38  ;;  %v2731_v14 = vsel %vm630_vm1, %v6532_v10, %v2704_v46  ;;  %v2745_v51 = vsel %vm655_vm2, %v2704_v46, %v2712_v2  ;;  %v2714_v45 = vpop.permute.xlu2 %2713 }
 0x3cd   : > { %3031 = vmatmul.bf16.gmra.mxu3 %v2731_v14  ;;  %3084 = vmatmul.bf16.vlgmr.msra.gmra.mxu1 %v2754_v61 }
 0x3ce   : > { %3060 = vmatmul.bf16.gmra.mxu0 %v2745_v51 }
 0x3db   : > { %v2721_v11 = vpop.permute.xlu0 %2720  ;;  %v2706_v15 = vpop.permute.xlu1 %2705 }
 0x3dc   : > { %v2735_v4 = vsel %vm630_vm1, %v6545_v22, %v2706_v15  ;;  %v2757_v33 = vsel %vm680_vm3, %v2712_v2, %v2721_v11  ;;  %v2748_v56 = vsel %vm655_vm2, %v2706_v15, %v2714_v45  ;;  %v2716_v10 = vpop.permute.xlu2 %2715 }
 0x3dd   : > { %3036 = vmatmul.bf16.gmra.mxu3 %v2735_v4  ;;  %3089 = vmatmul.bf16.gmra.mxu1 %v2757_v33 }
 0x3de   : > { %3065 = vmatmul.bf16.gmra.mxu0 %v2748_v56 }
 0x3e4   : > { %v6657_v57 = vpop.f32.mrf.mxu2 }
 0x3eb   : > { %v2723_v31 = vpop.permute.xlu0 %2722  ;;  %v2708_v53 = vpop.permute.xlu1 %2707 }
 0x3ec   : > { %v2739_v3 = vsel %vm630_vm1, %v6589_v17, %v2708_v53  ;;  %v2760_v30 = vsel %vm680_vm3, %v2714_v45, %v2723_v31  ;;  %v2751_v28 = vsel %vm655_vm2, %v2708_v53, %v2716_v10  ;;  %v3116_v48 = vpop.f32.mrf.mxu2 }
 0x3ed   : > { %3041 = vmatmul.bf16.gmra.mxu3 %v2739_v3  ;;  %3094 = vmatmul.bf16.gmra.mxu1 %v2760_v30 }
 0x3ee   : > { %3070 = vmatmul.bf16.gmra.mxu0 %v2751_v28 }
 0x3f4   : > { %v2725_v22 = vpop.permute.xlu0 %2724  ;;  %v3119_v55 = vpop.f32.mrf.mxu2 }
 0x3f5   : > { %v2763_v20 = vsel %vm680_vm3, %v2716_v10, %v2725_v22 }
 0x3fc   : > { %v3121_v0 = vpop.f32.mrf.mxu2 }
 0x3fd   : > { %3099 = vmatmul.bf16.gmra.mxu1 %v2763_v20 }
 0x404   : > { %v6666_v9 = vpop.f32.mrf.mxu2 }
 0x40c   : > { %v3126_v53 = vpop.f32.mrf.mxu2 }
 0x43b   : > { %v3056_v24 = vpop.f32.mrf.mxu0 }
 0x440   : > { %v3027_v63 = vpop.f32.mrf.mxu3 }
 0x441   : > { %v3028_v35 = vadd.f32 %v6655_v36, %v3027_v63 }
 0x443   : > { %v3057_v43 = vadd.f32 %v3056_v24, %v3028_v35  ;;  %v3058_v21 = vpop.f32.mrf.mxu0 }
 0x448   : > { %v3029_v58 = vpop.f32.mrf.mxu3 }
 0x449   : > { %v3030_v13 = vadd.f32 %v6655_v36, %v3029_v58 }
 0x44a   : > { %v3085_v27 = vpop.f32.mrf.mxu1 }
 0x44b   : > { %v6660_v34 = vadd.f32 %v3085_v27, %v3057_v43  ;;  %v3061_v26 = vpop.f32.mrf.mxu0  ;;  %v3059_v44 = vadd.f32 %v3058_v21, %v3030_v13  ;;  %v3129_v13 = vpop.f32.mrf.mxu2 }
 0x450   : > { %v3032_v47 = vpop.f32.mrf.mxu3 }
 0x451   : > { %v3033_v54 = vadd.f32 %v6655_v36, %v3032_v47 }
 0x452   : > { %v3087_v17 = vpop.f32.mrf.mxu1 }
 0x453   : > { %v3088_v39 = vadd.f32 %v3087_v17, %v3059_v44  ;;  %v3063_v25 = vpop.f32.mrf.mxu0  ;;  %v3062_v1 = vadd.f32 %v3061_v26, %v3033_v54 }
 0x455   : > { %v3117_v59 = vadd.f32 %v3116_v48, %v3088_v39 }
 0x457   : > { %v3135_v18 = vsub.f32 0.0, %v3117_v59 }
 0x458   : > { %v3034_v7 = vpop.f32.mrf.mxu3 }
 0x459   : > { %v3144_v40 = vmul.f32 1.442695, %v3135_v18  ;;  %v3035_v8 = vadd.f32 %v6655_v36, %v3034_v7 }
 0x45a   : > { %v3090_v42 = vpop.f32.mrf.mxu1 }
 0x45b   : > { %5010 = vpow2.f32 %v3144_v40  ;;  %v3091_v5 = vadd.f32 %v3090_v42, %v3062_v1  ;;  %v3064_v49 = vadd.f32 %v3063_v25, %v3035_v8  ;;  %v3066_v6 = vpop.f32.mrf.mxu0  ;;  %v4763_v8 = vld [vmem:[%s6875_s7 + $0x38] sm:$0xff] }
 0x45c   : > { %3620 = vmatpush.bf16.msrb.mxu3 %v4763_v8  ;;  %v4781_v8 = vld [vmem:[%s6875_s7 + $0xc8] sm:$0xff] }
 0x45d   : > { %v3120_v19 = vadd.f32 %v3119_v55, %v3091_v5 }
 0x45f   : > { %v3136_v23 = vsub.f32 0.0, %v3120_v19 }
 0x460   : > { %v3037_v50 = vpop.f32.mrf.mxu3 }
 0x461   : > { %v5011_v32 = vpop.eup %5010  ;;  %v3146_v12 = vmul.f32 1.442695, %v3136_v23  ;;  %v3038_v29 = vadd.f32 %v6655_v36, %v3037_v50  ;;  %v4771_v23 = vld [vmem:[%s6875_s7 + $0x78] sm:$0xff] }
 0x462   : > { %v3159_v60 = vadd.f32 1.0, %v5011_v32  ;;  %v3092_v41 = vpop.f32.mrf.mxu1  ;;  %v4778_v32 = vld [vmem:[%s6875_s7 + $0xb0] sm:$0xff]  ;;  %3633 = vmatpush.bf16.msrb.mxu0 %v4771_v23 }
 0x463   : > { %5012 = vpow2.f32 %v3146_v12  ;;  %v3093_v52 = vadd.f32 %v3092_v41, %v3064_v49  ;;  %v3067_v62 = vadd.f32 %v3066_v6, %v3038_v29  ;;  %v3068_v15 = vpop.f32.mrf.mxu0  ;;  %v4762_v12 = vld [vmem:[%s6875_s7 + $0x30] sm:$0xff]  ;;  %v3131_v29 = vpop.f32.mrf.mxu2 }
 0x464   : > { %5014 = vrcp.f32 %v3159_v60  ;;  %v4770_v49 = vld [vmem:[%s6875_s7 + $0x70] sm:$0xff]  ;;  %v4787_v60 = vld [vmem:[%s6875_s7 + $0xf8] sm:$0xff]  ;;  %3621 = vmatpush.bf16.msrb.mxu3 %v4762_v12 }
 0x465   : > { %v3122_v37 = vadd.f32 %v3121_v0, %v3093_v52  ;;  %v4779_v0 = vld [vmem:[%s6875_s7 + $0xb8] sm:$0xff]  ;;  %3659 = vmatpush.bf16.msrb.mxu2 %v4787_v60  ;;  %v4777_v52 = vld [vmem:[%s6875_s7 + $0xa8] sm:$0xff] }
 0x466   : > { %3646 = vmatpush.bf16.msrb.mxu1 %v4779_v0  ;;  %3634 = vmatpush.bf16.msrb.mxu0 %v4770_v49  ;;  %v4792_v0 = vld [vmem:[%s6875_s7 + $0x120] sm:$0xff] }
 0x467   : > { %v3137_v2 = vsub.f32 0.0, %v3122_v37  ;;  %v4769_v37 = vld [vmem:[%s6875_s7 + $0x68] sm:$0xff] }
 0x468   : > { %v3039_v38 = vpop.f32.mrf.mxu3 }
 0x469   : > { %v5013_v46 = vpop.eup %5012  ;;  %v3148_v61 = vmul.f32 1.442695, %v3137_v2  ;;  %v3040_v4 = vadd.f32 %v6655_v36, %v3039_v38 }
 0x46a   : > { %v5015_v14 = vpop.eup %5014  ;;  %v3160_v51 = vadd.f32 1.0, %v5013_v46  ;;  %v3095_v16 = vpop.f32.mrf.mxu1  ;;  %3647 = vmatpush.bf16.msrb.mxu1 %v4778_v32  ;;  %3635 = vmatpush.bf16.msrb.mxu0 %v4769_v37  ;;  %v4780_v32 = vld [vmem:[%s6875_s7 + $0xc0] sm:$0xff] }
 0x46b   : > { %5016 = vpow2.f32 %v3148_v61  ;;  %v6668_v45 = vadd.f32 %v3095_v16, %v3067_v62  ;;  %v3175_v11 = vpack.c.bf16 %v5015_v14, %v5015_v14  ;;  %v3069_v3 = vadd.f32 %v3068_v15, %v3040_v4  ;;  %v3071_v21 = vpop.f32.mrf.mxu0  ;;  %v4761_v62 = vld [vmem:[%s6875_s7 + $0x28] sm:$0xff]  ;;  %v4760_v16 = vld [vmem:[%s6875_s7 + $0x20] sm:$0xff] }
 0x46c   : > { %5018 = vrcp.f32 %v3160_v51  ;;  %v4776_v51 = vld [vmem:[%s6875_s7 + $0xa0] sm:$0xff]  ;;  %3622 = vmatpush.bf16.msrb.mxu3 %v4761_v62 }
 0x46d   : > { %v3183_v33 = vunpack.c.l.b16 %v3175_v11  ;;  %v4768_v11 = vld [vmem:[%s6875_s7 + $0x60] sm:$0xff] }
 0x46e   : > { %3648 = vmatpush.bf16.msrb.mxu1 %v4777_v52  ;;  %3636 = vmatpush.bf16.msrb.mxu0 %v4768_v11 }
 0x46f   : > { %v3184_v56 = vpack.c.b16 %v3183_v33, %v3183_v33  ;;  %v4775_v33 = vld [vmem:[%s6875_s7 + $0x98] sm:$0xff] }
 0x470   : > { %v3042_v10 = vpop.f32.mrf.mxu3  ;;  %3623 = vmatpush.bf16.msrb.mxu3 %v4760_v16  ;;  %v4796_v16 = vld [vmem:[%s6875_s7 + $0x140] sm:$0xff] }
 0x471   : > { %v5017_v31 = vpop.eup %5016  ;;  %3185 = vrot.lane.b32.xlu1 %v3184_v56, %s6890_s29  ;;  %v3043_v63 = vadd.f32 %v6655_v36, %v3042_v10 }
 0x472   : > { %v5019_v30 = vpop.eup %5018  ;;  %v3161_v28 = vadd.f32 1.0, %v5017_v31  ;;  %v3097_v22 = vpop.f32.mrf.mxu1  ;;  %3649 = vmatpush.bf16.msrb.mxu1 %v4776_v51  ;;  %v4797_v51 = vld [vmem:[%s6875_s7 + $0x148] sm:$0xff] }
 0x473   : > { %v3098_v20 = vadd.f32 %v3097_v22, %v3069_v3  ;;  %v3176_v24 = vpack.c.bf16 %v5019_v30, %v5019_v30  ;;  %v3072_v26 = vadd.f32 %v3071_v21, %v3043_v63  ;;  %v3073_v40 = vpop.f32.mrf.mxu0  ;;  %v4774_v3 = vld [vmem:[%s6875_s7 + $0x90] sm:$0xff]  ;;  %v4773_v21 = vld [vmem:[%s6875_s7 + $0x88] sm:$0xff] }
 0x474   : > { %5020 = vrcp.f32 %v3161_v28 }
 0x475   : > { %v3127_v35 = vadd.f32 %v3126_v53, %v3098_v20  ;;  %v3188_v43 = vunpack.c.l.b16 %v3176_v24 }
 0x476   : > { %3650 = vmatpush.bf16.msrb.mxu1 %v4775_v33 }
 0x477   : > { %v3139_v58 = vsub.f32 0.0, %v3127_v35  ;;  %v3189_v48 = vpack.c.b16 %v3188_v43, %v3188_v43  ;;  %v4759_v35 = vld [vmem:[%s6875_s7 + $0x18] sm:$0xff] }
 0x478   : > { %v3044_v44 = vpop.f32.mrf.mxu3  ;;  %v4767_v43 = vld [vmem:[%s6875_s7 + $0x58] sm:$0xff]  ;;  %3624 = vmatpush.bf16.msrb.mxu3 %v4759_v35 }
 0x479   : > { %v3152_v27 = vmul.f32 1.442695, %v3139_v58  ;;  %3190 = vrot.lane.b32.xlu2 %v3189_v48, %s6891_s26  ;;  %v3045_v54 = vadd.f32 %v6655_v36, %v3044_v44  ;;  %v4786_v58 = vld [vmem:[%s6875_s7 + $0xf0] sm:$0xff]  ;;  %3637 = vmatpush.bf16.msrb.mxu0 %v4767_v43  ;;  %v4785_v44 = vld [vmem:[%s6875_s7 + $0xe8] sm:$0xff]  ;;  %v4849_v43 = vld [vmem:[%s6876_s8] ss:$0 sm:$0xff] }
 0x47a   : > { %v5021_v47 = vpop.eup %5020  ;;  %v3100_v17 = vpop.f32.mrf.mxu1  ;;  %3651 = vmatpush.bf16.msrb.mxu1 %v4774_v3  ;;  %v4758_v48 = vld [vmem:[%s6875_s7 + $0x10] sm:$0xff]  ;;  %3660 = vmatpush.bf16.msrb.mxu2 %v4786_v58 }
 0x47b   : > { %5022 = vpow2.f32 %v3152_v27  ;;  %v3101_v55 = vadd.f32 %v3100_v17, %v3072_v26  ;;  %v3177_v39 = vpack.c.bf16 %v5021_v47, %v5021_v47  ;;  %v3074_v5 = vadd.f32 %v3073_v40, %v3045_v54  ;;  %v4766_v27 = vld [vmem:[%s6875_s7 + $0x50] sm:$0xff]  ;;  %v4757_v26 = vld [vmem:[%s6875_s7 + $0x8] sm:$0xff]  ;;  %v4756_v17 = vld [vmem:[%s6875_s7] sm:$0xff] }
 0x47c   : > { %3625 = vmatpush.bf16.msrb.mxu3 %v4758_v48  ;;  %v4765_v47 = vld [vmem:[%s6875_s7 + $0x48] sm:$0xff]  ;;  %v4802_v40 = vld [vmem:[%s6875_s7 + $0x170] sm:$0xff] }
 0x47d   : > { %v3130_v59 = vadd.f32 %v3129_v13, %v3101_v55  ;;  %v3193_v18 = vunpack.c.l.b16 %v3177_v39  ;;  %v4772_v13 = vld [vmem:[%s6875_s7 + $0x80] sm:$0xff]  ;;  %3638 = vmatpush.bf16.msrb.mxu0 %v4766_v27  ;;  %v3115_v39 = vadd.f32 %v6657_v57, %v6660_v34  ;;  %v4783_v57 = vld [vmem:[%s6875_s7 + $0xd8] sm:$0xff]  ;;  %v4794_v34 = vld [vmem:[%s6875_s7 + $0x130] sm:$0xff] }
 0x47e   : > { %3652 = vmatpush.bf16.msrb.mxu1 %v4773_v21  ;;  %v4764_v55 = vld [vmem:[%s6875_s7 + $0x40] sm:$0xff]  ;;  %3661 = vmatpush.bf16.msrb.mxu2 %v4785_v44 }
 0x47f   : > { %v3140_v25 = vsub.f32 0.0, %v3130_v59  ;;  %v3194_v7 = vpack.c.b16 %v3193_v18, %v3193_v18  ;;  %v3134_v54 = vsub.f32 0.0, %v3115_v39  ;;  %v4784_v59 = vld [vmem:[%s6875_s7 + $0xe0] sm:$0xff]  ;;  %v4795_v18 = vld [vmem:[%s6875_s7 + $0x138] sm:$0xff] }
 0x480   : > { %3626 = vmatpush.bf16.msrb.mxu3 %v4757_v26 }
 0x481   : > { %v5023_v1 = vpop.eup %5022  ;;  %v3154_v42 = vmul.f32 1.442695, %v3140_v25  ;;  %3195 = vrot.lane.b32.xlu2 %v3194_v7, %s6889_s16  ;;  %3639 = vmatpush.bf16.msrb.mxu0 %v4765_v47  ;;  %v4803_v25 = vld [vmem:[%s6875_s7 + $0x178] sm:$0xff]  ;;  %v3142_v7 = vmul.f32 1.442695, %v3134_v54 }
 0x482   : > { %v3163_v19 = vadd.f32 1.0, %v5023_v1  ;;  %v3102_v36 = vpop.f32.mrf.mxu1  ;;  %3653 = vmatpush.bf16.msrb.mxu1 %v4772_v13  ;;  %3662 = vmatpush.bf16.msrb.mxu2 %v4784_v59  ;;  %v4793_v1 = vld [vmem:[%s6875_s7 + $0x128] sm:$0xff] }
 0x483   : > { %5024 = vpow2.f32 %v3154_v42  ;;  %v3103_v50 = vadd.f32 %v3102_v36, %v3074_v5  ;;  %v4782_v42 = vld [vmem:[%s6875_s7 + $0xd0] sm:$0xff]  ;;  %v4801_v5 = vld [vmem:[%s6875_s7 + $0x168] sm:$0xff] }
 0x484   : > { %5026 = vrcp.f32 %v3163_v19  ;;  %3627 = vmatpush.bf16.msrb.mxu3 %v4756_v17  ;;  %v4800_v19 = vld [vmem:[%s6875_s7 + $0x160] sm:$0xff] }
 0x485   : > { %v3132_v6 = vadd.f32 %v3131_v29, %v3103_v50  ;;  %3640 = vmatpush.bf16.msrb.mxu0 %v4764_v55  ;;  %v4791_v50 = vld [vmem:[%s6875_s7 + $0x118] sm:$0xff]  ;;  %v4790_v29 = vld [vmem:[%s6875_s7 + $0x110] sm:$0xff] }
 0x486   : > { %3663 = vmatpush.bf16.msrb.mxu2 %v4783_v57 }
 0x487   : > { %v3141_v41 = vsub.f32 0.0, %v3132_v6 }
 0x488   : > { %3672 = vmatpush.bf16.msra.mxu3 %v4795_v18 }
 0x489   : > { %v5025_v2 = vpop.eup %5024  ;;  %v3156_v38 = vmul.f32 1.442695, %v3141_v41  ;;  %3685 = vmatpush.bf16.msra.mxu0 %v4803_v25  ;;  %v3125_v41 = vadd.f32 %v6666_v9, %v6668_v45  ;;  %v4788_v9 = vld [vmem:[%s6875_s7 + $0x100] sm:$0xff]  ;;  %v4798_v45 = vld [vmem:[%s6875_s7 + $0x150] sm:$0xff] }
 0x48a   : > { %v5027_v46 = vpop.eup %5026  ;;  %v3164_v61 = vadd.f32 1.0, %v5025_v2  ;;  %3664 = vmatpush.bf16.msrb.mxu2 %v4782_v42 }
 0x48b   : > { %5028 = vpow2.f32 %v3156_v38  ;;  %v3179_v14 = vpack.c.bf16 %v5027_v46, %v5027_v46  ;;  %v3138_v37 = vsub.f32 0.0, %v3125_v41  ;;  %v4789_v46 = vld [vmem:[%s6875_s7 + $0x108] sm:$0xff] }
 0x48c   : > { %5030 = vrcp.f32 %v3164_v61  ;;  %3673 = vmatpush.bf16.msra.mxu3 %v4794_v34  ;;  %v4799_v61 = vld [vmem:[%s6875_s7 + $0x158] sm:$0xff] }
 0x48d   : > { %v3198_v15 = vunpack.c.l.b16 %v3179_v14  ;;  %3686 = vmatpush.bf16.msra.mxu0 %v4802_v40  ;;  %v3150_v14 = vmul.f32 1.442695, %v3138_v37 }
 0x48e   : > { %3665 = vmatpush.bf16.msrb.mxu2 %v4781_v8 }
 0x48f   : > { %v3199_v4 = vpack.c.b16 %v3198_v15, %v3198_v15 }
 0x490   : > { %3674 = vmatpush.bf16.msra.mxu3 %v4793_v1 }
 0x491   : > { %v5029_v56 = vpop.eup %5028  ;;  %3200 = vrot.lane.b32.xlu0 %v3199_v4, %s6890_s29  ;;  %3687 = vmatpush.bf16.msra.mxu0 %v4801_v5  ;;  %s3778_s29 = sshll.u32 %s323_s24, 3 }
 0x492   : > { %v5031_v10 = vpop.eup %5030  ;;  %v3165_v31 = vadd.f32 1.0, %v5029_v56  ;;  %3666 = vmatpush.bf16.msrb.mxu2 %v4780_v32  ;;  %s325_s22 = scalar_lea.vmem [#allocation2], %s3778_s29 }
 0x493   : > { %v3180_v53 = vpack.c.bf16 %v5031_v10, %v5031_v10  ;;  %s3712_s23 = sshll.u32 %s325_s22, 4  ;;  %s3713_s23 = int_to_ptr.vmem [resolvable:$true] %s3712_s23 }
 0x494   : > { %5032 = vrcp.f32 %v3165_v31  ;;  %3675 = vmatpush.bf16.msra.mxu3 %v4792_v0 }
 0x495   : > { %v3203_v30 = vunpack.c.l.b16 %v3180_v53  ;;  %5034 = vpow2.f32 %v3142_v7  ;;  %3688 = vmatpush.bf16.msra.mxu0 %v4800_v19 }
 0x497   : > { %v3204_v28 = vpack.c.b16 %v3203_v30, %v3203_v30 }
 0x498   : > { %3676 = vmatpush.bf16.msra.mxu3 %v4791_v50 }
 0x499   : > { %3205 = vrot.lane.b32.xlu1 %v3204_v28, %s6891_s26  ;;  %3689 = vmatpush.bf16.msra.mxu0 %v4799_v61  ;;  %s5056_s26 = sshra.s32 %s3715_s17, 4  ;;  %s5057_s26 = int_to_ptr.hbm [resolvable:$true] %s5056_s26 }
 0x49a   : > { %v5033_v22 = vpop.eup %5032  ;;  %s5058_s0 = scalar_lea.hbm %s5057_s26, 8  ;;  %p5063_p0 = scmp.lt.s32.totalorder %s5057_s26, %s6877_s9 }
 0x49b   : > { %v3181_v20 = vpack.c.bf16 %v5033_v22, %v5033_v22  ;;  %v5035_v36 = vpop.eup %5034  ;;  %p5059_p11 = scmp.ne.s32.totalorder %s5057_s26, %s5058_s0  ;;  %p5064_p1 = scmp.lt.s32.totalorder %s5062_s21, %s5058_s0 }
 0x49c   : > { %v3158_v12 = vadd.f32 1.0, %v5035_v36  ;;  %3677 = vmatpush.bf16.msra.mxu3 %v4790_v29 }
 0x49d   : > { %v3208_v24 = vunpack.c.l.b16 %v3181_v20  ;;  %3690 = vmatpush.bf16.msra.mxu0 %v4798_v45  ;;  %p5060_p12 = pnand %p5059_p11, %p5198_p5  ;;  %p5065_p2 = por %p5064_p1, %p5063_p0 }
 0x49e   : > { %5036 = vrcp.f32 %v3158_v12 }
 0x49f   : > { %v3209_v63 = vpack.c.b16 %v3208_v24, %v3208_v24  ;;  %5038 = vpow2.f32 %v3150_v14  ;;  %p5061_p13 = pneg %p5060_p12 }
 0x4a0   : > { %3678 = vmatpush.bf16.msra.mxu3 %v4789_v46 }
 0x4a1   : > { %3210 = vrot.lane.b32.xlu0 %v3209_v63, %s6889_s16  ;;  %3691 = vmatpush.bf16.msra.mxu0 %v4797_v51  ;;  %p5066_p3 = pnand %p5065_p2, %p5061_p13 }
 0x4a4   : > { %v5037_v6 = vpop.eup %5036  ;;  %3679 = vmatpush.bf16.msra.mxu3 %v4788_v9 }
 0x4a5   : > { %v3174_v52 = vpack.c.bf16 %v5037_v6, %v5037_v6  ;;  %v5039_v11 = vpop.eup %5038  ;;  %3692 = vmatpush.bf16.msra.mxu0 %v4796_v16 }
 0x4a6   : > { %v3162_v15 = vadd.f32 1.0, %v5039_v11 }
 0x4a8   : > { %5040 = vrcp.f32 %v3162_v15 }
 0x4ae   : > { %v5041_v4 = vpop.eup %5040 }
 0x4af   : > { %v3178_v33 = vpack.c.bf16 %v5041_v4, %v5041_v4 }
 0x4d3   : > { %v3191_v23 = vpop.permute.xlu2 %3190 }
 0x4db   : > { %v3196_v49 = vpop.permute.xlu2 %3195 }
 0x4dc   : > { %v3220_v60 = vsel %vm680_vm3, %v3191_v23, %v3196_v49 }
 0x4dd   : > { %3654 = vmatmul.bf16.vlgmr.msrb.gmra.mxu1 %v3220_v60 }
 0x4e3   : > { %v3186_v62 = vpop.permute.xlu1 %3185 }
 0x4e4   : > { %v3214_v2 = vsel %vm630_vm1, %v3174_v52, %v3186_v62  ;;  %v3217_v38 = vsel %vm655_vm2, %v3186_v62, %v3191_v23 }
 0x4e5   : > { %3628 = vmatmul.bf16.vlgmr.msrb.gmra.mxu3 %v3214_v2  ;;  %3641 = vmatmul.bf16.vlgmr.msrb.gmra.mxu0 %v3217_v38 }
 0x503   : > { %v3201_v56 = vpop.permute.xlu0 %3200 }
 0x504   : > { %v3224_v10 = vsel %vm630_vm1, %v3178_v33, %v3201_v56 }
 0x505   : > { %3667 = vmatmul.bf16.vlgmr.msrb.gmra.mxu2 %v3224_v10 }
 0x50b   : > { %v3206_v31 = vpop.permute.xlu1 %3205 }
 0x50c   : > { %v3227_v53 = vsel %vm655_vm2, %v3201_v56, %v3206_v31 }
 0x50d   : > { %3680 = vmatmul.bf16.vlgmr.msra.gmra.mxu3 %v3227_v53 }
 0x513   : > { %v3211_v3 = vpop.permute.xlu0 %3210 }
 0x514   : > { %v3230_v30 = vsel %vm680_vm3, %v3206_v31, %v3211_v3 }
 0x515   : > { %3693 = vmatmul.bf16.vlgmr.msra.gmra.mxu0 %v3230_v30 }
 0x55a   : > { %v3655_v28 = vpop.f32.mrf.mxu1 }
 0x562   : > { %v3642_v22 = vpop.f32.mrf.mxu0  ;;  %v3657_v20 = vpop.f32.mrf.mxu1 }
 0x568   : > { %v3629_v24 = vpop.f32.mrf.mxu3 }
 0x569   : > { %v3630_v21 = vadd.f32 %v4849_v43, %v3629_v24 }
 0x56a   : > { %v3644_v63 = vpop.f32.mrf.mxu0 }
 0x56b   : > { %v3643_v48 = vadd.f32 %v3642_v22, %v3630_v21 }
 0x56d   : > { %v3656_v27 = vadd.f32 %v3655_v28, %v3643_v48 }
 0x570   : > { %v3631_v35 = vpop.f32.mrf.mxu3 }
 0x588   : > { %v3668_v58 = vpop.f32.mrf.mxu2 }
 0x589   : > { %v3669_v13 = vadd.f32 %v3668_v58, %v3656_v27 }
 0x590   : > { %v3670_v26 = vpop.f32.mrf.mxu2  ;;  %v3681_v47 = vpop.f32.mrf.mxu3 }
 0x591   : > { %v3682_v44 = vadd.f32 %v3681_v47, %v3669_v13 }
 0x592   : > { %v3694_v17 = vpop.f32.mrf.mxu0 }
 0x593   : > { %v3695_v55 = vadd.f32 %v3694_v17, %v3682_v44 }
 0x595   : > { %3698 = vst [vmem:[%s325_s22] sm:$0xff] %v3695_v55 }
 0x596   : > { %5069 = shalt.err (!%p5066_p3)
}
 0x597   : > { %4804 = dma.vmem_to_hbm [thread:$0]  (%p5198_p5), %s3713_s23, 128, %s3715_s17, %s3700_s13  }
 0x598   : > { %v3683_v39 = vpop.f32.mrf.mxu3 }
 0x59a   : > { %v3696_v54 = vpop.f32.mrf.mxu0 }
 0x59b PF: > { %p4810_p4 = scmp.ge.s32.totalorder %s5104_s12, 2  ;;  %s3726_s24 = sand.u32 1, %s5092_s30  }
 0x59c   : > { %s3727_s27 = scalar_lea.sflag [#allocation3], %s3726_s24 }
 0x59d   : > { %p4807_p7 = pnand %p4810_p4, %p5202_p6 }
 0x59f   : > { %p4808_p8 = pneg %p4807_p7 }
 0x5a1   : > { %5087 = dma.done.wait (%p4808_p8), %s3727_s27, 128  }
 0x5a2   : > { %5089 = vsyncadd (%p4808_p8), %s3727_s27, 4294967168  ;;  %s6892_s28 = sld [smem:[#allocation5_spill]]  ;;  %p19_p5 = scmp.ge.s32.totalorder %s5185_s15, 4  }
 0x5a3   : > { %s6893_s30 = smov %s5096_s10  ;;  %s6894_s10 = smov %s5100_s11 }
 0x5a4   : > { %s6896_s12 = smov %s5185_s15  ;;  %21 = sbr.rel (!%p19_p5) target bundleno = 5 (0x5), region = 91 }
 0x5a8   : > { %s6895_s11 = smov %s6892_s28 }
 0x5a9   :  { %3733 = vsyncpa [#allocation3], 1 }
 0x5aa   :  { %3735 = vsyncpa [#allocation3 + $0x1], 1 }

</bundles_post_ra>
